<compile_context>
chip_gen: v7x
topology: tpu7x:2x2x1
jax: 0.10.0
libtpu: 0.0.40
codegen_flags: <defaults>
</compile_context>

<pallas_src>
import functools

import jax
import jax.numpy as jnp
import numpy as np
from jax import lax
from jax.experimental import pallas as pl
from jax.experimental.pallas import tpu as pltpu

EPS = 1e-5  # PyTorch LayerNorm default


def _layer_norm(x, gamma, beta):
    mean = jnp.mean(x, axis=-1, keepdims=True)
    xc = x - mean
    var = jnp.mean(xc * xc, axis=-1, keepdims=True)  # biased, as in torch
    return xc * lax.rsqrt(var + EPS) * gamma + beta


# ---------------------------------------------------------------------------
# Fused kernel: embedding + all encoder layers (grid axis) + mean-pool + fc.
# ---------------------------------------------------------------------------
def fused_transformer_kernel(tok_ref, emb_ref, pos_ref,
                             wqkv_ref, bqkv_ref, wo_ref, bo_ref,
                             g1_ref, be1_ref,
                             w1_ref, s1_ref, b1_ref,
                             w2_ref, s2_ref, b2_ref,
                             g2_ref, be2_ref,
                             wfc_ref, bfc_ref,
                             out_ref, x_scr,
                             *, num_heads, head_dim, batch, seq):
    layer = pl.program_id(0)
    E = num_heads * head_dim
    BS = batch * seq
    bf16 = jnp.bfloat16
    f32 = jnp.float32

    # ---- layer 0: fused embedding gather (one-hot matmul) + positional add -
    @pl.when(layer == 0)
    def _():
        vocab_pad = emb_ref.shape[0]
        tok = tok_ref[...]                                        # (BS,1) i32
        onehot = (tok == lax.broadcasted_iota(jnp.int32, (BS, vocab_pad), 1)
                  ).astype(f32)
        x_scr[...] = (jnp.dot(onehot, emb_ref[...],
                              preferred_element_type=f32) + pos_ref[...])

    x = x_scr[...]                      # (BS, E) f32, resident across layers
    xb = x.astype(bf16)

    # ---- fused QKV projection (one MXU matmul for Q, K and V) --------------
    qkv = jnp.dot(xb, wqkv_ref[0], preferred_element_type=f32) + bqkv_ref[0]
    q, k, v = qkv[:, :E], qkv[:, E:2 * E], qkv[:, 2 * E:]

    # ---- multi-head attention: single batched einsum pair over B*H ---------
    def split_heads(t):                 # (BS, E) -> (B*H, S, D)
        t4 = t.reshape(batch, seq, num_heads, head_dim)
        return (t4.transpose(0, 2, 1, 3)
                  .reshape(batch * num_heads, seq, head_dim).astype(bf16))

    qh, kh, vh = split_heads(q), split_heads(k), split_heads(v)
    scale = 1.0 / (head_dim ** 0.5)
    s = jnp.einsum("bqd,bkd->bqk", qh, kh,
                   preferred_element_type=f32) * scale
    s = s - jnp.max(s, axis=-1, keepdims=True)
    p = jnp.exp(s)
    p = p * pl.reciprocal(jnp.sum(p, axis=-1, keepdims=True), approx=True)
    ctx = jnp.einsum("bqk,bkd->bqd", p.astype(bf16), vh,
                     preferred_element_type=f32)
    ctx2d = (ctx.reshape(batch, num_heads, seq, head_dim)
                .transpose(0, 2, 1, 3).reshape(BS, E))

    attn = jnp.dot(ctx2d.astype(bf16), wo_ref[0],
                   preferred_element_type=f32) + bo_ref[0]
    x = _layer_norm(x + attn, g1_ref[0], be1_ref[0])     # post-LN

    # ---- feed-forward: int8 weights, dequant to bf16, scale folded post-dot
    xb2 = x.astype(bf16)
    w1 = w1_ref[0].astype(f32).astype(bf16)               # int8 -> bf16 (exact)
    h = jnp.dot(xb2, w1, preferred_element_type=f32) * s1_ref[0] + b1_ref[0]
    h = jnp.maximum(h, 0.0).astype(bf16)                   # relu
    w2 = w2_ref[0].astype(f32).astype(bf16)
    ffn = jnp.dot(h, w2, preferred_element_type=f32) * s2_ref[0] + b2_ref[0]
    x = _layer_norm(x + ffn, g2_ref[0], be2_ref[0])
    x_scr[...] = x

    # ---- after the last layer: mean-pool over sequence + classifier --------
    @pl.when(layer == pl.num_programs(0) - 1)
    def _():
        pooled = jnp.mean(x.reshape(batch, seq, E), axis=1)       # (B, E)
        rows = out_ref.shape[0]
        if rows > batch:                                          # full-tile store
            pooled = jnp.concatenate(
                [pooled, jnp.zeros((rows - batch, E), pooled.dtype)], axis=0)
        out_ref[...] = (jnp.dot(pooled.astype(bf16), wfc_ref[...],
                                preferred_element_type=f32) + bfc_ref[...])


# ---------------------------------------------------------------------------
# Wrapper: everything runs in the single fused Pallas kernel.
# ---------------------------------------------------------------------------
def transformer_classifier_forward(tokens, params, *, num_heads, num_classes):
    B, S = tokens.shape
    E = params["emb"].shape[1]
    L = params["w_qkv"].shape[0]
    C_pad = params["w_fc"].shape[1]
    head_dim = E // num_heads
    B_pad = max(8, ((B + 7) // 8) * 8)          # f32 sublane-tile-dense output

    tok2d = tokens.reshape(B * S, 1).astype(jnp.int32)
    pos_slab = jnp.tile(params["pos"][0, :S, :], (B, 1)).astype(jnp.float32)

    kernel = functools.partial(
        fused_transformer_kernel, num_heads=num_heads, head_dim=head_dim,
        batch=B, seq=S)

    def layer_spec(a):      # stacked weights: stream one layer per grid step
        return pl.BlockSpec((1,) + a.shape[1:], lambda l: (l, 0, 0))

    def resident_spec(a):   # same block every step -> stays resident in VMEM
        n = a.ndim
        return pl.BlockSpec(a.shape, lambda l, _n=n: (0,) * _n)

    stream = [params["w_qkv"], params["b_qkv"], params["w_o"], params["b_o"],
              params["g1"], params["be1"],
              params["w1q"], params["s1"], params["b1"],
              params["w2q"], params["s2"], params["b2"],
              params["g2"], params["be2"]]

    in_specs = ([resident_spec(tok2d), resident_spec(params["emb"]),
                 resident_spec(pos_slab)]
                + [layer_spec(a) for a in stream]
                + [resident_spec(params["w_fc"]), resident_spec(params["b_fc"])])

    # TODO(synk): on v5e the first layer's weight DMA prologue is still exposed;
    # a cross-call prefetch (SEMAPHORE/VMEM future) would hide it.
    logits_pad = pl.pallas_call(
        kernel,
        out_shape=jax.ShapeDtypeStruct((B_pad, C_pad), jnp.float32),
        grid=(L,),
        in_specs=in_specs,
        out_specs=pl.BlockSpec((B_pad, C_pad), lambda l: (0, 0)),
        scratch_shapes=[pltpu.VMEM((B * S, E), jnp.float32)],
        compiler_params=pltpu.CompilerParams(
            dimension_semantics=("arbitrary",),          # sequential layer carry
            vmem_limit_bytes=32 * 1024 * 1024),          # safe on v5e/v6e/v7x
    )(tok2d, params["emb"], pos_slab, *stream, params["w_fc"], params["b_fc"])

    return logits_pad[:B, :num_classes]


# ---------------------------------------------------------------------------
# Pure-JAX reference (same math / same bf16 + int8-dequant sites).
# ---------------------------------------------------------------------------
def reference_forward(tokens, params, *, num_heads, num_classes):
    B, S = tokens.shape
    E = params["emb"].shape[1]
    dh = E // num_heads
    L = params["w_qkv"].shape[0]
    bf16 = jnp.bfloat16
    f32 = jnp.float32

    x = (params["emb"][tokens] + params["pos"][:, :S, :]).astype(f32)

    def bdot(a, w):
        return jnp.dot(a.astype(bf16), w.astype(bf16), preferred_element_type=f32)

    for l in range(L):
        qkv = bdot(x, params["w_qkv"][l]) + params["b_qkv"][l]
        q, k, v = qkv[..., :E], qkv[..., E:2 * E], qkv[..., 2 * E:]
        qh = q.reshape(B, S, num_heads, dh).astype(bf16)
        kh = k.reshape(B, S, num_heads, dh).astype(bf16)
        vh = v.reshape(B, S, num_heads, dh).astype(bf16)
        s = jnp.einsum("bqhd,bkhd->bhqk", qh, kh,
                       preferred_element_type=f32) / (dh ** 0.5)
        p = jax.nn.softmax(s, axis=-1)
        ctx = jnp.einsum("bhqk,bkhd->bqhd", p.astype(bf16), vh,
                         preferred_element_type=f32).reshape(B, S, E)
        attn = bdot(ctx, params["w_o"][l]) + params["b_o"][l]
        x = _layer_norm(x + attn, params["g1"][l], params["be1"][l])
        w1 = params["w1q"][l].astype(f32).astype(bf16)
        h = jnp.maximum(bdot(x, w1) * params["s1"][l] + params["b1"][l], 0.0)
        w2 = params["w2q"][l].astype(f32).astype(bf16)
        ffn = bdot(h, w2) * params["s2"][l] + params["b2"][l]
        x = _layer_norm(x + ffn, params["g2"][l], params["be2"][l])
    pooled = jnp.mean(x, axis=1)
    logits = bdot(pooled, params["w_fc"]) + params["b_fc"]
    return logits[:, :num_classes]


# ---------------------------------------------------------------------------
# Deterministic synthetic parameter init (stacked / packed kernel layout).
# ---------------------------------------------------------------------------
def init_params(key, *, vocab_size, max_length, num_classes,
                embed_dim, num_layers, dim_feedforward):
    E, F = embed_dim, dim_feedforward
    keys = iter(jax.random.split(key, 4 + 12 * num_layers))

    def nrm(shape, scale=0.02):
        return (scale * jax.random.normal(next(keys), shape)).astype(jnp.float32)

    vocab_pad = ((vocab_size + 127) // 128) * 128          # lane-clean one-hot dot
    emb = jnp.zeros((vocab_pad, E), jnp.float32).at[:vocab_size].set(
        nrm((vocab_size, E)))
    # nn.Parameter(torch.zeros(...)) in the module; random here so the
    # positional add is actually exercised by this synthetic test.
    pos = nrm((1, max_length, E))

    def quant_cols(w):                 # int8 per-output-column symmetric quant
        s = jnp.maximum(jnp.max(jnp.abs(w), axis=0, keepdims=True) / 127.0, 1e-8)
        q = jnp.clip(jnp.round(w / s), -127.0, 127.0).astype(jnp.int8)
        return q, s.astype(jnp.float32)

    wqkv, bqkv, wo, bo = [], [], [], []
    w1q, s1, b1, w2q, s2, b2 = [], [], [], [], [], []
    for _ in range(num_layers):
        wq, wk, wv = nrm((E, E)), nrm((E, E)), nrm((E, E))
        bq, bk, bv = nrm((1, E)), nrm((1, E)), nrm((1, E))
        wqkv.append(jnp.concatenate([wq, wk, wv], axis=1))   # (E, 3E)
        bqkv.append(jnp.concatenate([bq, bk, bv], axis=1))   # (1, 3E)
        wo.append(nrm((E, E))); bo.append(nrm((1, E)))
        q1, sc1 = quant_cols(nrm((E, F))); w1q.append(q1); s1.append(sc1)
        b1.append(nrm((1, F)))
        q2, sc2 = quant_cols(nrm((F, E))); w2q.append(q2); s2.append(sc2)
        b2.append(nrm((1, E)))

    wfc = nrm((E, num_classes)); bfc = nrm((1, num_classes))
    C_pad = ((num_classes + 127) // 128) * 128               # lane-dense output
    wfc_pad = jnp.zeros((E, C_pad), jnp.float32).at[:, :num_classes].set(wfc)
    bfc_pad = jnp.zeros((1, C_pad), jnp.float32).at[:, :num_classes].set(bfc)

    bf16 = jnp.bfloat16
    return {
        "emb": emb, "pos": pos,
        "w_qkv": jnp.stack(wqkv).astype(bf16), "b_qkv": jnp.stack(bqkv),
        "w_o": jnp.stack(wo).astype(bf16), "b_o": jnp.stack(bo),
        "g1": jnp.ones((num_layers, 1, E), jnp.float32),
        "be1": jnp.zeros((num_layers, 1, E), jnp.float32),
        "w1q": jnp.stack(w1q), "s1": jnp.stack(s1), "b1": jnp.stack(b1),
        "w2q": jnp.stack(w2q), "s2": jnp.stack(s2), "b2": jnp.stack(b2),
        "g2": jnp.ones((num_layers, 1, E), jnp.float32),
        "be2": jnp.zeros((num_layers, 1, E), jnp.float32),
        "w_fc": wfc_pad.astype(bf16), "b_fc": bfc_pad,
    }


if __name__ == "__main__":
    VOCAB, MAX_LEN, NUM_CLASSES = 50, 16, 3
    EMBED_DIM, NUM_HEADS, NUM_LAYERS = 128, 8, 2
    DIM_FF = 2048                      # nn.TransformerEncoderLayer default
    B, S = 2, 8

    key = jax.random.PRNGKey(0)
    pkey, tkey = jax.random.split(key)
    params = init_params(pkey, vocab_size=VOCAB, max_length=MAX_LEN,
                         num_classes=NUM_CLASSES, embed_dim=EMBED_DIM,
                         num_layers=NUM_LAYERS, dim_feedforward=DIM_FF)
    tokens = jax.random.randint(tkey, (B, S), 0, VOCAB, dtype=jnp.int32)

    fwd = jax.jit(functools.partial(transformer_classifier_forward,
                                    num_heads=NUM_HEADS,
                                    num_classes=NUM_CLASSES))
    out = jax.block_until_ready(fwd(tokens, params))

    ref = reference_forward(tokens, params, num_heads=NUM_HEADS,
                            num_classes=NUM_CLASSES)
    np.testing.assert_allclose(np.asarray(out), np.asarray(ref),
                               rtol=2e-2, atol=1e-2)

    assert out.shape == (B, NUM_CLASSES)
    print("KERNEL_OK")
</pallas_src>

<mosaic_0001>
module attributes {stable_mosaic.version = 11 : i64} {
  func.func @fused_transformer_kernel(%arg0: i32, %arg1: memref<16x1xi32, #tpu.memory_space<vmem>>, %arg2: memref<128x128xf32, #tpu.memory_space<vmem>>, %arg3: memref<16x128xf32, #tpu.memory_space<vmem>>, %arg4: memref<1x128x384xbf16, #tpu.memory_space<vmem>>, %arg5: memref<1x1x384xf32, #tpu.memory_space<vmem>>, %arg6: memref<1x128x128xbf16, #tpu.memory_space<vmem>>, %arg7: memref<1x1x128xf32, #tpu.memory_space<vmem>>, %arg8: memref<1x1x128xf32, #tpu.memory_space<vmem>>, %arg9: memref<1x1x128xf32, #tpu.memory_space<vmem>>, %arg10: memref<1x128x2048xi8, #tpu.memory_space<vmem>>, %arg11: memref<1x1x2048xf32, #tpu.memory_space<vmem>>, %arg12: memref<1x1x2048xf32, #tpu.memory_space<vmem>>, %arg13: memref<1x2048x128xi8, #tpu.memory_space<vmem>>, %arg14: memref<1x1x128xf32, #tpu.memory_space<vmem>>, %arg15: memref<1x1x128xf32, #tpu.memory_space<vmem>>, %arg16: memref<1x1x128xf32, #tpu.memory_space<vmem>>, %arg17: memref<1x1x128xf32, #tpu.memory_space<vmem>>, %arg18: memref<128x128xbf16, #tpu.memory_space<vmem>>, %arg19: memref<1x128xf32, #tpu.memory_space<vmem>>, %arg20: memref<8x128xf32, #tpu.memory_space<vmem>>, %arg21: memref<16x128xf32, #tpu.memory_space<vmem>>) attributes {dimension_semantics = [#tpu.dimension_semantics<arbitrary>], iteration_bounds = array<i64: 2>, scalar_prefetch = 0 : i64, scratch_operands = 1 : i64, tpu.core_type = #tpu.core_type<tc>, window_params = [{pipeline_mode = #tpu.pipeline_mode<synchronous>, transform_indices = @transform_0, window_bounds = array<i64: 16, 1>}, {pipeline_mode = #tpu.pipeline_mode<synchronous>, transform_indices = @transform_1, window_bounds = array<i64: 128, 128>}, {pipeline_mode = #tpu.pipeline_mode<synchronous>, transform_indices = @transform_2, window_bounds = array<i64: 16, 128>}, {transform_indices = @transform_3, window_bounds = array<i64: 1, 128, 384>}, {transform_indices = @transform_4, window_bounds = array<i64: 1, 1, 384>}, {transform_indices = @transform_5, window_bounds = array<i64: 1, 128, 128>}, {transform_indices = @transform_6, window_bounds = array<i64: 1, 1, 128>}, {transform_indices = @transform_7, window_bounds = array<i64: 1, 1, 128>}, {transform_indices = @transform_8, window_bounds = array<i64: 1, 1, 128>}, {transform_indices = @transform_9, window_bounds = array<i64: 1, 128, 2048>}, {transform_indices = @transform_10, window_bounds = array<i64: 1, 1, 2048>}, {transform_indices = @transform_11, window_bounds = array<i64: 1, 1, 2048>}, {transform_indices = @transform_12, window_bounds = array<i64: 1, 2048, 128>}, {transform_indices = @transform_13, window_bounds = array<i64: 1, 1, 128>}, {transform_indices = @transform_14, window_bounds = array<i64: 1, 1, 128>}, {transform_indices = @transform_15, window_bounds = array<i64: 1, 1, 128>}, {transform_indices = @transform_16, window_bounds = array<i64: 1, 1, 128>}, {pipeline_mode = #tpu.pipeline_mode<synchronous>, transform_indices = @transform_17, window_bounds = array<i64: 128, 128>}, {pipeline_mode = #tpu.pipeline_mode<synchronous>, transform_indices = @transform_18, window_bounds = array<i64: 1, 128>}, {pipeline_mode = #tpu.pipeline_mode<synchronous>, transform_indices = @transform_19, window_bounds = array<i64: 8, 128>}]} {
    %c0_i32 = arith.constant 0 : i32
    %0 = arith.cmpi eq, %arg0, %c0_i32 : i32
    %1 = arith.extui %0 : i1 to i32
    %c0_i32_0 = arith.constant 0 : i32
    %2 = arith.cmpi ne, %1, %c0_i32_0 : i32
    scf.if %2 {
      %c0_66 = arith.constant 0 : index
      %c0_67 = arith.constant 0 : index
      %137 = vector.load %arg1[%c0_66, %c0_67] : memref<16x1xi32, #tpu.memory_space<vmem>>, vector<16x1xi32>
      %138 = tpu.iota {dimensions = array<i32: 1>} : vector<16x128xi32>
      %139 = vector.broadcast %137 : vector<16x1xi32> to vector<16x128xi32>
      %140 = arith.cmpi eq, %139, %138 : vector<16x128xi32>
      %141 = arith.extui %140 : vector<16x128xi1> to vector<16x128xi32>
      %142 = arith.sitofp %141 : vector<16x128xi32> to vector<16x128xf32>
      %c0_68 = arith.constant 0 : index
      %c0_69 = arith.constant 0 : index
      %143 = vector.load %arg2[%c0_68, %c0_69] : memref<128x128xf32, #tpu.memory_space<vmem>>, vector<128x128xf32>
      %cst_70 = arith.constant dense<0.000000e+00> : vector<16x128xf32>
      %144 = tpu.matmul %142, %143, %cst_70 {dimension_numbers = #tpu.dot_dimension_numbers<[1], [0], [0], [1], [0, 0, 1, 1], [], []>} : vector<16x128xf32>, vector<128x128xf32>, vector<16x128xf32> -> vector<16x128xf32>
      %c0_71 = arith.constant 0 : index
      %c0_72 = arith.constant 0 : index
      %145 = vector.load %arg3[%c0_71, %c0_72] : memref<16x128xf32, #tpu.memory_space<vmem>>, vector<16x128xf32>
      %146 = arith.addf %144, %145 : vector<16x128xf32>
      %c0_73 = arith.constant 0 : index
      %c0_74 = arith.constant 0 : index
      %147 = vector.load %arg21[%c0_73, %c0_74] : memref<16x128xf32, #tpu.memory_space<vmem>>, vector<16x128xf32>
      tpu.vector_store %arg21[%c0_73, %c0_74], %146 {strides = array<i32>} : memref<16x128xf32, #tpu.memory_space<vmem>>, vector<16x128xf32>,
    } else {
    }
    %c0 = arith.constant 0 : index
    %c0_1 = arith.constant 0 : index
    %3 = vector.load %arg21[%c0, %c0_1] : memref<16x128xf32, #tpu.memory_space<vmem>>, vector<16x128xf32>
    %4 = arith.truncf %3 : vector<16x128xf32> to vector<16x128xbf16>
    %c0_2 = arith.constant 0 : index
    %c0_3 = arith.constant 0 : index
    %c0_4 = arith.constant 0 : index
    %5 = vector.load %arg4[%c0_2, %c0_3, %c0_4] : memref<1x128x384xbf16, #tpu.memory_space<vmem>>, vector<1x128x384xbf16>
    %6 = vector.shape_cast %5 : vector<1x128x384xbf16> to vector<128x384xbf16>
    %cst = arith.constant dense<0.000000e+00> : vector<16x384xf32>
    %7 = tpu.matmul %4, %6, %cst {dimension_numbers = #tpu.dot_dimension_numbers<[1], [0], [0], [1], [0, 0, 1, 1], [], []>} : vector<16x128xbf16>, vector<128x384xbf16>, vector<16x384xf32> -> vector<16x384xf32>
    %c0_5 = arith.constant 0 : index
    %c0_6 = arith.constant 0 : index
    %c0_7 = arith.constant 0 : index
    %8 = vector.load %arg5[%c0_5, %c0_6, %c0_7] : memref<1x1x384xf32, #tpu.memory_space<vmem>>, vector<1x1x384xf32>
    %9 = vector.shape_cast %8 : vector<1x1x384xf32> to vector<1x384xf32>
    %10 = vector.broadcast %9 : vector<1x384xf32> to vector<16x384xf32>
    %11 = arith.addf %7, %10 : vector<16x384xf32>
    %12 = vector.extract_strided_slice %11 {offsets = [0, 0], sizes = [16, 128], strides = [1, 1]} : vector<16x384xf32> to vector<16x128xf32>
    %13 = vector.extract_strided_slice %11 {offsets = [0, 128], sizes = [16, 128], strides = [1, 1]} : vector<16x384xf32> to vector<16x128xf32>
    %14 = vector.extract_strided_slice %11 {offsets = [0, 256], sizes = [16, 128], strides = [1, 1]} : vector<16x384xf32> to vector<16x128xf32>
    %15 = vector.shape_cast %12 : vector<16x128xf32> to vector<2x8x8x16xf32>
    %16 = tpu.transpose %15, [0, 2, 1, 3] : vector<2x8x8x16xf32> -> vector<2x8x8x16xf32>
    %17 = vector.shape_cast %16 : vector<2x8x8x16xf32> to vector<16x8x16xf32>
    %18 = arith.truncf %17 : vector<16x8x16xf32> to vector<16x8x16xbf16>
    %19 = vector.shape_cast %13 : vector<16x128xf32> to vector<2x8x8x16xf32>
    %20 = tpu.transpose %19, [0, 2, 1, 3] : vector<2x8x8x16xf32> -> vector<2x8x8x16xf32>
    %21 = vector.shape_cast %20 : vector<2x8x8x16xf32> to vector<16x8x16xf32>
    %22 = arith.truncf %21 : vector<16x8x16xf32> to vector<16x8x16xbf16>
    %23 = vector.shape_cast %14 : vector<16x128xf32> to vector<2x8x8x16xf32>
    %24 = tpu.transpose %23, [0, 2, 1, 3] : vector<2x8x8x16xf32> -> vector<2x8x8x16xf32>
    %25 = vector.shape_cast %24 : vector<2x8x8x16xf32> to vector<16x8x16xf32>
    %26 = arith.truncf %25 : vector<16x8x16xf32> to vector<16x8x16xbf16>
    "tpu.trace_start"() <{level = 10 : i32, message = "bqd,bkd->bqk"}> : () -> ()
    %cst_8 = arith.constant dense<0.000000e+00> : vector<16x8x8xf32>
    %27 = tpu.matmul %18, %22, %cst_8 {dimension_numbers = #tpu.dot_dimension_numbers<[2], [2], [1], [1], [0, 0, 0, 1, 1, 1], [0], [0]>} : vector<16x8x16xbf16>, vector<16x8x16xbf16>, vector<16x8x8xf32> -> vector<16x8x8xf32>
    "tpu.trace_stop"() : () -> ()
    %cst_9 = arith.constant 2.500000e-01 : f32
    %28 = vector.broadcast %cst_9 : f32 to vector<16x8x8xf32>
    %29 = arith.mulf %27, %28 : vector<16x8x8xf32>
    %cst_10 = arith.constant dense<0xFF800000> : vector<16x8xf32>
    %30 = vector.multi_reduction <maximumf>, %29, %cst_10 [2] : vector<16x8x8xf32> to vector<16x8xf32>
    %31 = vector.shape_cast %30 : vector<16x8xf32> to vector<16x8x1xf32>
    %32 = vector.broadcast %31 : vector<16x8x1xf32> to vector<16x8x8xf32>
    %33 = arith.subf %29, %32 : vector<16x8x8xf32>
    %34 = math.exp %33 : vector<16x8x8xf32>
    %cst_11 = arith.constant dense<0.000000e+00> : vector<16x8xf32>
    %35 = vector.multi_reduction <add>, %34, %cst_11 [2] : vector<16x8x8xf32> to vector<16x8xf32>
    %36 = vector.shape_cast %35 : vector<16x8xf32> to vector<16x8x1xf32>
    %37 = tpu.reciprocal %36 {approx = true} : vector<16x8x1xf32> -> vector<16x8x1xf32>
    %38 = vector.broadcast %37 : vector<16x8x1xf32> to vector<16x8x8xf32>
    %39 = arith.mulf %34, %38 : vector<16x8x8xf32>
    %40 = arith.truncf %39 : vector<16x8x8xf32> to vector<16x8x8xbf16>
    "tpu.trace_start"() <{level = 10 : i32, message = "bqk,bkd->bqd"}> : () -> ()
    %cst_12 = arith.constant dense<0.000000e+00> : vector<16x8x16xf32>
    %41 = tpu.matmul %40, %26, %cst_12 {dimension_numbers = #tpu.dot_dimension_numbers<[2], [1], [1], [2], [0, 0, 0, 1, 1, 2], [0], [0]>} : vector<16x8x8xbf16>, vector<16x8x16xbf16>, vector<16x8x16xf32> -> vector<16x8x16xf32>
    "tpu.trace_stop"() : () -> ()
    %42 = vector.shape_cast %41 : vector<16x8x16xf32> to vector<2x8x8x16xf32>
    %43 = tpu.transpose %42, [0, 2, 1, 3] : vector<2x8x8x16xf32> -> vector<2x8x8x16xf32>
    %44 = vector.shape_cast %43 : vector<2x8x8x16xf32> to vector<16x128xf32>
    %45 = arith.truncf %44 : vector<16x128xf32> to vector<16x128xbf16>
    %c0_13 = arith.constant 0 : index
    %c0_14 = arith.constant 0 : index
    %c0_15 = arith.constant 0 : index
    %46 = vector.load %arg6[%c0_13, %c0_14, %c0_15] : memref<1x128x128xbf16, #tpu.memory_space<vmem>>, vector<1x128x128xbf16>
    %47 = vector.shape_cast %46 : vector<1x128x128xbf16> to vector<128x128xbf16>
    %cst_16 = arith.constant dense<0.000000e+00> : vector<16x128xf32>
    %48 = tpu.matmul %45, %47, %cst_16 {dimension_numbers = #tpu.dot_dimension_numbers<[1], [0], [0], [1], [0, 0, 1, 1], [], []>} : vector<16x128xbf16>, vector<128x128xbf16>, vector<16x128xf32> -> vector<16x128xf32>
    %c0_17 = arith.constant 0 : index
    %c0_18 = arith.constant 0 : index
    %c0_19 = arith.constant 0 : index
    %49 = vector.load %arg7[%c0_17, %c0_18, %c0_19] : memref<1x1x128xf32, #tpu.memory_space<vmem>>, vector<1x1x128xf32>
    %50 = vector.shape_cast %49 : vector<1x1x128xf32> to vector<1x128xf32>
    %51 = vector.broadcast %50 : vector<1x128xf32> to vector<16x128xf32>
    %52 = arith.addf %48, %51 : vector<16x128xf32>
    %53 = arith.addf %3, %52 : vector<16x128xf32>
    %c0_20 = arith.constant 0 : index
    %c0_21 = arith.constant 0 : index
    %c0_22 = arith.constant 0 : index
    %54 = vector.load %arg8[%c0_20, %c0_21, %c0_22] : memref<1x1x128xf32, #tpu.memory_space<vmem>>, vector<1x1x128xf32>
    %55 = vector.shape_cast %54 : vector<1x1x128xf32> to vector<1x128xf32>
    %c0_23 = arith.constant 0 : index
    %c0_24 = arith.constant 0 : index
    %c0_25 = arith.constant 0 : index
    %56 = vector.load %arg9[%c0_23, %c0_24, %c0_25] : memref<1x1x128xf32, #tpu.memory_space<vmem>>, vector<1x1x128xf32>
    %57 = vector.shape_cast %56 : vector<1x1x128xf32> to vector<1x128xf32>
    %cst_26 = arith.constant dense<0.000000e+00> : vector<16xf32>
    %58 = vector.multi_reduction <add>, %53, %cst_26 [1] : vector<16x128xf32> to vector<16xf32>
    %59 = vector.shape_cast %58 : vector<16xf32> to vector<16x1xf32>
    %cst_27 = arith.constant 1.280000e+02 : f32
    %60 = vector.broadcast %cst_27 : f32 to vector<16x1xf32>
    %61 = arith.divf %59, %60 : vector<16x1xf32>
    %62 = vector.broadcast %61 : vector<16x1xf32> to vector<16x128xf32>
    %63 = arith.subf %53, %62 : vector<16x128xf32>
    %64 = arith.mulf %63, %63 : vector<16x128xf32>
    %cst_28 = arith.constant dense<0.000000e+00> : vector<16xf32>
    %65 = vector.multi_reduction <add>, %64, %cst_28 [1] : vector<16x128xf32> to vector<16xf32>
    %66 = vector.shape_cast %65 : vector<16xf32> to vector<16x1xf32>
    %cst_29 = arith.constant 1.280000e+02 : f32
    %67 = vector.broadcast %cst_29 : f32 to vector<16x1xf32>
    %68 = arith.divf %66, %67 : vector<16x1xf32>
    %cst_30 = arith.constant 9.99999974E-6 : f32
    %69 = vector.broadcast %cst_30 : f32 to vector<16x1xf32>
    %70 = arith.addf %68, %69 : vector<16x1xf32>
    %71 = math.rsqrt %70 : vector<16x1xf32>
    %72 = vector.broadcast %71 : vector<16x1xf32> to vector<16x128xf32>
    %73 = arith.mulf %63, %72 : vector<16x128xf32>
    %74 = vector.broadcast %55 : vector<1x128xf32> to vector<16x128xf32>
    %75 = arith.mulf %73, %74 : vector<16x128xf32>
    %76 = vector.broadcast %57 : vector<1x128xf32> to vector<16x128xf32>
    %77 = arith.addf %75, %76 : vector<16x128xf32>
    %78 = arith.truncf %77 : vector<16x128xf32> to vector<16x128xbf16>
    %c0_31 = arith.constant 0 : index
    %c0_32 = arith.constant 0 : index
    %c0_33 = arith.constant 0 : index
    %79 = vector.load %arg10[%c0_31, %c0_32, %c0_33] : memref<1x128x2048xi8, #tpu.memory_space<vmem>>, vector<1x128x2048xi8>
    %80 = vector.shape_cast %79 : vector<1x128x2048xi8> to vector<128x2048xi8>
    %81 = arith.sitofp %80 : vector<128x2048xi8> to vector<128x2048xf32>
    %82 = arith.truncf %81 : vector<128x2048xf32> to vector<128x2048xbf16>
    %cst_34 = arith.constant dense<0.000000e+00> : vector<16x2048xf32>
    %83 = tpu.matmul %78, %82, %cst_34 {dimension_numbers = #tpu.dot_dimension_numbers<[1], [0], [0], [1], [0, 0, 1, 1], [], []>} : vector<16x128xbf16>, vector<128x2048xbf16>, vector<16x2048xf32> -> vector<16x2048xf32>
    %c0_35 = arith.constant 0 : index
    %c0_36 = arith.constant 0 : index
    %c0_37 = arith.constant 0 : index
    %84 = vector.load %arg11[%c0_35, %c0_36, %c0_37] : memref<1x1x2048xf32, #tpu.memory_space<vmem>>, vector<1x1x2048xf32>
    %85 = vector.shape_cast %84 : vector<1x1x2048xf32> to vector<1x2048xf32>
    %86 = vector.broadcast %85 : vector<1x2048xf32> to vector<16x2048xf32>
    %87 = arith.mulf %83, %86 : vector<16x2048xf32>
    %c0_38 = arith.constant 0 : index
    %c0_39 = arith.constant 0 : index
    %c0_40 = arith.constant 0 : index
    %88 = vector.load %arg12[%c0_38, %c0_39, %c0_40] : memref<1x1x2048xf32, #tpu.memory_space<vmem>>, vector<1x1x2048xf32>
    %89 = vector.shape_cast %88 : vector<1x1x2048xf32> to vector<1x2048xf32>
    %90 = vector.broadcast %89 : vector<1x2048xf32> to vector<16x2048xf32>
    %91 = arith.addf %87, %90 : vector<16x2048xf32>
    %cst_41 = arith.constant 0.000000e+00 : f32
    %92 = vector.broadcast %cst_41 : f32 to vector<16x2048xf32>
    %93 = arith.maximumf %91, %92 : vector<16x2048xf32>
    %94 = arith.truncf %93 : vector<16x2048xf32> to vector<16x2048xbf16>
    %c0_42 = arith.constant 0 : index
    %c0_43 = arith.constant 0 : index
    %c0_44 = arith.constant 0 : index
    %95 = vector.load %arg13[%c0_42, %c0_43, %c0_44] : memref<1x2048x128xi8, #tpu.memory_space<vmem>>, vector<1x2048x128xi8>
    %96 = vector.shape_cast %95 : vector<1x2048x128xi8> to vector<2048x128xi8>
    %97 = arith.sitofp %96 : vector<2048x128xi8> to vector<2048x128xf32>
    %98 = arith.truncf %97 : vector<2048x128xf32> to vector<2048x128xbf16>
    %cst_45 = arith.constant dense<0.000000e+00> : vector<16x128xf32>
    %99 = tpu.matmul %94, %98, %cst_45 {dimension_numbers = #tpu.dot_dimension_numbers<[1], [0], [0], [1], [0, 0, 1, 1], [], []>} : vector<16x2048xbf16>, vector<2048x128xbf16>, vector<16x128xf32> -> vector<16x128xf32>
    %c0_46 = arith.constant 0 : index
    %c0_47 = arith.constant 0 : index
    %c0_48 = arith.constant 0 : index
    %100 = vector.load %arg14[%c0_46, %c0_47, %c0_48] : memref<1x1x128xf32, #tpu.memory_space<vmem>>, vector<1x1x128xf32>
    %101 = vector.shape_cast %100 : vector<1x1x128xf32> to vector<1x128xf32>
    %102 = vector.broadcast %101 : vector<1x128xf32> to vector<16x128xf32>
    %103 = arith.mulf %99, %102 : vector<16x128xf32>
    %c0_49 = arith.constant 0 : index
    %c0_50 = arith.constant 0 : index
    %c0_51 = arith.constant 0 : index
    %104 = vector.load %arg15[%c0_49, %c0_50, %c0_51] : memref<1x1x128xf32, #tpu.memory_space<vmem>>, vector<1x1x128xf32>
    %105 = vector.shape_cast %104 : vector<1x1x128xf32> to vector<1x128xf32>
    %106 = vector.broadcast %105 : vector<1x128xf32> to vector<16x128xf32>
    %107 = arith.addf %103, %106 : vector<16x128xf32>
    %108 = arith.addf %77, %107 : vector<16x128xf32>
    %c0_52 = arith.constant 0 : index
    %c0_53 = arith.constant 0 : index
    %c0_54 = arith.constant 0 : index
    %109 = vector.load %arg16[%c0_52, %c0_53, %c0_54] : memref<1x1x128xf32, #tpu.memory_space<vmem>>, vector<1x1x128xf32>
    %110 = vector.shape_cast %109 : vector<1x1x128xf32> to vector<1x128xf32>
    %c0_55 = arith.constant 0 : index
    %c0_56 = arith.constant 0 : index
    %c0_57 = arith.constant 0 : index
    %111 = vector.load %arg17[%c0_55, %c0_56, %c0_57] : memref<1x1x128xf32, #tpu.memory_space<vmem>>, vector<1x1x128xf32>
    %112 = vector.shape_cast %111 : vector<1x1x128xf32> to vector<1x128xf32>
    %cst_58 = arith.constant dense<0.000000e+00> : vector<16xf32>
    %113 = vector.multi_reduction <add>, %108, %cst_58 [1] : vector<16x128xf32> to vector<16xf32>
    %114 = vector.shape_cast %113 : vector<16xf32> to vector<16x1xf32>
    %cst_59 = arith.constant 1.280000e+02 : f32
    %115 = vector.broadcast %cst_59 : f32 to vector<16x1xf32>
    %116 = arith.divf %114, %115 : vector<16x1xf32>
    %117 = vector.broadcast %116 : vector<16x1xf32> to vector<16x128xf32>
    %118 = arith.subf %108, %117 : vector<16x128xf32>
    %119 = arith.mulf %118, %118 : vector<16x128xf32>
    %cst_60 = arith.constant dense<0.000000e+00> : vector<16xf32>
    %120 = vector.multi_reduction <add>, %119, %cst_60 [1] : vector<16x128xf32> to vector<16xf32>
    %121 = vector.shape_cast %120 : vector<16xf32> to vector<16x1xf32>
    %cst_61 = arith.constant 1.280000e+02 : f32
    %122 = vector.broadcast %cst_61 : f32 to vector<16x1xf32>
    %123 = arith.divf %121, %122 : vector<16x1xf32>
    %cst_62 = arith.constant 9.99999974E-6 : f32
    %124 = vector.broadcast %cst_62 : f32 to vector<16x1xf32>
    %125 = arith.addf %123, %124 : vector<16x1xf32>
    %126 = math.rsqrt %125 : vector<16x1xf32>
    %127 = vector.broadcast %126 : vector<16x1xf32> to vector<16x128xf32>
    %128 = arith.mulf %118, %127 : vector<16x128xf32>
    %129 = vector.broadcast %110 : vector<1x128xf32> to vector<16x128xf32>
    %130 = arith.mulf %128, %129 : vector<16x128xf32>
    %131 = vector.broadcast %112 : vector<1x128xf32> to vector<16x128xf32>
    %132 = arith.addf %130, %131 : vector<16x128xf32>
    %c0_63 = arith.constant 0 : index
    %c0_64 = arith.constant 0 : index
    %133 = vector.load %arg21[%c0_63, %c0_64] : memref<16x128xf32, #tpu.memory_space<vmem>>, vector<16x128xf32>
    tpu.vector_store %arg21[%c0_63, %c0_64], %132 {strides = array<i32>} : memref<16x128xf32, #tpu.memory_space<vmem>>, vector<16x128xf32>,
    %c1_i32 = arith.constant 1 : i32
    %134 = arith.cmpi eq, %arg0, %c1_i32 : i32
    %135 = arith.extui %134 : i1 to i32
    %c0_i32_65 = arith.constant 0 : i32
    %136 = arith.cmpi ne, %135, %c0_i32_65 : i32
    scf.if %136 {
      %137 = vector.shape_cast %132 : vector<16x128xf32> to vector<2x8x128xf32>
      %cst_66 = arith.constant dense<0.000000e+00> : vector<2x128xf32>
      %138 = vector.multi_reduction <add>, %137, %cst_66 [1] : vector<2x8x128xf32> to vector<2x128xf32>
      %cst_67 = arith.constant 8.000000e+00 : f32
      %139 = vector.broadcast %cst_67 : f32 to vector<2x128xf32>
      %140 = arith.divf %138, %139 : vector<2x128xf32>
      %cst_68 = arith.constant 0.000000e+00 : f32
      %141 = vector.broadcast %cst_68 : f32 to vector<6x128xf32>
      %142 = tpu.concatenate %140, %141 in 0 : vector<2x128xf32>, vector<6x128xf32> -> vector<8x128xf32>
      %143 = arith.truncf %142 : vector<8x128xf32> to vector<8x128xbf16>
      %c0_69 = arith.constant 0 : index
      %c0_70 = arith.constant 0 : index
      %144 = vector.load %arg18[%c0_69, %c0_70] : memref<128x128xbf16, #tpu.memory_space<vmem>>, vector<128x128xbf16>
      %cst_71 = arith.constant dense<0.000000e+00> : vector<8x128xf32>
      %145 = tpu.matmul %143, %144, %cst_71 {dimension_numbers = #tpu.dot_dimension_numbers<[1], [0], [0], [1], [0, 0, 1, 1], [], []>} : vector<8x128xbf16>, vector<128x128xbf16>, vector<8x128xf32> -> vector<8x128xf32>
      %c0_72 = arith.constant 0 : index
      %c0_73 = arith.constant 0 : index
      %146 = vector.load %arg19[%c0_72, %c0_73] : memref<1x128xf32, #tpu.memory_space<vmem>>, vector<1x128xf32>
      %147 = vector.broadcast %146 : vector<1x128xf32> to vector<8x128xf32>
      %148 = arith.addf %145, %147 : vector<8x128xf32>
      %c0_74 = arith.constant 0 : index
      %c0_75 = arith.constant 0 : index
      %149 = vector.load %arg20[%c0_74, %c0_75] : memref<8x128xf32, #tpu.memory_space<vmem>>, vector<8x128xf32>
      tpu.vector_store %arg20[%c0_74, %c0_75], %148 {strides = array<i32>} : memref<8x128xf32, #tpu.memory_space<vmem>>, vector<8x128xf32>,
    } else {
    }
    return
  }
  func.func @transform_0(%arg0: i32) -> (i32, i32) {
    %c0_i32 = arith.constant 0 : i32
    %c0_i32_0 = arith.constant 0 : i32
    %c0_i32_1 = arith.constant 0 : i32
    return %c0_i32, %c0_i32_0 : i32, i32
  }
  func.func @transform_1(%arg0: i32) -> (i32, i32) {
    %c0_i32 = arith.constant 0 : i32
    %c0_i32_0 = arith.constant 0 : i32
    %c0_i32_1 = arith.constant 0 : i32
    return %c0_i32, %c0_i32_0 : i32, i32
  }
  func.func @transform_2(%arg0: i32) -> (i32, i32) {
    %c0_i32 = arith.constant 0 : i32
    %c0_i32_0 = arith.constant 0 : i32
    %c0_i32_1 = arith.constant 0 : i32
    return %c0_i32, %c0_i32_0 : i32, i32
  }
  func.func @transform_3(%arg0: i32) -> (i32, i32, i32) {
    %c0_i32 = arith.constant 0 : i32
    %c0_i32_0 = arith.constant 0 : i32
    %c0_i32_1 = arith.constant 0 : i32
    return %arg0, %c0_i32, %c0_i32_0 : i32, i32, i32
  }
  func.func @transform_4(%arg0: i32) -> (i32, i32, i32) {
    %c0_i32 = arith.constant 0 : i32
    %c0_i32_0 = arith.constant 0 : i32
    %c0_i32_1 = arith.constant 0 : i32
    return %arg0, %c0_i32, %c0_i32_0 : i32, i32, i32
  }
  func.func @transform_5(%arg0: i32) -> (i32, i32, i32) {
    %c0_i32 = arith.constant 0 : i32
    %c0_i32_0 = arith.constant 0 : i32
    %c0_i32_1 = arith.constant 0 : i32
    return %arg0, %c0_i32, %c0_i32_0 : i32, i32, i32
  }
  func.func @transform_6(%arg0: i32) -> (i32, i32, i32) {
    %c0_i32 = arith.constant 0 : i32
    %c0_i32_0 = arith.constant 0 : i32
    %c0_i32_1 = arith.constant 0 : i32
    return %arg0, %c0_i32, %c0_i32_0 : i32, i32, i32
  }
  func.func @transform_7(%arg0: i32) -> (i32, i32, i32) {
    %c0_i32 = arith.constant 0 : i32
    %c0_i32_0 = arith.constant 0 : i32
    %c0_i32_1 = arith.constant 0 : i32
    return %arg0, %c0_i32, %c0_i32_0 : i32, i32, i32
  }
  func.func @transform_8(%arg0: i32) -> (i32, i32, i32) {
    %c0_i32 = arith.constant 0 : i32
    %c0_i32_0 = arith.constant 0 : i32
    %c0_i32_1 = arith.constant 0 : i32
    return %arg0, %c0_i32, %c0_i32_0 : i32, i32, i32
  }
  func.func @transform_9(%arg0: i32) -> (i32, i32, i32) {
    %c0_i32 = arith.constant 0 : i32
    %c0_i32_0 = arith.constant 0 : i32
    %c0_i32_1 = arith.constant 0 : i32
    return %arg0, %c0_i32, %c0_i32_0 : i32, i32, i32
  }
  func.func @transform_10(%arg0: i32) -> (i32, i32, i32) {
    %c0_i32 = arith.constant 0 : i32
    %c0_i32_0 = arith.constant 0 : i32
    %c0_i32_1 = arith.constant 0 : i32
    return %arg0, %c0_i32, %c0_i32_0 : i32, i32, i32
  }
  func.func @transform_11(%arg0: i32) -> (i32, i32, i32) {
    %c0_i32 = arith.constant 0 : i32
    %c0_i32_0 = arith.constant 0 : i32
    %c0_i32_1 = arith.constant 0 : i32
    return %arg0, %c0_i32, %c0_i32_0 : i32, i32, i32
  }
  func.func @transform_12(%arg0: i32) -> (i32, i32, i32) {
    %c0_i32 = arith.constant 0 : i32
    %c0_i32_0 = arith.constant 0 : i32
    %c0_i32_1 = arith.constant 0 : i32
    return %arg0, %c0_i32, %c0_i32_0 : i32, i32, i32
  }
  func.func @transform_13(%arg0: i32) -> (i32, i32, i32) {
    %c0_i32 = arith.constant 0 : i32
    %c0_i32_0 = arith.constant 0 : i32
    %c0_i32_1 = arith.constant 0 : i32
    return %arg0, %c0_i32, %c0_i32_0 : i32, i32, i32
  }
  func.func @transform_14(%arg0: i32) -> (i32, i32, i32) {
    %c0_i32 = arith.constant 0 : i32
    %c0_i32_0 = arith.constant 0 : i32
    %c0_i32_1 = arith.constant 0 : i32
    return %arg0, %c0_i32, %c0_i32_0 : i32, i32, i32
  }
  func.func @transform_15(%arg0: i32) -> (i32, i32, i32) {
    %c0_i32 = arith.constant 0 : i32
    %c0_i32_0 = arith.constant 0 : i32
    %c0_i32_1 = arith.constant 0 : i32
    return %arg0, %c0_i32, %c0_i32_0 : i32, i32, i32
  }
  func.func @transform_16(%arg0: i32) -> (i32, i32, i32) {
    %c0_i32 = arith.constant 0 : i32
    %c0_i32_0 = arith.constant 0 : i32
    %c0_i32_1 = arith.constant 0 : i32
    return %arg0, %c0_i32, %c0_i32_0 : i32, i32, i32
  }
  func.func @transform_17(%arg0: i32) -> (i32, i32) {
    %c0_i32 = arith.constant 0 : i32
    %c0_i32_0 = arith.constant 0 : i32
    %c0_i32_1 = arith.constant 0 : i32
    return %c0_i32, %c0_i32_0 : i32, i32
  }
  func.func @transform_18(%arg0: i32) -> (i32, i32) {
    %c0_i32 = arith.constant 0 : i32
    %c0_i32_0 = arith.constant 0 : i32
    %c0_i32_1 = arith.constant 0 : i32
    return %c0_i32, %c0_i32_0 : i32, i32
  }
  func.func @transform_19(%arg0: i32) -> (i32, i32) {
    %c0_i32 = arith.constant 0 : i32
    %c0_i32_0 = arith.constant 0 : i32
    %c0_i32_1 = arith.constant 0 : i32
    return %c0_i32, %c0_i32_0 : i32, i32
  }
}

</mosaic_0001>

<bundles_post_ra>
// kernel: transformer_classifier_forward.1
= control target key start
LH: loop header
LB: loop body
LE: loop exit
PB: predicated region body
PF: predicated region fallthrough
CT: control target
= control target key end

     0   :  { %s10621_s0 = inlined_call_operand.vmem [shape: s32[16,1], index: 0, kind: input, shape index: {}]   ;;  %s10622_s1 = inlined_call_operand.hbm [shape: f32[128,128], index: 1, kind: input, shape index: {}]   ;;  %s10623_s2 = inlined_call_operand.vmem [shape: f32[16,128], index: 2, kind: input, shape index: {}]   ;;  %s10624_s3 = inlined_call_operand.hbm [shape: bf16[2,128,384], index: 3, kind: input, shape index: {}]   ;;  %s10625_s4 = inlined_call_operand.vmem [shape: f32[2,1,384], index: 4, kind: input, shape index: {}]   ;;  %s10626_s5 = inlined_call_operand.hbm [shape: bf16[2,128,128], index: 5, kind: input, shape index: {}]   ;;  %s10627_s6 = inlined_call_operand.vmem [shape: f32[2,1,128], index: 6, kind: input, shape index: {}]   ;;  %s10628_s7 = inlined_call_operand.vmem [shape: f32[2,1,128], index: 7, kind: input, shape index: {}]   ;;  %s10629_s8 = inlined_call_operand.vmem [shape: f32[2,1,128], index: 8, kind: input, shape index: {}]   ;;  %s10630_s9 = inlined_call_operand.hbm [shape: s8[2,128,2048], index: 9, kind: input, shape index: {}]   ;;  %s10631_s10 = inlined_call_operand.vmem [shape: f32[2,1,2048], index: 10, kind: input, shape index: {}]   ;;  %s10632_s11 = inlined_call_operand.hbm [shape: f32[2,1,2048], index: 11, kind: input, shape index: {}]   ;;  %s10633_s12 = inlined_call_operand.hbm [shape: s8[2,2048,128], index: 12, kind: input, shape index: {}]   ;;  %s10634_s13 = inlined_call_operand.vmem [shape: f32[2,1,128], index: 13, kind: input, shape index: {}]   ;;  %s10635_s14 = inlined_call_operand.vmem [shape: f32[2,1,128], index: 14, kind: input, shape index: {}]   ;;  %s10636_s15 = inlined_call_operand.vmem [shape: f32[2,1,128], index: 15, kind: input, shape index: {}]   ;;  %s10637_s16 = inlined_call_operand.vmem [shape: f32[2,1,128], index: 16, kind: input, shape index: {}]   ;;  %s10638_s17 = inlined_call_operand.vmem [shape: bf16[128,128], index: 17, kind: input, shape index: {}]   ;;  %s10639_s18 = inlined_call_operand.hbm [shape: f32[1,128], index: 18, kind: input, shape index: {}]   ;;  %s10640_s19 = inlined_call_operand.vmem [shape: f32[8,128], index: 19, kind: output, shape index: {}]  }
   0x1   :  { %10664 = sst [smem:[#allocation23_spill]] %s10621_s0 }
   0x2   :  { %10665 = sst [smem:[#allocation24_spill]] %s10622_s1 }
   0x3   :  { %10666 = sst [smem:[#allocation25_spill]] %s10623_s2 }
   0x4   :  { %10667 = sst [smem:[#allocation26_spill]] %s10624_s3 }
   0x5   :  { %10668 = sst [smem:[#allocation27_spill]] %s10625_s4 }
   0x6   :  { %10669 = sst [smem:[#allocation28_spill]] %s10626_s5 }
   0x7   :  { %10670 = sst [smem:[#allocation29_spill]] %s10627_s6 }
   0x8   :  { %10671 = sst [smem:[#allocation30_spill]] %s10628_s7 }
   0x9   :  { %10672 = sst [smem:[#allocation31_spill]] %s10629_s8 }
   0xa   :  { %10673 = sst [smem:[#allocation32_spill]] %s10630_s9 }
   0xb   :  { %10674 = sst [smem:[#allocation33_spill]] %s10631_s10 }
   0xc   :  { %10675 = sst [smem:[#allocation34_spill]] %s10632_s11 }
   0xd   :  { %10676 = sst [smem:[#allocation35_spill]] %s10634_s13 }
   0xe   :  { %10677 = sst [smem:[#allocation36_spill]] %s10635_s14 }
   0xf   :  { %10678 = sst [smem:[#allocation37_spill]] %s10636_s15 }
  0x10   :  { %10679 = sst [smem:[#allocation38_spill]] %s10637_s16 }
  0x11   :  { %10680 = sst [smem:[#allocation39_spill]] %s10638_s17 }
  0x12   :  { %10681 = sst [smem:[#allocation40_spill]] %s10639_s18 }
  0x13   :  { %10682 = sst [smem:[#allocation41_spill]] %s10640_s19 }
  0x14   :  { %24 = vsyncpa [#allocation4], 0 }
  0x15   :  { %25 = vsyncpa [#allocation6], 0 }
  0x16   :  { %27 = vsyncpa [#allocation6 + $0x1], 0 }
  0x17   :  { %28 = vsyncpa [#allocation9], 0 }
  0x18   :  { %30 = vsyncpa [#allocation9 + $0x1], 0 }
  0x19   :  { %31 = vsyncpa [#allocation12], 0 }
  0x1a   :  { %33 = vsyncpa [#allocation12 + $0x1], 0  ;;  %s8783_s0 = smov 0   ;;  %s8785_s30 = smov 0  }
  0x1b   :  { %s8787_s20 = smov 0   ;;  %s8789_s21 = smov 0  }
  0x1c LB: > { %10683 = sst [smem:[#allocation19_spill]] %s8647_s20  ;;  %s8802_s1 = sadd.s32 4294967295, %s8651_s21   ;;  %s8651_s21 = sphi %s8789_s21, %s10739_s21   ;;  %s8647_s20 = sphi %s8787_s20, %s10741_s20   ;;  %s8643_s30 = sphi %s8785_s30, %s10743_s30   ;;  %s8639_s0 = sphi %s8783_s0, %s10742_s0  }
  0x1d   : > { %s8805_s22 = sadd.s32 1, %s8651_s21   ;;  %s109_s23 = sadd.s32 1, %s8647_s20 }
  0x1e   : > { %10684 = sst [smem:[#allocation20_spill]] %s8805_s22  ;;  %s106_s2 = ssub.s32 %s8651_s21, %s8805_s22 }
  0x1f   : > { %p107_p0 = scmp.eq.s32.totalorder %s106_s2, 0  ;;  %p116_p1 = scmp.ne.s32.totalorder %s8647_s20, %s8643_s30 }
  0x20   : > { %p117_p2 = scmp.eq.s32.totalorder %s8651_s21, 0  ;;  %p122_p3 = scmp.ne.s32.totalorder %s8643_s30, %s8639_s0 }
  0x21   : > { %s8815_s24 = scalar_select %p107_p0, %s8647_s20, %s109_s23  }
  0x22   : > { %p8817_p4 = por %p117_p2, %p116_p1  ;;  %p10649_p5 = scmp.eq.s32.totalorder %s8802_s1, 0 }
  0x23   : > { %10685 = sst [smem:[#allocation21_spill]] %s8815_s24  ;;  %p7342_p6 = scmp.ge.s32.totalorder %s8651_s21, 1 }
  0x24   : > { %p534_p7 = scmp.lt.s32.totalorder %s8651_s21, 3  ;;  %p8826_p8 = por %p10649_p5, %p122_p3 }
  0x25   : > { %s8653_s27 = smov [#allocation13]   ;;  %p8177_p12 = scmp.lt.s32.totalorder %s8651_s21, 2 }
  0x26   : > { %s10687_s3 = scalar_select %p8826_p8, 1, 0 }
  0x27   : > { %p8831_p10 = pnand %p7342_p6, %p534_p7  ;;  %s569_s28 = sshll.u32 %s8653_s27, 4  ;;  %s570_s28 = int_to_ptr.vmem [resolvable:$true] %s569_s28 }
  0x28   : > { %10688 = sst [smem:[#allocation22_spill]] %s10687_s3  ;;  %s8839_s29 = sand.u32 1, %s8651_s21  }
  0x29   : > { %s10689_s26 = scalar_select %p8831_p10, 1, 0 }
  0x2a   : > { %p8152_p11 = pneg %p8831_p10  ;;  %p8849_p0 = pnand %p8177_p12, %p8817_p4 }
  0x2b   : > { %s8854_s23 = sand.u32 1, %s8647_s20   ;;  %s10692_s18 = sld [smem:[#allocation40_spill]] }
  0x2c   : > { %p8843_p13 = pnand %p8152_p11, %p10649_p5  ;;  %s8130_s27 = smul.u32 192, %s8854_s23 }
  0x2d   : > { %s10691_s2 = scalar_select %p8849_p0, 1, 0 }
  0x2e   : > { %s10690_s0 = scalar_select %p8843_p13, 1, 0 }
  0x2f   : > { %p10653_p2 = pneg %p8843_p13 }
  0x31   : > { %s8395_s19 = scalar_lea.hbm %s10692_s18, 16 }
  0x32   : > { %p8396_p1 = scmp.ne.s32.totalorder %s10692_s18, %s8395_s19  ;;  %p8402_p6 = scmp.lt.u32.totalorder %s8395_s19, %s10692_s18 }
  0x34   : > { %p8398_p3 = pnand %p10653_p2, %p8396_p1 }
  0x36   : > { %p8399_p4 = pneg %p8398_p3 }
  0x38   : > { %p8404_p7 = pnand %p8402_p6, %p8399_p4 }
  0x3a   : > { %8407 = shalt.err (!%p8404_p7)
}
  0x3b   : > { %s8408_s20 = scalar_lea.vmem %s570_s28, 16  ;;  %s8415_s16 = scalar_lea.vmem %s570_s28, 32 }
  0x3c   : > { %p8409_p11 = scmp.ne.s32.totalorder %s570_s28, %s8408_s20  ;;  %p8416_p5 = scmp.lt.s32.totalorder %s570_s28, %s570_s28 }
  0x3d   : > { %p8417_p8 = scmp.lt.s32.totalorder %s8415_s16, %s8408_s20 }
  0x3e   : > { %p8411_p12 = pnand %p8409_p11, %p10653_p2 }
  0x3f   : > { %p8418_p10 = por %p8417_p8, %p8416_p5 }
  0x40   : > { %p8412_p9 = pneg %p8411_p12 }
  0x42   : > { %p8419_p0 = pnand %p8418_p10, %p8412_p9 }
  0x44   : > { %8422 = shalt.err (!%p8419_p0)
}
  0x45   : > { %8158 = dma.hbm_to_vmem [thread:$0]  (!%p8843_p13), %s10692_s18, 16, %s570_s28, [#allocation12]  }
  0x46   : > { %s8131_s19 = smul.u32 3072, %s8651_s21  ;;  %s584_s22 = scalar_lea.vmem [#allocation5], %s8130_s27 }
  0x47   : > { %s591_s24 = sshll.u32 %s584_s22, 4  ;;  %s10693_s20 = sld [smem:[#allocation26_spill]]  ;;  %s8880_s24 = int_to_ptr.vmem [resolvable:$true] %s591_s24 }
  0x48   : > { %s10657_s10 = scalar_lea.sflag [#allocation6], %s8839_s29  ;;  %p10695_p8 = scmp.ne.s32.totalorder %s10691_s2, 0 }
  0x4a   : > { %p8892_p9 = pneg %p10695_p8 }
  0x4c   : > { %s10696_s28 = scalar_select %p8892_p9, 1, 0 }
  0x4d   : > { %s10694_s16 = smov %s10693_s20  ;;  %s8885_s13 = scalar_lea.hbm %s10693_s20, %s8131_s19 }
  0x4e   : > { %s8423_s17 = scalar_lea.hbm %s8885_s13, 3072  ;;  %s8428_s15 = scalar_lea.hbm %s10694_s16, 6144 }
  0x4f   : > { %p8424_p5 = scmp.ne.s32.totalorder %s8885_s13, %s8423_s17  ;;  %p8429_p1 = scmp.lt.u32.totalorder %s8885_s13, %s10694_s16 }
  0x50   : > { %p8430_p3 = scmp.lt.u32.totalorder %s8428_s15, %s8423_s17  ;;  %p8432_p6 = scmp.lt.u32.totalorder %s8423_s17, %s8885_s13 }
  0x51   : > { %p8426_p10 = pnand %p8892_p9, %p8424_p5 }
  0x52   : > { %p8431_p4 = por %p8430_p3, %p8429_p1 }
  0x53   : > { %p8427_p0 = pneg %p8426_p10 }
  0x54   : > { %p8433_p7 = por %p8432_p6, %p8431_p4 }
  0x56   : > { %p8434_p11 = pnand %p8433_p7, %p8427_p0 }
  0x58   : > { %8437 = shalt.err (!%p8434_p11)
}
  0x59   : > { %s8438_s25 = scalar_lea.vmem %s8880_s24, 3072  ;;  %s8654_s20 = smov [#allocation5]  }
  0x5a   : > { %p8439_p12 = scmp.ne.s32.totalorder %s8880_s24, %s8438_s25  ;;  %s8443_s27 = sshll.u32 %s8654_s20, 4  ;;  %s8444_s27 = int_to_ptr.vmem [resolvable:$false] %s8443_s27 }
  0x5b   : > { %s8445_s14 = scalar_lea.vmem %s8444_s27, 6144  ;;  %p8446_p2 = scmp.lt.s32.totalorder %s8880_s24, %s8444_s27 }
  0x5c   : > { %p8441_p5 = pnand %p8439_p12, %p8892_p9  ;;  %p8447_p13 = scmp.lt.s32.totalorder %s8445_s14, %s8438_s25 }
  0x5e   : > { %p8442_p10 = pneg %p8441_p5  ;;  %p8448_p1 = por %p8447_p13, %p8446_p2 }
  0x60   : > { %p8449_p3 = pnand %p8448_p1, %p8442_p10 }
  0x62   : > { %8452 = shalt.err (!%p8449_p3)
}
  0x63   : > { %s8655_s17 = smov 192   ;;  %s8656_s15 = smov 12  }
  0x64   : > { %8162 = dma.hbm_to_vmem [thread:$0]  (!%p10695_p8), %s8885_s13, 3072, %s8880_s24, %s10657_s10, %s8655_s17, %s8655_s17, %s8656_s15  }
  0x65   : > { %s7350_s19 = sshll.u32 %s8854_s23, 9  ;;  %s7523_s22 = sshll.u32 %s8651_s21, 13 }
  0x66   : > { %s10697_s9 = sld [smem:[#allocation32_spill]]  ;;  %s651_s14 = scalar_lea.vmem [#allocation8], %s7350_s19 }
  0x67   : > { %s658_s16 = sshll.u32 %s651_s14, 4  ;;  %s648_s18 = scalar_lea.sflag [#allocation9], %s8839_s29  ;;  %s8928_s16 = int_to_ptr.vmem [resolvable:$true] %s658_s16 }
  0x6c   : > { %s8924_s27 = scalar_lea.hbm %s10697_s9, %s7523_s22  ;;  %s8458_s17 = scalar_lea.hbm %s10697_s9, 16384 }
  0x6d   : > { %s8453_s4 = scalar_lea.hbm %s8924_s27, 8192  ;;  %p8459_p4 = scmp.lt.u32.totalorder %s8924_s27, %s10697_s9 }
  0x6e   : > { %p8454_p13 = scmp.ne.s32.totalorder %s8924_s27, %s8453_s4  ;;  %p8460_p6 = scmp.lt.u32.totalorder %s8458_s17, %s8453_s4 }
  0x6f   : > { %p8462_p11 = scmp.lt.u32.totalorder %s8453_s4, %s8924_s27 }
  0x70   : > { %p8456_p2 = pnand %p8454_p13, %p8892_p9  ;;  %p8461_p7 = por %p8460_p6, %p8459_p4 }
  0x72   : > { %p8457_p0 = pneg %p8456_p2  ;;  %p8463_p12 = por %p8462_p11, %p8461_p7 }
  0x74   : > { %p8464_p5 = pnand %p8463_p12, %p8457_p0 }
  0x76   : > { %8467 = shalt.err (!%p8464_p5)
}
  0x77   : > { %s8468_s20 = scalar_lea.vmem %s8928_s16, 8192  ;;  %s8657_s14 = smov [#allocation8]  }
  0x78   : > { %p8469_p10 = scmp.ne.s32.totalorder %s8928_s16, %s8468_s20  ;;  %s8473_s13 = sshll.u32 %s8657_s14, 4  ;;  %s8474_s13 = int_to_ptr.vmem [resolvable:$false] %s8473_s13 }
  0x79   : > { %s8475_s24 = scalar_lea.vmem %s8474_s13, 16384  ;;  %p8476_p13 = scmp.lt.s32.totalorder %s8928_s16, %s8474_s13 }
  0x7a   : > { %p8471_p1 = pnand %p8469_p10, %p8892_p9  ;;  %p8477_p2 = scmp.lt.s32.totalorder %s8475_s24, %s8468_s20 }
  0x7c   : > { %p8472_p3 = pneg %p8471_p1  ;;  %p8478_p4 = por %p8477_p2, %p8476_p13 }
  0x7e   : > { %p8479_p6 = pnand %p8478_p4, %p8472_p3 }
  0x80   : > { %8482 = shalt.err (!%p8479_p6)
}
  0x81   : > { %s8658_s4 = smov 2048   ;;  %s8659_s17 = smov 128  }
  0x82   : > { %8168 = dma.hbm_to_vmem [thread:$0]  (!%p10695_p8), %s8924_s27, 8192, %s8928_s16, %s648_s18, %s8658_s4, %s8658_s4, %s8659_s17  }
  0x83   : > { %s8960_s20 = scalar_lea.hbm %s10633_s12, %s7523_s22  ;;  %s698_s14 = scalar_lea.vmem [#allocation11], %s7350_s19 }
  0x84   : > { %s705_s13 = sshll.u32 %s698_s14, 4  ;;  %s8660_s24 = smov [#allocation3]   ;;  %s8964_s13 = int_to_ptr.vmem [resolvable:$true] %s705_s13 }
  0x85   : > { %s549_s10 = sshll.u32 %s8660_s24, 4  ;;  %s7347_s9 = sshll.u32 %s8854_s23, 6  ;;  %s550_s10 = int_to_ptr.vmem [resolvable:$true] %s549_s10 }
  0x86   : > { %s10698_s6 = sld [smem:[#allocation24_spill]]  ;;  %p10699_p7 = scmp.ne.s32.totalorder %s10690_s0, 0 }
  0x88   : > { %p10700_p11 = pneg %p10699_p7 }
  0x8c   : > { %s8483_s3 = scalar_lea.hbm %s10698_s6, 2048 }
  0x8d   : > { %p8484_p0 = scmp.ne.s32.totalorder %s10698_s6, %s8483_s3  ;;  %p8490_p10 = scmp.lt.u32.totalorder %s8483_s3, %s10698_s6 }
  0x8f   : > { %p8486_p12 = pnand %p8484_p0, %p10700_p11 }
  0x91   : > { %p8487_p5 = pneg %p8486_p12 }
  0x93   : > { %p8492_p1 = pnand %p8490_p10, %p8487_p5 }
  0x95   : > { %8495 = shalt.err (!%p8492_p1)
}
  0x96   : > { %s8496_s4 = scalar_lea.vmem %s550_s10, 2048  ;;  %p10701_p13 = pmov %p10700_p11 }
  0x97   : > { %p8497_p3 = scmp.ne.s32.totalorder %s550_s10, %s8496_s4  ;;  %p8504_p6 = scmp.lt.s32.totalorder %s550_s10, %s550_s10 }
  0x98   : > { %p8505_p8 = scmp.lt.s32.totalorder %s8496_s4, %s8496_s4 }
  0x99   : > { %p8499_p2 = pnand %p8497_p3, %p10701_p13 }
  0x9a   : > { %p8506_p9 = por %p8505_p8, %p8504_p6 }
  0x9b   : > { %p8500_p4 = pneg %p8499_p2 }
  0x9d   : > { %p8507_p0 = pnand %p8506_p9, %p8500_p4 }
  0x9f   : > { %8510 = shalt.err (!%p8507_p0)
}
  0xa0   : > { %s8661_s7 = smov 8   ;;  %s7522_s15 = sshll.u32 %s8651_s21, 10 }
  0xa1   : > { %8155 = dma.hbm_to_vmem [thread:$0]  (!%p10699_p7), %s10698_s6, 2048, %s550_s10, [#allocation4], %s8659_s17, %s8659_s17, %s8661_s7  }
  0xa2   : > { %s10702_s5 = sld [smem:[#allocation28_spill]]  ;;  %s612_s0 = scalar_lea.vmem [#allocation7], %s7347_s9 }
  0xa3   : > { %s619_s16 = sshll.u32 %s612_s0, 4  ;;  %s7353_s27 = sshll.u32 %s8854_s23, 4  ;;  %s8996_s16 = int_to_ptr.vmem [resolvable:$true] %s619_s16 }
  0xa4   : > { %p10703_p9 = scmp.ne.s32.totalorder %s10696_s28, 0 }
  0xa8   : > { %s8994_s24 = scalar_lea.hbm %s10702_s5, %s7522_s15  ;;  %s8516_s4 = scalar_lea.hbm %s10702_s5, 2048 }
  0xa9   : > { %s8511_s19 = scalar_lea.hbm %s8994_s24, 1024  ;;  %p8517_p12 = scmp.lt.u32.totalorder %s8994_s24, %s10702_s5 }
  0xaa   : > { %p8512_p8 = scmp.ne.s32.totalorder %s8994_s24, %s8511_s19  ;;  %p8518_p5 = scmp.lt.u32.totalorder %s8516_s4, %s8511_s19 }
  0xab   : > { %p8520_p1 = scmp.lt.u32.totalorder %s8511_s19, %s8994_s24 }
  0xac   : > { %p8514_p11 = pnand %p8512_p8, %p10703_p9  ;;  %p8519_p10 = por %p8518_p5, %p8517_p12 }
  0xae   : > { %p8515_p7 = pneg %p8514_p11  ;;  %p8521_p3 = por %p8520_p1, %p8519_p10 }
  0xb0   : > { %p8522_p13 = pnand %p8521_p3, %p8515_p7 }
  0xb2   : > { %8525 = shalt.err (!%p8522_p13)
}
  0xb3   : > { %s8526_s9 = scalar_lea.vmem %s8996_s16, 1024  ;;  %s8662_s15 = smov [#allocation7]  }
  0xb4   : > { %p8527_p2 = scmp.ne.s32.totalorder %s8996_s16, %s8526_s9  ;;  %s8531_s25 = sshll.u32 %s8662_s15, 4  ;;  %s8532_s25 = int_to_ptr.vmem [resolvable:$false] %s8531_s25 }
  0xb5   : > { %s8533_s14 = scalar_lea.vmem %s8532_s25, 2048  ;;  %p8534_p0 = scmp.lt.s32.totalorder %s8996_s16, %s8532_s25 }
  0xb6   : > { %p8529_p4 = pnand %p8527_p2, %p10703_p9  ;;  %p8535_p8 = scmp.lt.s32.totalorder %s8533_s14, %s8526_s9 }
  0xb8   : > { %p8530_p6 = pneg %p8529_p4  ;;  %p8536_p11 = por %p8535_p8, %p8534_p0 }
  0xba   : > { %p8537_p12 = pnand %p8536_p11, %p8530_p6 }
  0xbc   : > { %8540 = shalt.err (!%p8537_p12)
}
  0xbd   : > { %s8663_s0 = smov 64   ;;  %s8664_s19 = smov 4  }
  0xbe   : > { %p10704_p7 = scmp.ne.s32.totalorder %s10691_s2, 0  ;;  %s10705_s10 = scalar_lea.sflag [#allocation6], %s8839_s29 }
  0xbf   : > { %s7524_s22 = sshll.u32 %s8651_s21, 8  ;;  %s10706_s11 = sld [smem:[#allocation34_spill]] }
  0xc0   : > { %8165 = dma.hbm_to_vmem [thread:$0]  (!%p10704_p7), %s8994_s24, 1024, %s8996_s16, %s10705_s10, %s8663_s0, %s8663_s0, %s8664_s19  }
  0xc1   : > { %s679_s9 = scalar_lea.vmem [#allocation10], %s7353_s27 }
  0xc2   : > { %s687_s15 = sshll.u32 %s679_s9, 4  ;;  %s688_s15 = int_to_ptr.vmem [resolvable:$true] %s687_s15 }
  0xc5   : > { %s9026_s3 = scalar_lea.hbm %s10706_s11, %s7524_s22  ;;  %s8546_s16 = scalar_lea.hbm %s10706_s11, 512 }
  0xc6   : > { %s8541_s25 = scalar_lea.hbm %s9026_s3, 256  ;;  %p8547_p3 = scmp.lt.u32.totalorder %s9026_s3, %s10706_s11 }
  0xc7   : > { %p8542_p5 = scmp.ne.s32.totalorder %s9026_s3, %s8541_s25  ;;  %p8548_p13 = scmp.lt.u32.totalorder %s8546_s16, %s8541_s25 }
  0xc8   : > { %p8550_p4 = scmp.lt.u32.totalorder %s8541_s25, %s9026_s3 }
  0xc9   : > { %p8544_p10 = pnand %p8542_p5, %p10703_p9  ;;  %p8549_p2 = por %p8548_p13, %p8547_p3 }
  0xcb   : > { %p8545_p1 = pneg %p8544_p10  ;;  %p8551_p6 = por %p8550_p4, %p8549_p2 }
  0xcd   : > { %p8552_p0 = pnand %p8551_p6, %p8545_p1 }
  0xcf   : > { %8555 = shalt.err (!%p8552_p0)
}
  0xd0   : > { %s8556_s23 = scalar_lea.vmem %s688_s15, 256  ;;  %s8665_s27 = smov [#allocation10]  }
  0xd1   : > { %p8557_p8 = scmp.ne.s32.totalorder %s688_s15, %s8556_s23  ;;  %s8561_s19 = sshll.u32 %s8665_s27, 4  ;;  %s8562_s19 = int_to_ptr.vmem [resolvable:$false] %s8561_s19 }
  0xd2   : > { %s8563_s10 = scalar_lea.vmem %s8562_s19, 512  ;;  %p8564_p5 = scmp.lt.s32.totalorder %s688_s15, %s8562_s19 }
  0xd3   : > { %p8559_p11 = pnand %p8557_p8, %p10703_p9  ;;  %p8565_p10 = scmp.lt.s32.totalorder %s8563_s10, %s8556_s23 }
  0xd5   : > { %p8560_p12 = pneg %p8559_p11  ;;  %p8566_p7 = por %p8565_p10, %p8564_p5 }
  0xd7   : > { %p8567_p3 = pnand %p8566_p7, %p8560_p12 }
  0xd9   : > { %8570 = shalt.err (!%p8567_p3)
}
  0xda   : > { %p10707_p13 = scmp.ne.s32.totalorder %s10691_s2, 0  ;;  %s695_s22 = scalar_lea.sflag [#allocation12], %s8839_s29 }
  0xdb   : > { %s8571_s4 = scalar_lea.hbm %s8960_s20, 8192  ;;  %s8576_s25 = scalar_lea.hbm %s10633_s12, 16384 }
  0xdc   : > { %8171 = dma.hbm_to_vmem [thread:$0]  (!%p10707_p13), %s9026_s3, 256, %s688_s15, %s648_s18  }
  0xdd   : > { %p8572_p1 = scmp.ne.s32.totalorder %s8960_s20, %s8571_s4  ;;  %p8577_p7 = scmp.lt.u32.totalorder %s8960_s20, %s10633_s12 }
  0xde   : > { %p8578_p6 = scmp.lt.u32.totalorder %s8576_s25, %s8571_s4  ;;  %p8580_p8 = scmp.lt.u32.totalorder %s8571_s4, %s8960_s20 }
  0xdf   : > { %p8574_p2 = pnand %p8572_p1, %p10703_p9 }
  0xe0   : > { %p8579_p0 = por %p8578_p6, %p8577_p7 }
  0xe1   : > { %p8575_p4 = pneg %p8574_p2 }
  0xe2   : > { %p8581_p11 = por %p8580_p8, %p8579_p0 }
  0xe4   : > { %p8582_p12 = pnand %p8581_p11, %p8575_p4 }
  0xe6   : > { %8585 = shalt.err (!%p8582_p12)
}
  0xe7   : > { %s8586_s18 = scalar_lea.vmem %s8964_s13, 8192  ;;  %s8666_s3 = smov [#allocation11]  }
  0xe8   : > { %p8587_p5 = scmp.ne.s32.totalorder %s8964_s13, %s8586_s18  ;;  %s8591_s15 = sshll.u32 %s8666_s3, 4  ;;  %s8592_s15 = int_to_ptr.vmem [resolvable:$false] %s8591_s15 }
  0xe9   : > { %s8593_s16 = scalar_lea.vmem %s8592_s15, 16384  ;;  %p8594_p1 = scmp.lt.s32.totalorder %s8964_s13, %s8592_s15 }
  0xea   : > { %p8589_p10 = pnand %p8587_p5, %p10703_p9  ;;  %p8595_p2 = scmp.lt.s32.totalorder %s8593_s16, %s8586_s18 }
  0xec   : > { %p8590_p3 = pneg %p8589_p10  ;;  %p8596_p7 = por %p8595_p2, %p8594_p1 }
  0xee   : > { %p8597_p6 = pnand %p8596_p7, %p8590_p3 }
  0xf0   : > { %8600 = shalt.err (!%p8597_p6)
}
  0xf1   : > { %8174 = dma.hbm_to_vmem [thread:$0]  (!%p10707_p13), %s8960_s20, 8192, %s8964_s13, %s695_s22, %s8659_s17, %s8659_s17, %s8661_s7  }
  0xf2   : > { %p10708_p9 = scmp.ne.s32.totalorder %s10689_s26, 0 }
  0xf3   : > { %p10709_p4 = scmp.eq.s32.totalorder (!%p10708_p9), %s8802_s1, 0 }
  0xf4   : > { %741 = sbr.rel (%p10708_p9) target bundleno = 3671 (0xe57), region = 96 }
  0xfb   : > { %8618 = dma.done.wait (%p10709_p4), [#allocation4], 2048   ;;  %p10710_p0 = pmov %p10709_p4 }
  0xfc   : > { %s10711_s2 = sld [smem:[#allocation22_spill]]  ;;  %s747_s28 = sand.u32 1, %s8802_s1  }
  0xfd   : > { %8620 = vsyncadd (%p10710_p0), [#allocation4], 4294965248  ;;  %s749_s14 = sand.u32 1, %s8643_s30   ;;  %s748_s23 = scalar_lea.sflag [#allocation6], %s747_s28 }
  0xfe   : > { %s8132_s0 = smul.u32 192, %s749_s14 }
 0x100   : > { %s9084_s29 = scalar_lea.vmem [#allocation5], %s8132_s0 }
 0x102   : > { %p10712_p8 = scmp.ne.s32.totalorder %s10711_s2, 0 }
 0x104   : > { %8622 = dma.done.wait (%p10712_p8), %s748_s23, 4096  }
 0x105   : > { %8624 = vsyncadd (%p10712_p8), %s748_s23, 4294963200  ;;  %s7361_s26 = sshll.u32 %s749_s14, 6  ;;  %s7362_s17 = sshll.u32 %s749_s14, 9 }
 0x106   : > { %s9090_s20 = scalar_lea.vmem [#allocation7], %s7361_s26  ;;  %s766_s13 = scalar_lea.sflag [#allocation9], %s747_s28 }
 0x107   : > { %s9092_s7 = scalar_lea.vmem [#allocation8], %s7362_s17 }
 0x108   : > { %8626 = dma.done.wait (%p10712_p8), %s766_s13, 8448  }
 0x109   : > { %8628 = vsyncadd (%p10712_p8), %s766_s13, 4294958848  ;;  %s7363_s27 = sshll.u32 %s749_s14, 4  ;;  %s784_s10 = scalar_lea.sflag [#allocation12], %s747_s28 }
 0x10a   : > { %s9098_s19 = scalar_lea.vmem [#allocation10], %s7363_s27  ;;  %s9100_s22 = scalar_lea.vmem [#allocation11], %s7362_s17 }
 0x10b   : > { %8630 = dma.done.wait (%p10712_p8), %s784_s10, 8192  }
 0x10c   : > { %8632 = vsyncadd (%p10712_p8), %s784_s10, 4294959104  ;;  %p10713_p13 = pmov %p10710_p0 }
 0x10d   : > { %p10714_p11 = pmov %p10710_p0 }
 0x10e   : > { %8634 = dma.done.wait (%p10713_p13), [#allocation12], 16  }
 0x10f   : > { %8636 = vsyncadd (%p10714_p11), [#allocation12], 4294967280  ;;  %p890_p12 = scmp.lt.s32.totalorder %s8802_s1, 1  ;;  %s10718_s17 = sld [smem:[#allocation27_spill]] }
 0x110   : > { %s10719_s6 = sld [smem:[#allocation33_spill]]  ;;  %s10720_s24 = sld [smem:[#allocation35_spill]] }
 0x111   : > { %s9112_s4 = scalar_select %p890_p12, %s8802_s1, 1 }
 0x112   : > { %s10721_s16 = sld [smem:[#allocation36_spill]]  ;;  %s10722_s0 = sld [smem:[#allocation37_spill]] }
 0x113   : > { %s8133_s8 = smul.u32 3, %s9112_s4  ;;  %s7366_s27 = sshll.u32 %s9112_s4, 4 }
 0x114   : > { %p10724_p5 = scmp.ne.s32.totalorder %s8802_s1, 0 }
 0x115   : > { %s9130_s13 = scalar_lea.vmem %s10718_s17, %s8133_s8  ;;  %s10723_s17 = sld [smem:[#allocation38_spill]]  ;;  %v940_v1 = vld [vmem:[#allocation3] sm:$0xff] (!%p10724_p5)  ;;  %v8667_v2 = vmov (!%p10724_p5), 0   ;;  %v941_v3 = vld [vmem:[#allocation3 + $0x8] sm:$0xff] (!%p10724_p5)  ;;  %v942_v4 = vld [vmem:[#allocation3 + $0x10] sm:$0xff] (!%p10724_p5)  ;;  %v926_v27 = vlaneseq (!%p10724_p5)  ;;  %v8668_v30 = vmov (!%p10724_p5), 1.0  }
 0x116   : > { %s9136_s11 = scalar_lea.vmem %s10719_s6, %s7366_s27  ;;  %s909_s18 = scalar_lea.vmem %s10720_s24, %s9112_s4  ;;  %8237 = vset.pattern.permute.xlu0 (!%p10724_p5), %v8667_v2  ;;  %v943_v5 = vld [vmem:[#allocation3 + $0x18] sm:$0xff] (!%p10724_p5)  ;;  %v8098_v6 = vpack.c.bf16 (!%p10724_p5), %v941_v3, %v940_v1  ;;  %v944_v9 = vld [vmem:[#allocation3 + $0x20] sm:$0xff] (!%p10724_p5)  ;;  %v945_v10 = vld [vmem:[#allocation3 + $0x28] sm:$0xff] (!%p10724_p5) }
 0x117   : > { %923 = sbr.rel (%p10724_p5) target bundleno = 635 (0x27b), region = 128  ;;  %s10725_s27 = sld [smem:[#allocation23_spill]] (!%p10724_p5)  ;;  %v8102_v7 = vpack.c.bf16 (!%p10724_p5), %v943_v5, %v942_v4  ;;  %v8106_v11 = vpack.c.bf16 (!%p10724_p5), %v945_v10, %v944_v9  ;;  %v946_v12 = vld [vmem:[#allocation3 + $0x30] sm:$0xff] (!%p10724_p5)  ;;  %v947_v13 = vld [vmem:[#allocation3 + $0x38] sm:$0xff] (!%p10724_p5)  ;;  %v948_v15 = vld [vmem:[#allocation3 + $0x40] sm:$0xff] (!%p10724_p5)  ;;  %v927_v28 = vand.u32 (!%p10724_p5), 127, %v926_v27 }
 0x118   : > { %s912_s2 = scalar_lea.vmem %s10721_s16, %s9112_s4  ;;  %s915_s23 = scalar_lea.vmem %s10722_s0, %s9112_s4  ;;  %8099 = vmatprep.subr.bf16.mxu0 (!%p10724_p5), %v8098_v6  ;;  %v8110_v14 = vpack.c.bf16 (!%p10724_p5), %v947_v13, %v946_v12  ;;  %v949_v16 = vld [vmem:[#allocation3 + $0x48] sm:$0xff] (!%p10724_p5)  ;;  %v950_v18 = vld [vmem:[#allocation3 + $0x50] sm:$0xff] (!%p10724_p5)  ;;  %v951_v19 = vld [vmem:[#allocation3 + $0x58] sm:$0xff] (!%p10724_p5) }
 0x119   : > { %8101 = vmatpush3.bf16.msra.mxu0 (!%p10724_p5), %v8098_v6  ;;  %v8114_v17 = vpack.c.bf16 (!%p10724_p5), %v949_v16, %v948_v15  ;;  %v8118_v20 = vpack.c.bf16 (!%p10724_p5), %v951_v19, %v950_v18  ;;  %v952_v21 = vld [vmem:[#allocation3 + $0x60] sm:$0xff] (!%p10724_p5)  ;;  %v953_v22 = vld [vmem:[#allocation3 + $0x68] sm:$0xff] (!%p10724_p5)  ;;  %v954_v24 = vld [vmem:[#allocation3 + $0x70] sm:$0xff] (!%p10724_p5)  ;;  %s10726_s25 = sld [smem:[#allocation25_spill]] (!%p10724_p5) }
 0x11a   : > { %8103 = vmatprep.subr.bf16.mxu0 (!%p10724_p5), %v8102_v7  ;;  %v8122_v23 = vpack.c.bf16 (!%p10724_p5), %v953_v22, %v952_v21  ;;  %v955_v25 = vld [vmem:[#allocation3 + $0x78] sm:$0xff] (!%p10724_p5) }
 0x11b   : > { %s918_s21 = scalar_lea.vmem %s10723_s17, %s9112_s4  ;;  %v8126_v26 = vpack.c.bf16 (!%p10724_p5), %v955_v25, %v954_v24 }
 0x11d   : > { %v924_v0 = vld [vmem:[%s10725_s27] sm:$0xff] (!%p10724_p5)  ;;  %v925_v8 = vld [vmem:[%s10725_s27 + $0x8] sm:$0xff] (!%p10724_p5)  ;;  %8105 = vmatpush3.bf16.msra.mxu0 (!%p10724_p5), %v8102_v7 }
 0x11e   : > { %929 = vperm.xlu0 %8237, %v924_v0   ;;  %8107 = vmatprep.subr.bf16.mxu0 %v8106_v11 }
 0x11f   : > { %v957_v32 = vld [vmem:[%s10726_s25 + $0x8] sm:$0xff]  ;;  %v956_v33 = vld [vmem:[%s10726_s25] sm:$0xff] }
 0x121   : > { %8109 = vmatpush3.bf16.msra.mxu0 %v8106_v11 }
 0x122   : > { %932 = vperm.xlu0 %8237, %v925_v8   ;;  %8111 = vmatprep.subr.bf16.mxu0 %v8110_v14 }
 0x125   : > { %8113 = vmatpush3.bf16.msra.mxu0 %v8110_v14 }
 0x126   : > { %8115 = vmatprep.subr.bf16.mxu0 %v8114_v17 }
 0x129   : > { %8117 = vmatpush3.bf16.msra.mxu0 %v8114_v17 }
 0x12a   : > { %8119 = vmatprep.subr.bf16.mxu0 %v8118_v20 }
 0x12d   : > { %8121 = vmatpush3.bf16.msra.mxu0 %v8118_v20 }
 0x12e   : > { %8123 = vmatprep.subr.bf16.mxu0 %v8122_v23 }
 0x131   : > { %8125 = vmatpush3.bf16.msra.mxu0 %v8122_v23 }
 0x132   : > { %8127 = vmatprep.subr.bf16.mxu0 %v8126_v26 }
 0x135   : > { %8129 = vmatpush3.bf16.msra.mxu0 %v8126_v26 }
 0x19d   : > { %v930_v29 = vpop.permute.xlu0 %929 }
 0x19e   : > { %vm934_vm0 = vcmp.eq.s32.totalorder %v930_v29, %v927_v28 }
 0x19f   : > { %7843 = vmatprep.mubr.msk.f32.mxu0 %vm934_vm0, %v8668_v30 }
 0x1a1   : > { %v933_v31 = vpop.permute.xlu0 %932 }
 0x1a2   : > { %vm935_vm1 = vcmp.eq.s32.totalorder %v933_v31, %v927_v28 }
 0x1a3   : > { %7844 = vmatmul.mubr.msk.f32.vlgmr.msra.gmra.mrb[0].mxu0 %vm935_vm1, %v8668_v30 }
 0x276   : > { %v7845_v34 = vpop.f32.mrb[0].mxu0 }
 0x277   : > { %v1030_v35 = vadd.f32 %v7845_v34, %v957_v32  ;;  %v1024_v36 = vpop.f32.mrb[1].mxu0 }
 0x278   : > { %v1025_v37 = vadd.f32 %v1024_v36, %v956_v33 }
 0x279   : > { %1034 = vst [vmem:[#allocation2 + $0x8] sm:$0xff] %v1030_v35 }
 0x27a   : > { %1033 = vst [vmem:[#allocation2] sm:$0xff] %v1025_v37 }
 0x27b PF: > { %v8273_v38 = vld [vmem:[%s9084_s29 + $0x4] ss:$12 sps:$4 sm:$0xff]   ;;  %v8275_v39 = vld [vmem:[%s9084_s29] ss:$12 sps:$4 sm:$0xff]   ;;  %v8669_v40 = vmov 0   ;;  %v8670_v41 = vmov 0.0   ;;  %v1072_v3 = vlaneseq }
 0x27c   : > { %1247 = vmatprep.mubr.bf16.mxu0 %v8669_v40  ;;  %7846 = vmatprep.subr.bf16.mxu1 %v8670_v41  ;;  %v8276_v42 = vld [vmem:[%s9084_s29 + $0x1c] ss:$12 sps:$4 sm:$0xff]   ;;  %v8278_v43 = vld [vmem:[%s9084_s29 + $0x18] ss:$12 sps:$4 sm:$0xff]   ;;  %v8279_v44 = vld [vmem:[%s9084_s29 + $0x34] ss:$12 sps:$4 sm:$0xff]  }
 0x27d   : > { %1215 = vmatprep.subr.bf16.mxu0 %v8273_v38  ;;  %v8281_v45 = vld [vmem:[%s9084_s29 + $0x30] ss:$12 sps:$4 sm:$0xff]   ;;  %v8282_v46 = vld [vmem:[%s9084_s29 + $0x4c] ss:$12 sps:$4 sm:$0xff]   ;;  %v8284_v47 = vld [vmem:[%s9084_s29 + $0x48] ss:$12 sps:$4 sm:$0xff]  }
 0x27e   : > { %1216 = vmatpush1.bf16.msra.mxu0 %v8275_v39  ;;  %v8285_v48 = vld [vmem:[%s9084_s29 + $0x64] ss:$12 sps:$4 sm:$0xff]   ;;  %v8297_v49 = vld [vmem:[%s9084_s29 + $0x8] ss:$12 sps:$4 sm:$0xff]   ;;  %v8298_v50 = vld [vmem:[%s9084_s29 + $0x20] ss:$12 sps:$4 sm:$0xff]  }
 0x27f   : > { %1217 = vmatprep.subr.bf16.mxu0 %v8276_v42  ;;  %7847 = vmatpush3.bf16.msra.mxu1 %v8297_v49  ;;  %v8287_v51 = vld [vmem:[%s9084_s29 + $0x60] ss:$12 sps:$4 sm:$0xff]   ;;  %v8288_v52 = vld [vmem:[%s9084_s29 + $0x7c] ss:$12 sps:$4 sm:$0xff]   ;;  %v8299_v53 = vld [vmem:[%s9084_s29 + $0x38] ss:$12 sps:$4 sm:$0xff]  }
 0x280   : > { %7848 = vmatprep.subr.bf16.mxu1 %v8670_v41  ;;  %v8290_v54 = vld [vmem:[%s9084_s29 + $0x78] ss:$12 sps:$4 sm:$0xff]   ;;  %v8291_v55 = vld [vmem:[%s9084_s29 + $0x94] ss:$12 sps:$4 sm:$0xff]   ;;  %v8300_v56 = vld [vmem:[%s9084_s29 + $0x50] ss:$12 sps:$4 sm:$0xff]  }
 0x281   : > { %v8293_v57 = vld [vmem:[%s9084_s29 + $0x90] ss:$12 sps:$4 sm:$0xff]   ;;  %v8294_v58 = vld [vmem:[%s9084_s29 + $0xac] ss:$12 sps:$4 sm:$0xff]   ;;  %v8296_v59 = vld [vmem:[%s9084_s29 + $0xa8] ss:$12 sps:$4 sm:$0xff]  }
 0x282   : > { %1218 = vmatpush1.bf16.msra.mxu0 %v8278_v43  ;;  %v1035_v60 = vld [vmem:[#allocation2] sm:$0xff]  ;;  %v1036_v61 = vld [vmem:[#allocation2 + $0x8] sm:$0xff]  ;;  %v8302_v0 = vld [vmem:[%s9084_s29 + $0x80] ss:$12 sps:$4 sm:$0xff]   ;;  %vm8671_vm2 = vmmov 0   ;;  %v9209_v4 = vshrl.u32 %v1072_v3, 7 }
 0x283   : > { %1219 = vmatprep.subr.bf16.mxu0 %v8279_v44  ;;  %7849 = vmatpush3.bf16.msra.mxu1 %v8298_v50  ;;  %v1037_v62 = vpack.c.bf16 %v1036_v61, %v1035_v60  ;;  %v8301_v63 = vld [vmem:[%s9084_s29 + $0x68] ss:$12 sps:$4 sm:$0xff]   ;;  %v8303_v1 = vld [vmem:[%s9084_s29 + $0x98] ss:$12 sps:$4 sm:$0xff]   ;;  %v8304_v2 = vld [vmem:[%s9084_s29 + $0xb0] ss:$12 sps:$4 sm:$0xff]  }
 0x284   : > { %7850 = vmatprep.subr.bf16.mxu1 %v8670_v41  ;;  %7862 = vmatprep.mubr.msk.bf16.mxu1 %vm8671_vm2, %v8670_v41  ;;  %v9212_v5 = vsub.s32 1, %v9209_v4  ;;  %v1070_v6 = vld [vmem:[%s9130_s13] sm:$0x7]  ;;  %v9216_v7 = vsub.s32 0, %v9209_v4  ;;  %s8672_s29 = smov 80   ;;  %s8673_s15 = smov 112  }
 0x285   : > { %s8674_s13 = smov 96   ;;  %s8675_s28 = smov 64   ;;  %v9285_v18 = vsub.s32 2, %v9209_v4  ;;  %v8679_v20 = vmov 1983009808   ;;  %vm3111_vm3 = vcmask 130048  }
 0x286   : > { %1220 = vmatpush1.bf16.msra.mxu0 %v8281_v45  ;;  %v1079_v8 = vrot.slane %v1070_v6, %v9212_v5  ;;  %v1075_v11 = vrot.slane %v1070_v6, %v9216_v7  ;;  %s8676_s14 = smov 48   ;;  %s8677_s8 = smov 32   ;;  %v1346_v21 = vunpack.c.l.s4 %v8679_v20  ;;  %v8680_v26 = vmov 1934713408  }
 0x287   : > { %1221 = vmatprep.subr.bf16.mxu0 %v8282_v46  ;;  %7851 = vmatpush3.bf16.msra.mxu1 %v8299_v53  ;;  %s8678_s26 = smov 16   ;;  %v1083_v23 = vrot.slane %v1070_v6, %v9285_v18  ;;  %v1410_v27 = vunpack.c.l.s4 %v8680_v26  ;;  %vm4060_vm4 = vcmask 1043456   ;;  %vm3864_vm5 = vcmask 64512   ;;  %s10727_s5 = sld [smem:[#allocation29_spill]] }
 0x288   : > { %7852 = vmatprep.subr.bf16.mxu1 %v8670_v41  ;;  %v1347_v30 = vunpack.c.0.s8 %v1346_v21  ;;  %vm5396_vm6 = vcmask 261120   ;;  %vm5399_vm7 = vcmask 392192   ;;  %vm5402_vm8 = vcmask 523264   ;;  %s10729_s10 = sld [smem:[#allocation30_spill]]  ;;  %p7507_p10 = scmp.ne.s32.totalorder %s8802_s1, 1 }
 0x289   : > { %v1411_v33 = vunpack.c.0.s8 %v1410_v27  ;;  %vm5405_vm9 = vcmask 654336   ;;  %vm5408_vm10 = vcmask 785408   ;;  %vm5411_vm11 = vcmask 916480  }
 0x28a   : > { %1222 = vmatpush1.bf16.msra.mxu0 %v8284_v47  ;;  %v9297_v34 = vsub.s32 %v1347_v30, %v9209_v4  ;;  %vm8682_vm12 = vmmov (!%p7507_p10), 0   ;;  %vm6990_vm13 = vcmask (!%p7507_p10), 1041409   ;;  %vm6993_vm14 = vcmask (!%p7507_p10), 1041408  }
 0x28b   : > { %1223 = vmatprep.subr.bf16.mxu0 %v8285_v48  ;;  %7853 = vmatpush3.bf16.msra.mxu1 %v8300_v56  ;;  %v9306_v43 = vsub.s32 %v1411_v33, %v9209_v4  ;;  %vm7517_vm15 = vmpackc.low (!%p7507_p10), %vm6993_vm14, %vm6993_vm14 }
 0x28c   : > { %7854 = vmatprep.subr.bf16.mxu1 %v8670_v41 }
 0x28d   : > { %s10728_s6 = scalar_lea.vmem %s10727_s5, %s9112_s4 }
 0x28e   : > { %1224 = vmatpush1.bf16.msra.mxu0 %v8287_v51  ;;  %s10730_s9 = scalar_lea.vmem %s10729_s10, %s9112_s4 }
 0x28f   : > { %1225 = vmatprep.subr.bf16.mxu0 %v8288_v52  ;;  %7855 = vmatpush3.bf16.msra.mxu1 %v8301_v63 }
 0x290   : > { %7856 = vmatprep.subr.bf16.mxu1 %v8670_v41 }
 0x292   : > { %1226 = vmatpush1.bf16.msra.mxu0 %v8290_v54 }
 0x293   : > { %1227 = vmatprep.subr.bf16.mxu0 %v8291_v55  ;;  %7857 = vmatpush3.bf16.msra.mxu1 %v8302_v0 }
 0x294   : > { %7858 = vmatprep.subr.bf16.mxu1 %v8670_v41 }
 0x296   : > { %1228 = vmatpush1.bf16.msra.mxu0 %v8293_v57 }
 0x297   : > { %1229 = vmatprep.subr.bf16.mxu0 %v8294_v58  ;;  %7859 = vmatpush3.bf16.msra.mxu1 %v8303_v1 }
 0x298   : > { %7860 = vmatprep.subr.bf16.mxu1 %v8670_v41 }
 0x29a   : > { %1230 = vmatpush1.bf16.msra.mxu0 %v8296_v59 }
 0x29b   : > { %7890 = vmatprep.subr.bf16.mxu0 %v8670_v41  ;;  %7861 = vmatpush3.bf16.msra.mxu1 %v8304_v2 }
 0x29c   : > { %7866 = vmatprep.subr.bf16.mxu1 %v8670_v41 }
 0x29d   : > { %1248 = vmatmul.mubr.bf16.vlgmr.msra.gmra.mrb[0].mxu0 %v1037_v62 }
 0x29e   : > { %7892 = vmatprep.mubr.msk.bf16.mxu0 %vm8671_vm2, %v8670_v41  ;;  %7863 = vmatmul.mubr.bf16.vlgmr.msra.gmra.mrb[0].mxu1 %v1037_v62 }
 0x29f   : > { %7868 = vmatprep.mubr.msk.bf16.mxu1 %vm8671_vm2, %v8670_v41 }
 0x370   : > { %v1249_v9 = vpop.f32.mrb[0].mxu0 }
 0x371   : > { %v1251_v10 = vpop.f32.mrb[1].mxu0  ;;  %v9226_v15 = vadd.f32 %v1249_v9, %v1075_v11  ;;  %v1292_v19 = vpop.f32.mrb[0].mxu1 }
 0x372   : > { %v9220_v12 = vadd.f32 %v1251_v10, %v1079_v8  ;;  %v1253_v13 = vpop.f32.mrb[2].mxu0  ;;  %v7864_v22 = vpop.f32.mrb[1].mxu1  ;;  %v9288_v28 = vadd.f32 %v1292_v19, %v1083_v23 }
 0x373   : > { %v1255_v14 = vpop.f32.mrb[3].mxu0  ;;  %v9258_v17 = vadd.f32 %v1253_v13, %v1075_v11  ;;  %v1295_v24 = vpop.f32.mrb[2].mxu1 }
 0x374   : > { %1917 = vrot.lane.b32.xlu1 %v9220_v12, %s8672_s29  ;;  %1905 = vrot.lane.b32.xlu0 %v9220_v12, %s8673_s15  ;;  %v9252_v16 = vadd.f32 %v1255_v14, %v1079_v8  ;;  %v7865_v25 = vpop.f32.mrb[3].mxu1  ;;  %v9290_v29 = vadd.f32 %v1295_v24, %v1083_v23 }
 0x378   : > { %1911 = vrot.lane.b32.xlu0 %v9220_v12, %s8674_s13  ;;  %1301 = vrot.lane.b32.xlu1 %v9226_v15, %s8673_s15 }
 0x37c   : > { %1307 = vrot.lane.b32.xlu0 %v9226_v15, %s8674_s13  ;;  %1313 = vrot.lane.b32.xlu1 %v9226_v15, %s8672_s29 }
 0x380   : > { %1923 = vrot.lane.b32.xlu0 %v9220_v12, %s8675_s28  ;;  %1929 = vrot.lane.b32.xlu1 %v9220_v12, %s8676_s14 }
 0x384   : > { %1935 = vrot.lane.b32.xlu0 %v9220_v12, %s8677_s8  ;;  %1941 = vrot.lane.b32.xlu1 %v9220_v12, %s8678_s26 }
 0x388   : > { %1319 = vrot.lane.b32.xlu0 %v9226_v15, %s8675_s28  ;;  %1325 = vrot.lane.b32.xlu1 %v9226_v15, %s8676_s14 }
 0x38c   : > { %1331 = vrot.lane.b32.xlu0 %v9226_v15, %s8677_s8  ;;  %1337 = vrot.lane.b32.xlu1 %v9226_v15, %s8678_s26 }
 0x390   : > { %1907 = vrot.lane.b32.xlu0 %v9252_v16, %s8673_s15  ;;  %1913 = vrot.lane.b32.xlu1 %v9252_v16, %s8674_s13 }
 0x394   : > { %1919 = vrot.lane.b32.xlu0 %v9252_v16, %s8672_s29  ;;  %1303 = vrot.lane.b32.xlu1 %v9258_v17, %s8673_s15 }
 0x398   : > { %1309 = vrot.lane.b32.xlu0 %v9258_v17, %s8674_s13  ;;  %1315 = vrot.lane.b32.xlu1 %v9258_v17, %s8672_s29 }
 0x39c   : > { %1925 = vrot.lane.b32.xlu0 %v9252_v16, %s8675_s28  ;;  %1931 = vrot.lane.b32.xlu1 %v9252_v16, %s8676_s14 }
 0x3a0   : > { %1937 = vrot.lane.b32.xlu0 %v9252_v16, %s8677_s8  ;;  %1943 = vrot.lane.b32.xlu1 %v9252_v16, %s8678_s26 }
 0x3a4   : > { %1321 = vrot.lane.b32.xlu0 %v9258_v17, %s8675_s28  ;;  %1327 = vrot.lane.b32.xlu1 %v9258_v17, %s8676_s14 }
 0x3a8   : > { %1333 = vrot.lane.b32.xlu0 %v9258_v17, %s8677_s8  ;;  %1339 = vrot.lane.b32.xlu1 %v9258_v17, %s8678_s26 }
 0x3ac   : > { %2509 = vrot.lane.b32.xlu1 %v9288_v28, %s8673_s15  ;;  %2515 = vrot.lane.b32.xlu0 %v9288_v28, %s8674_s13 }
 0x3b0   : > { %2521 = vrot.lane.b32.xlu1 %v9288_v28, %s8672_s29  ;;  %2527 = vrot.lane.b32.xlu0 %v9288_v28, %s8675_s28 }
 0x3b4   : > { %2545 = vrot.lane.b32.xlu0 %v9288_v28, %s8678_s26  ;;  %2533 = vrot.lane.b32.xlu1 %v9288_v28, %s8676_s14 }
 0x3b8   : > { %2539 = vrot.lane.b32.xlu1 %v9288_v28, %s8677_s8 }
 0x3e6   : > { %v1918_v31 = vpop.permute.xlu1 %1917  ;;  %v1906_v32 = vpop.permute.xlu0 %1905 }
 0x3e7   : > { %v1963_v35 = vcombine.low %v1906_v32, %v1918_v31  ;;  %v1964_v36 = vcombine.high %v1906_v32, %v1918_v31 }
 0x3e9   : > { %v1971_v44 = vrot.slane %v1963_v35, %v9297_v34  ;;  %v1978_v45 = vrot.slane %v1964_v36, %v9297_v34 }
 0x3ea   : > { %v1912_v37 = vpop.permute.xlu0 %1911  ;;  %v1302_v38 = vpop.permute.xlu1 %1301 }
 0x3eb   : > { %v1947_v39 = vcombine.low %v9220_v12, %v1912_v37  ;;  %v1948_v42 = vcombine.high %v9220_v12, %v1912_v37 }
 0x3ed   : > { %v1955_v46 = vrot.slane %v1947_v39, %v9297_v34  ;;  %v1962_v47 = vrot.slane %v1948_v42, %v9297_v34 }
 0x3ee   : > { %v1308_v48 = vpop.permute.xlu0 %1307  ;;  %v1314_v49 = vpop.permute.xlu1 %1313 }
 0x3ef   : > { %v2011_v50 = vcombine.low %v1955_v46, %v1971_v44  ;;  %v2012_v51 = vcombine.high %v1955_v46, %v1971_v44  ;;  %v2027_v52 = vcombine.low %v1962_v47, %v1978_v45  ;;  %v2028_v53 = vcombine.high %v1962_v47, %v1978_v45 }
 0x3f0   : > { %v1343_v54 = vcombine.low %v9226_v15, %v1308_v48  ;;  %v1344_v55 = vcombine.high %v9226_v15, %v1308_v48  ;;  %v1359_v56 = vcombine.low %v1302_v38, %v1314_v49  ;;  %v1360_v57 = vcombine.high %v1302_v38, %v1314_v49 }
 0x3f1   : > { %v2019_v58 = vrot.slane %v2011_v50, %v9306_v43  ;;  %v2026_v59 = vrot.slane %v2012_v51, %v9306_v43  ;;  %v2035_v60 = vrot.slane %v2027_v52, %v9306_v43  ;;  %v2042_v61 = vrot.slane %v2028_v53, %v9306_v43 }
 0x3f2   : > { %v1351_v62 = vrot.slane %v1343_v54, %v9297_v34  ;;  %v1358_v63 = vrot.slane %v1344_v55, %v9297_v34  ;;  %v1367_v0 = vrot.slane %v1359_v56, %v9297_v34  ;;  %v1374_v1 = vrot.slane %v1360_v57, %v9297_v34  ;;  %v1924_v2 = vpop.permute.xlu0 %1923  ;;  %v1930_v3 = vpop.permute.xlu1 %1929 }
 0x3f3   : > { %v7412_v6 = vcombine.low %v2019_v58, %v2026_v59  ;;  %v7414_v8 = vcombine.high %v2019_v58, %v2026_v59  ;;  %v7416_v9 = vcombine.low %v2035_v60, %v2042_v61  ;;  %v7418_v10 = vcombine.high %v2035_v60, %v2042_v61 }
 0x3f4   : > { %v1407_v11 = vcombine.low %v1351_v62, %v1367_v0  ;;  %v1408_v12 = vcombine.high %v1351_v62, %v1367_v0  ;;  %v1423_v13 = vcombine.low %v1358_v63, %v1374_v1  ;;  %v1424_v14 = vcombine.high %v1358_v63, %v1374_v1 }
 0x3f5   : > { %v9329_v15 = vrot.slane %v7412_v6, %v9297_v34  ;;  %v9332_v19 = vrot.slane %v7414_v8, %v9297_v34  ;;  %v9335_v20 = vrot.slane %v7416_v9, %v9297_v34  ;;  %v9338_v21 = vrot.slane %v7418_v10, %v9297_v34 }
 0x3f6   : > { %v1415_v22 = vrot.slane %v1407_v11, %v9306_v43  ;;  %v1422_v23 = vrot.slane %v1408_v12, %v9306_v43  ;;  %v1431_v24 = vrot.slane %v1423_v13, %v9306_v43  ;;  %v1438_v25 = vrot.slane %v1424_v14, %v9306_v43  ;;  %v1936_v26 = vpop.permute.xlu0 %1935  ;;  %v1942_v27 = vpop.permute.xlu1 %1941 }
 0x3f7   : > { %v1979_v30 = vcombine.low %v1924_v2, %v1936_v26  ;;  %v1980_v31 = vcombine.high %v1924_v2, %v1936_v26  ;;  %v1995_v32 = vcombine.low %v1930_v3, %v1942_v27  ;;  %v1996_v33 = vcombine.high %v1930_v3, %v1942_v27 }
 0x3f8   : > { %v7396_v35 = vcombine.low %v1415_v22, %v1422_v23  ;;  %v7398_v36 = vcombine.high %v1415_v22, %v1422_v23  ;;  %v7400_v37 = vcombine.low %v1431_v24, %v1438_v25  ;;  %v7402_v38 = vcombine.high %v1431_v24, %v1438_v25 }
 0x3f9   : > { %v1987_v39 = vrot.slane %v1979_v30, %v9297_v34  ;;  %v1994_v42 = vrot.slane %v1980_v31, %v9297_v34  ;;  %v2003_v44 = vrot.slane %v1995_v32, %v9297_v34  ;;  %v2010_v45 = vrot.slane %v1996_v33, %v9297_v34 }
 0x3fa   : > { %v9349_v46 = vrot.slane %v7396_v35, %v9297_v34  ;;  %v9352_v47 = vrot.slane %v7398_v36, %v9297_v34  ;;  %v9355_v48 = vrot.slane %v7400_v37, %v9297_v34  ;;  %v9358_v49 = vrot.slane %v7402_v38, %v9297_v34  ;;  %v1320_v50 = vpop.permute.xlu0 %1319  ;;  %v1326_v51 = vpop.permute.xlu1 %1325 }
 0x3fb   : > { %v2043_v52 = vcombine.low %v1987_v39, %v2003_v44  ;;  %v2044_v53 = vcombine.high %v1987_v39, %v2003_v44  ;;  %v2059_v54 = vcombine.low %v1994_v42, %v2010_v45  ;;  %v2060_v55 = vcombine.high %v1994_v42, %v2010_v45 }
 0x3fc   : > { %v1679_v56 = vcombine.low %v9349_v46, %v9352_v47  ;;  %v1711_v57 = vcombine.low %v9355_v48, %v9358_v49  ;;  %v1680_v62 = vcombine.high %v9349_v46, %v9352_v47  ;;  %v1712_v1 = vcombine.high %v9355_v48, %v9358_v49 }
 0x3fd   : > { %v9365_v58 = vrot.slane %v2043_v52, %v9306_v43  ;;  %v9368_v59 = vrot.slane %v2044_v53, %v9306_v43  ;;  %v9371_v60 = vrot.slane %v2059_v54, %v9306_v43  ;;  %v9374_v61 = vrot.slane %v2060_v55, %v9306_v43 }
 0x3fe   : > { %v1332_v63 = vpop.permute.xlu0 %1331  ;;  %v1338_v0 = vpop.permute.xlu1 %1337  ;;  %v2283_v2 = vcombine.low %v9329_v15, %v9332_v19  ;;  %v2315_v3 = vcombine.low %v9335_v20, %v9338_v21  ;;  %v9385_v6 = vrot.slane %v1679_v56, %v9306_v43  ;;  %v9394_v22 = vrot.slane %v1711_v57, %v9306_v43 }
 0x3ff   : > { %v1375_v8 = vcombine.low %v1320_v50, %v1332_v63  ;;  %v1376_v9 = vcombine.high %v1320_v50, %v1332_v63  ;;  %v1391_v10 = vcombine.low %v1326_v51, %v1338_v0  ;;  %v1392_v11 = vcombine.high %v1326_v51, %v1338_v0 }
 0x400   : > { %v7413_v12 = vcombine.low %v9365_v58, %v9368_v59  ;;  %v7415_v13 = vcombine.high %v9365_v58, %v9368_v59  ;;  %v7417_v14 = vcombine.low %v9371_v60, %v9374_v61  ;;  %v2291_v31 = vrot.slane %v2283_v2, %v9306_v43 }
 0x401   : > { %v1383_v23 = vrot.slane %v1375_v8, %v9297_v34  ;;  %v1390_v24 = vrot.slane %v1376_v9, %v9297_v34  ;;  %v1399_v25 = vrot.slane %v1391_v10, %v9297_v34  ;;  %v1406_v26 = vrot.slane %v1392_v11, %v9297_v34 }
 0x402   : > { %v1908_v27 = vpop.permute.xlu0 %1907  ;;  %v1914_v30 = vpop.permute.xlu1 %1913  ;;  %v2323_v32 = vrot.slane %v2315_v3, %v9306_v43  ;;  %v7419_v42 = vcombine.high %v9371_v60, %v9374_v61  ;;  %v1743_v59 = vcombine.low %v9385_v6, %v9394_v22  ;;  %v1726_v46 = vrot.slane %v1712_v1, %v9306_v43 }
 0x403   : > { %v2083_v33 = vcombine.low %v9252_v16, %v1914_v30  ;;  %v2084_v35 = vcombine.high %v9252_v16, %v1914_v30  ;;  %v1439_v36 = vcombine.low %v1383_v23, %v1399_v25  ;;  %v1440_v37 = vcombine.high %v1383_v23, %v1399_v25 }
 0x404   : > { %v1455_v38 = vcombine.low %v1390_v24, %v1406_v26  ;;  %v1456_v39 = vcombine.high %v1390_v24, %v1406_v26  ;;  %v2347_v44 = vcombine.low %v2291_v31, %v2323_v32  ;;  %v2348_v9 = vcombine.high %v2291_v31, %v2323_v32 }
 0x405   : > { %v2091_v45 = vrot.slane %v2083_v33, %v9297_v34  ;;  %v2098_v50 = vrot.slane %v2084_v35, %v9297_v34  ;;  %v1447_v51 = vrot.slane %v1439_v36, %v9306_v43  ;;  %v1454_v52 = vrot.slane %v1440_v37, %v9306_v43 }
 0x406   : > { %v1463_v53 = vrot.slane %v1455_v38, %v9306_v43  ;;  %v1470_v16 = vrot.slane %v1456_v39, %v9306_v43  ;;  %v1920_v54 = vpop.permute.xlu0 %1919  ;;  %v1304_v55 = vpop.permute.xlu1 %1303  ;;  %v2491_v56 = vpack.c.bf16 %v2347_v44, %v2347_v44  ;;  %v9431_v32 = vrot.slane %v7413_v12, %v9297_v34 }
 0x407   : > { %v2099_v57 = vcombine.low %v1908_v27, %v1920_v54  ;;  %v2100_v58 = vcombine.high %v1908_v27, %v1920_v54  ;;  %v7397_v60 = vcombine.low %v1447_v51, %v1454_v52  ;;  %v7399_v61 = vcombine.high %v1447_v51, %v1454_v52 }
 0x408   : > { %v7401_v63 = vcombine.low %v1463_v53, %v1470_v16  ;;  %v7403_v0 = vcombine.high %v1463_v53, %v1470_v16  ;;  %v3116_v2 = vsel %vm3111_vm3, %v2491_v56, 0  ;;  %v9434_v35 = vrot.slane %v7415_v13, %v9297_v34 }
 0x409   : > { %v2107_v3 = vrot.slane %v2099_v57, %v9297_v34  ;;  %v2114_v8 = vrot.slane %v2100_v58, %v9297_v34  ;;  %v9418_v10 = vrot.slane %v7397_v60, %v9297_v34  ;;  %v9421_v11 = vrot.slane %v7399_v61, %v9297_v34  ;;  %7867 = vmatpush3.bf16.xpose.msra.mxu1 %v3116_v2 }
 0x40a   : > { %v9424_v23 = vrot.slane %v7401_v63, %v9297_v34  ;;  %v9427_v24 = vrot.slane %v7403_v0, %v9297_v34  ;;  %v1310_v25 = vpop.permute.xlu0 %1309  ;;  %7872 = vmatprep.subr.bf16.mxu1 %v8670_v41  ;;  %v1316_v31 = vpop.permute.xlu1 %1315  ;;  %v9437_v36 = vrot.slane %v7417_v14, %v9297_v34  ;;  %v9440_v37 = vrot.slane %v7419_v42, %v9297_v34 }
 0x40b   : > { %v2147_v26 = vcombine.low %v2091_v45, %v2107_v3  ;;  %v2148_v27 = vcombine.high %v2091_v45, %v2107_v3  ;;  %v2163_v30 = vcombine.low %v2098_v50, %v2114_v8  ;;  %v2164_v33 = vcombine.high %v2098_v50, %v2114_v8 }
 0x40c   : > { %v2492_v12 = vpack.c.bf16 %v2348_v9, %v2348_v9  ;;  %v1479_v13 = vcombine.low %v9258_v17, %v1310_v25  ;;  %v1480_v50 = vcombine.high %v9258_v17, %v1310_v25  ;;  %v1495_v14 = vcombine.low %v1304_v55, %v1316_v31 }
 0x40d   : > { %v2155_v38 = vrot.slane %v2147_v26, %v9306_v43  ;;  %v2162_v39 = vrot.slane %v2148_v27, %v9306_v43  ;;  %v9445_v44 = vrot.slane %v2163_v30, %v9306_v43  ;;  %v9448_v45 = vrot.slane %v2164_v33, %v9306_v43 }
 0x40e   : > { %v1926_v51 = vpop.permute.xlu0 %1925  ;;  %v1695_v42 = vcombine.low %v9418_v10, %v9421_v11  ;;  %v1696_v52 = vcombine.high %v9418_v10, %v9421_v11  ;;  %v1727_v53 = vcombine.low %v9424_v23, %v9427_v24  ;;  %v1887_v16 = vpack.c.bf16 %v1743_v59, %v1743_v59  ;;  %v1932_v3 = vpop.permute.xlu1 %1931 }
 0x40f   : > { %v1728_v54 = vcombine.high %v9424_v23, %v9427_v24  ;;  %v1487_v56 = vrot.slane %v1479_v13, %v9297_v34  ;;  %v1494_v57 = vrot.slane %v1480_v50, %v9297_v34  ;;  %v1496_v17 = vcombine.high %v1304_v55, %v1316_v31 }
 0x410   : > { %v7420_v58 = vcombine.low %v2155_v38, %v2162_v39  ;;  %v7422_v60 = vcombine.high %v2155_v38, %v2162_v39  ;;  %v7424_v61 = vcombine.low %v9445_v44, %v9448_v45  ;;  %7869 = vmatmul.mubr.msk.bf16.vlgmr.msra.gmra.mrb[4].mxu1 %vm3111_vm3, %v1887_v16  ;;  %v3162_v63 = vsel %vm3111_vm3, %v2492_v12, 0 }
 0x411   : > { %7873 = vmatpush3.bf16.xpose.msra.mxu1 %v3162_v63  ;;  %v1503_v59 = vrot.slane %v1495_v14, %v9297_v34  ;;  %v1510_v0 = vrot.slane %v1496_v17, %v9297_v34  ;;  %v2299_v2 = vcombine.low %v9431_v32, %v9434_v35  ;;  %v2331_v55 = vcombine.low %v9437_v36, %v9440_v37 }
 0x412   : > { %7874 = vmatprep.mubr.msk.bf16.mxu1 %vm8671_vm2, %v8670_v41  ;;  %v1744_v8 = vcombine.high %v9385_v6, %v9394_v22  ;;  %7878 = vmatprep.subr.bf16.mxu1 %v8670_v41  ;;  %v2284_v9 = vcombine.high %v9329_v15, %v9332_v19  ;;  %v2316_v25 = vcombine.high %v9335_v20, %v9338_v21  ;;  %v1938_v31 = vpop.permute.xlu0 %1937  ;;  %v1944_v63 = vpop.permute.xlu1 %1943 }
 0x413   : > { %v1543_v26 = vcombine.low %v1487_v56, %v1503_v59  ;;  %v1544_v27 = vcombine.high %v1487_v56, %v1503_v59  ;;  %v1559_v30 = vcombine.low %v1494_v57, %v1510_v0  ;;  %v1560_v33 = vcombine.high %v1494_v57, %v1510_v0 }
 0x414   : > { %v9482_v38 = vrot.slane %v2299_v2, %v9306_v43  ;;  %v9485_v39 = vrot.slane %v2331_v55, %v9306_v43  ;;  %v1888_v6 = vpack.c.bf16 %v1744_v8, %v1744_v8  ;;  %v2298_v22 = vrot.slane %v2284_v9, %v9306_v43 }
 0x415   : > { %v1551_v12 = vrot.slane %v1543_v26, %v9306_v43  ;;  %v1558_v15 = vrot.slane %v1544_v27, %v9306_v43  ;;  %v1567_v19 = vrot.slane %v1559_v30, %v9306_v43  ;;  %v1574_v20 = vrot.slane %v1560_v33, %v9306_v43 }
 0x416   : > { %v2351_v21 = vcombine.low %v9482_v38, %v9485_v39  ;;  %v2330_v13 = vrot.slane %v2316_v25, %v9306_v43  ;;  %v2115_v50 = vcombine.low %v1926_v51, %v1938_v31  ;;  %v2116_v14 = vcombine.high %v1926_v51, %v1938_v31  ;;  %v1322_v27 = vpop.permute.xlu0 %1321 }
 0x417   : > { %v7404_v16 = vcombine.low %v1551_v12, %v1558_v15  ;;  %v7406_v56 = vcombine.high %v1551_v12, %v1558_v15  ;;  %v7408_v57 = vcombine.low %v1567_v19, %v1574_v20  ;;  %v7410_v17 = vcombine.high %v1567_v19, %v1574_v20 }
 0x418   : > { %v9496_v59 = vrot.slane %v7420_v58, %v9297_v34  ;;  %v7426_v0 = vcombine.high %v9445_v44, %v9448_v45  ;;  %v2495_v2 = vpack.c.bf16 %v2351_v21, %v2351_v21  ;;  %7875 = vmatmul.mubr.msk.bf16.vlgmr.msra.gmra.mrb[8].mxu1 %vm3111_vm3, %v1888_v6  ;;  %v2349_v55 = vcombine.low %v2298_v22, %v2330_v13  ;;  %v1328_v21 = vpop.permute.xlu1 %1327 }
 0x419   : > { %v9502_v8 = vrot.slane %v7422_v60, %v9297_v34  ;;  %v9505_v51 = vrot.slane %v7424_v61, %v9297_v34  ;;  %v2123_v9 = vrot.slane %v2115_v50, %v9297_v34  ;;  %v2130_v25 = vrot.slane %v2116_v14, %v9297_v34  ;;  %7880 = vmatprep.mubr.msk.bf16.mxu1 %vm8671_vm2, %v8670_v41 }
 0x41a   : > { %v3300_v58 = vsel %vm3111_vm3, %v2495_v2, 0  ;;  %v2493_v44 = vpack.c.bf16 %v2349_v55, %v2349_v55  ;;  %v2131_v45 = vcombine.low %v1932_v3, %v1944_v63  ;;  %v2132_v26 = vcombine.high %v1932_v3, %v1944_v63 }
 0x41b   : > { %v9513_v30 = vrot.slane %v7404_v16, %v9297_v34  ;;  %v9516_v60 = vrot.slane %v7406_v56, %v9297_v34  ;;  %v9519_v61 = vrot.slane %v7408_v57, %v9297_v34  ;;  %v9522_v33 = vrot.slane %v7410_v17, %v9297_v34  ;;  %7891 = vmatpush3.bf16.xpose.msra.mxu0 %v3300_v58  ;;  %v1334_v57 = vpop.permute.xlu0 %1333 }
 0x41c   : > { %v3208_v31 = vsel %vm3111_vm3, %v2493_v44, 0  ;;  %v2139_v6 = vrot.slane %v2131_v45, %v9297_v34  ;;  %v2146_v3 = vrot.slane %v2132_v26, %v9297_v34  ;;  %v9531_v12 = vrot.slane %v1695_v42, %v9306_v43  ;;  %7902 = vmatprep.subr.bf16.mxu0 %v8670_v41  ;;  %v1340_v26 = vpop.permute.xlu1 %1339 }
 0x41d   : > { %7879 = vmatpush3.bf16.xpose.msra.mxu1 %v3208_v31  ;;  %v9538_v15 = vrot.slane %v1727_v53, %v9306_v43  ;;  %v2300_v19 = vcombine.high %v9431_v32, %v9434_v35  ;;  %v2332_v20 = vcombine.high %v9437_v36, %v9440_v37  ;;  %v1694_v42 = vrot.slane %v1680_v62, %v9306_v43 }
 0x41e   : > { %v2179_v50 = vcombine.low %v2123_v9, %v2139_v6  ;;  %v2180_v14 = vcombine.high %v2123_v9, %v2139_v6  ;;  %v2195_v16 = vcombine.low %v2130_v25, %v2146_v3  ;;  %v2196_v56 = vcombine.high %v2130_v25, %v2146_v3  ;;  %7884 = vmatprep.subr.bf16.mxu1 %v8670_v41 }
 0x41f   : > { %v1747_v53 = vcombine.low %v9531_v12, %v9538_v15  ;;  %v9552_v32 = vrot.slane %v2300_v19, %v9306_v43  ;;  %v9555_v35 = vrot.slane %v2332_v20, %v9306_v43  ;;  %v1745_v2 = vcombine.low %v1694_v42, %v1726_v46 }
 0x420   : > { %v9562_v47 = vrot.slane %v2179_v50, %v9306_v43  ;;  %v9565_v62 = vrot.slane %v2180_v14, %v9306_v43  ;;  %v9568_v36 = vrot.slane %v2195_v16, %v9306_v43  ;;  %v9571_v37 = vrot.slane %v2196_v56, %v9306_v43 }
 0x421   : > { %v1891_v17 = vpack.c.bf16 %v1747_v53, %v1747_v53  ;;  %v2353_v63 = vcombine.low %v9552_v32, %v9555_v35  ;;  %v2350_v48 = vcombine.high %v2298_v22, %v2330_v13  ;;  %v9576_v49 = vrot.slane %v7426_v0, %v9297_v34 }
 0x422   : > { %v1815_v1 = vcombine.low %v9513_v30, %v9516_v60  ;;  %v1816_v55 = vcombine.high %v9513_v30, %v9516_v60  ;;  %v1847_v9 = vcombine.low %v9519_v61, %v9522_v33  ;;  %v1889_v58 = vpack.c.bf16 %v1745_v2, %v1745_v2 }
 0x423   : > { %7893 = vmatmul.mubr.msk.bf16.vlgmr.msra.gmra.mrb[4].mxu0 %vm3111_vm3, %v1891_v17  ;;  %v2497_v25 = vpack.c.bf16 %v2353_v63, %v2353_v63  ;;  %v2494_v44 = vpack.c.bf16 %v2350_v48, %v2350_v48  ;;  %v1511_v45 = vcombine.low %v1322_v27, %v1334_v57  ;;  %v7421_v22 = vcombine.low %v9562_v47, %v9565_v62 }
 0x424   : > { %v7423_v13 = vcombine.high %v9562_v47, %v9565_v62  ;;  %v7425_v0 = vcombine.low %v9568_v36, %v9571_v37  ;;  %v7427_v31 = vcombine.high %v9568_v36, %v9571_v37  ;;  %7904 = vmatprep.mubr.msk.bf16.mxu0 %vm8671_vm2, %v8670_v41  ;;  %7881 = vmatmul.mubr.msk.bf16.vlgmr.msra.gmra.mrb[12].mxu1 %vm3111_vm3, %v1889_v58 }
 0x425   : > { %v3392_v6 = vsel %vm3111_vm3, %v2497_v25, 0  ;;  %v3254_v3 = vsel %vm3111_vm3, %v2494_v44, 0  ;;  %v1512_v19 = vcombine.high %v1322_v27, %v1334_v57  ;;  %v1519_v20 = vrot.slane %v1511_v45, %v9297_v34  ;;  %7886 = vmatprep.mubr.msk.bf16.mxu1 %vm8671_vm2, %v8670_v41 }
 0x426   : > { %7903 = vmatpush3.bf16.xpose.msra.mxu0 %v3392_v6  ;;  %7885 = vmatpush3.bf16.xpose.msra.mxu1 %v3254_v3  ;;  %v1527_v50 = vcombine.low %v1328_v21, %v1340_v26  ;;  %v1528_v14 = vcombine.high %v1328_v21, %v1340_v26  ;;  %v9603_v16 = vrot.slane %v1696_v52, %v9306_v43 }
 0x427   : > { %v1526_v56 = vrot.slane %v1512_v19, %v9297_v34  ;;  %v9610_v53 = vrot.slane %v1728_v54, %v9306_v43  ;;  %7914 = vmatprep.subr.bf16.mxu0 %v8670_v41  ;;  %v2419_v27 = vcombine.low %v9496_v59, %v9502_v8  ;;  %v2451_v21 = vcombine.low %v9505_v51, %v9576_v49 }
 0x428   : > { %v1535_v10 = vrot.slane %v1527_v50, %v9297_v34  ;;  %v1542_v11 = vrot.slane %v1528_v14, %v9297_v34  ;;  %v1746_v52 = vcombine.high %v1694_v42, %v1726_v46  ;;  %7896 = vmatprep.subr.bf16.mxu1 %v8670_v41  ;;  %v2352_v47 = vcombine.high %v9482_v38, %v9485_v39 }
 0x429   : > { %v1749_v23 = vcombine.low %v9603_v16, %v9610_v53  ;;  %v9625_v24 = vrot.slane %v2419_v27, %v9306_v43  ;;  %v9628_v54 = vrot.slane %v2451_v21, %v9306_v43  ;;  %v9642_v44 = vrot.slane %v1815_v1, %v9306_v43 }
 0x42a   : > { %v1575_v62 = vcombine.low %v1519_v20, %v1535_v10  ;;  %v1576_v36 = vcombine.high %v1519_v20, %v1535_v10  ;;  %v1591_v37 = vcombine.low %v1526_v56, %v1542_v11  ;;  %v1592_v57 = vcombine.high %v1526_v56, %v1542_v11 }
 0x42b   : > { %v1893_v17 = vpack.c.bf16 %v1749_v23, %v1749_v23  ;;  %v2483_v42 = vcombine.low %v9625_v24, %v9628_v54  ;;  %v1890_v46 = vpack.c.bf16 %v1746_v52, %v1746_v52  ;;  %v2496_v63 = vpack.c.bf16 %v2352_v47, %v2352_v47 }
 0x42c   : > { %v1583_v2 = vrot.slane %v1575_v62, %v9306_v43  ;;  %v1590_v48 = vrot.slane %v1576_v36, %v9306_v43  ;;  %v1599_v25 = vrot.slane %v1591_v37, %v9306_v43  ;;  %v1606_v58 = vrot.slane %v1592_v57, %v9306_v43 }
 0x42d   : > { %7905 = vmatmul.mubr.msk.bf16.vlgmr.msra.gmra.mrb[8].mxu0 %vm3111_vm3, %v1893_v17  ;;  %v2499_v38 = vpack.c.bf16 %v2483_v42, %v2483_v42  ;;  %7887 = vmatmul.mubr.msk.bf16.vlgmr.msra.gmra.mrb[16].mxu1 %vm3111_vm3, %v1890_v46  ;;  %v3346_v39 = vsel %vm3111_vm3, %v2496_v63, 0  ;;  %v9645_v45 = vrot.slane %v1847_v9, %v9306_v43  ;;  %v2370_v26 = vrot.slane %v7421_v22, %v9297_v34 }
 0x42e   : > { %v2386_v6 = vrot.slane %v7423_v13, %v9297_v34  ;;  %v7405_v3 = vcombine.low %v1583_v2, %v1590_v48  ;;  %v7407_v19 = vcombine.high %v1583_v2, %v1590_v48  ;;  %7897 = vmatpush3.bf16.xpose.msra.mxu1 %v3346_v39  ;;  %v7409_v20 = vcombine.low %v1599_v25, %v1606_v58 }
 0x42f   : > { %v3484_v50 = vsel %vm3111_vm3, %v2499_v38, 0  ;;  %7916 = vmatprep.mubr.msk.bf16.mxu0 %vm8671_vm2, %v8670_v41  ;;  %v2420_v1 = vcombine.high %v9496_v59, %v9502_v8  ;;  %v2452_v9 = vcombine.high %v9505_v51, %v9576_v49  ;;  %7898 = vmatprep.mubr.msk.bf16.mxu1 %vm8671_vm2, %v8670_v41  ;;  %v2402_v22 = vrot.slane %v7425_v0, %v9297_v34 }
 0x430   : > { %v2418_v13 = vrot.slane %v7427_v31, %v9297_v34  ;;  %v7411_v14 = vcombine.high %v1599_v25, %v1606_v58  ;;  %7915 = vmatpush3.bf16.xpose.msra.mxu0 %v3484_v50  ;;  %v1879_v56 = vcombine.low %v9642_v44, %v9645_v45  ;;  %v1848_v27 = vcombine.high %v9519_v61, %v9522_v33 }
 0x431   : > { %7926 = vmatprep.subr.bf16.mxu0 %v8670_v41  ;;  %v2434_v59 = vrot.slane %v2420_v1, %v9306_v43  ;;  %v2466_v8 = vrot.slane %v2452_v9, %v9306_v43  ;;  %v1748_v51 = vcombine.high %v9531_v12, %v9538_v15  ;;  %v9670_v49 = vrot.slane %v7405_v3, %v9297_v34 }
 0x432   : > { %v9673_v0 = vrot.slane %v7407_v19, %v9297_v34  ;;  %7908 = vmatprep.subr.bf16.mxu1 %v8670_v41  ;;  %v1798_v31 = vrot.slane %v7409_v20, %v9297_v34  ;;  %v2354_v21 = vcombine.high %v9552_v32, %v9555_v35  ;;  %v1814_v10 = vrot.slane %v7411_v14, %v9297_v34 }
 0x433   : > { %v2485_v61 = vcombine.low %v2434_v59, %v2466_v8  ;;  %v1892_v33 = vpack.c.bf16 %v1748_v51, %v1748_v51  ;;  %v1895_v11 = vpack.c.bf16 %v1879_v56, %v1879_v56  ;;  %v2435_v52 = vcombine.low %v2370_v26, %v2386_v6 }
 0x434   : > { %v2467_v12 = vcombine.low %v2402_v22, %v2418_v13  ;;  %v2498_v23 = vpack.c.bf16 %v2354_v21, %v2354_v21  ;;  %v1830_v47 = vrot.slane %v1816_v55, %v9306_v43  ;;  %v1862_v62 = vrot.slane %v1848_v27, %v9306_v43 }
 0x435   : > { %v2501_v15 = vpack.c.bf16 %v2485_v61, %v2485_v61  ;;  %7899 = vmatmul.mubr.msk.bf16.vlgmr.msra.gmra.mrb[20].mxu1 %vm3111_vm3, %v1892_v33  ;;  %v2443_v36 = vrot.slane %v2435_v52, %v9306_v43  ;;  %v1831_v35 = vcombine.low %v9670_v49, %v9673_v0  ;;  %v2484_v30 = vcombine.high %v9625_v24, %v9628_v54  ;;  %v2510_v52 = vpop.permute.xlu1 %2509 }
 0x436   : > { %v2475_v32 = vrot.slane %v2467_v12, %v9306_v43  ;;  %7910 = vmatprep.mubr.msk.bf16.mxu1 %vm8671_vm2, %v8670_v41  ;;  %v3438_v57 = vsel %vm3111_vm3, %v2498_v23, 0  ;;  %v1863_v60 = vcombine.low %v1798_v31, %v1814_v10  ;;  %v2436_v17 = vcombine.high %v2370_v26, %v2386_v6  ;;  %v2516_v12 = vpop.permute.xlu0 %2515 }
 0x437   : > { %7917 = vmatmul.mubr.msk.bf16.vlgmr.msra.gmra.mrb[12].mxu0 %vm3111_vm3, %v1895_v11  ;;  %v3576_v37 = vsel %vm3111_vm3, %v2501_v15, 0  ;;  %7909 = vmatpush3.bf16.xpose.msra.mxu1 %v3438_v57  ;;  %v1881_v42 = vcombine.low %v1830_v47, %v1862_v62  ;;  %v1750_v46 = vcombine.high %v9603_v16, %v9610_v53  ;;  %v2468_v63 = vcombine.high %v2402_v22, %v2418_v13 }
 0x438   : > { %7927 = vmatpush3.bf16.xpose.msra.mxu0 %v3576_v37  ;;  %v2487_v55 = vcombine.low %v2443_v36, %v2475_v32  ;;  %7928 = vmatprep.mubr.msk.bf16.mxu0 %vm8671_vm2, %v8670_v41  ;;  %v2500_v48 = vpack.c.bf16 %v2484_v30, %v2484_v30  ;;  %v2450_v24 = vrot.slane %v2436_v17, %v9306_v43 }
 0x439   : > { %7938 = vmatprep.subr.bf16.mxu0 %v8670_v41  ;;  %7920 = vmatprep.subr.bf16.mxu1 %v8670_v41  ;;  %v2482_v54 = vrot.slane %v2468_v63, %v9306_v43  ;;  %v1897_v25 = vpack.c.bf16 %v1881_v42, %v1881_v42  ;;  %v1894_v58 = vpack.c.bf16 %v1750_v46, %v1750_v46 }
 0x43a   : > { %v2503_v2 = vpack.c.bf16 %v2487_v55, %v2487_v55  ;;  %v1839_v38 = vrot.slane %v1831_v35, %v9306_v43  ;;  %v1871_v39 = vrot.slane %v1863_v60, %v9306_v43  ;;  %v3530_v16 = vsel %vm3111_vm3, %v2500_v48, 0 }
 0x43b   : > { %v2489_v53 = vcombine.low %v2450_v24, %v2482_v54  ;;  %v2486_v6 = vcombine.high %v2434_v59, %v2466_v8  ;;  %v1832_v3 = vcombine.high %v9670_v49, %v9673_v0  ;;  %v1864_v19 = vcombine.high %v1798_v31, %v1814_v10 }
 0x43c   : > { %v3668_v26 = vsel %vm3111_vm3, %v2503_v2, 0  ;;  %v1883_v20 = vcombine.low %v1839_v38, %v1871_v39  ;;  %v1880_v50 = vcombine.high %v9642_v44, %v9645_v45  ;;  %v2488_v45 = vcombine.high %v2443_v36, %v2475_v32 }
 0x43d   : > { %v2505_v1 = vpack.c.bf16 %v2489_v53, %v2489_v53  ;;  %v2502_v9 = vpack.c.bf16 %v2486_v6, %v2486_v6  ;;  %v1846_v14 = vrot.slane %v1832_v3, %v9306_v43  ;;  %v1878_v56 = vrot.slane %v1864_v19, %v9306_v43 }
 0x43e   : > { %7911 = vmatmul.mubr.msk.bf16.vlgmr.msra.gmra.mrb[24].mxu1 %vm3111_vm3, %v1894_v58  ;;  %v1899_v22 = vpack.c.bf16 %v1883_v20, %v1883_v20  ;;  %v1896_v13 = vpack.c.bf16 %v1880_v50, %v1880_v50  ;;  %v1882_v8 = vcombine.high %v1830_v47, %v1862_v62  ;;  %v2504_v51 = vpack.c.bf16 %v2488_v45, %v2488_v45  ;;  %v2522_v62 = vpop.permute.xlu1 %2521 }
 0x43f   : > { %7929 = vmatmul.mubr.msk.bf16.vlgmr.msra.gmra.mrb[16].mxu0 %vm3111_vm3, %v1897_v25  ;;  %7921 = vmatpush3.bf16.xpose.msra.mxu1 %v3530_v16  ;;  %v3760_v27 = vsel %vm3111_vm3, %v2505_v1, 0  ;;  %v3622_v44 = vsel %vm3111_vm3, %v2502_v9, 0  ;;  %v1885_v59 = vcombine.low %v1846_v14, %v1878_v56  ;;  %v2490_v61 = vcombine.high %v2450_v24, %v2482_v54 }
 0x440   : > { %7939 = vmatpush3.bf16.xpose.msra.mxu0 %v3668_v26  ;;  %7940 = vmatprep.mubr.msk.bf16.mxu0 %vm8671_vm2, %v8670_v41  ;;  %v1898_v0 = vpack.c.bf16 %v1882_v8, %v1882_v8  ;;  %v3714_v31 = vsel %vm3111_vm3, %v2504_v51, 0  ;;  %v1884_v33 = vcombine.high %v1839_v38, %v1871_v39  ;;  %v2551_v15 = vcombine.low %v9288_v28, %v2516_v12  ;;  %v2528_v8 = vpop.permute.xlu0 %2527 }
 0x441   : > { %7950 = vmatprep.subr.bf16.mxu0 %v8670_v41  ;;  %7922 = vmatprep.mubr.msk.bf16.mxu1 %vm8671_vm2, %v8670_v41  ;;  %v1901_v49 = vpack.c.bf16 %v1885_v59, %v1885_v59  ;;  %v2506_v21 = vpack.c.bf16 %v2490_v61, %v2490_v61  ;;  %v2552_v23 = vcombine.high %v9288_v28, %v2516_v12 }
 0x442   : > { %7932 = vmatprep.subr.bf16.mxu1 %v8670_v41  ;;  %v1900_v10 = vpack.c.bf16 %v1884_v33, %v1884_v33  ;;  %v1886_v47 = vcombine.high %v1846_v14, %v1878_v56  ;;  %v2559_v36 = vrot.slane %v2551_v15, %v9297_v34  ;;  %v2567_v35 = vcombine.low %v2510_v52, %v2522_v62  ;;  %v2534_v51 = vpop.permute.xlu1 %2533 }
 0x443   : > { %v3806_v11 = vsel %vm3111_vm3, %v2506_v21, 0  ;;  %v2566_v32 = vrot.slane %v2552_v23, %v9297_v34  ;;  %v2568_v37 = vcombine.high %v2510_v52, %v2522_v62 }
 0x444   : > { %v1902_v57 = vpack.c.bf16 %v1886_v47, %v1886_v47  ;;  %v2575_v30 = vrot.slane %v2567_v35, %v9297_v34 }
 0x445   : > { %v2582_v60 = vrot.slane %v2568_v37, %v9297_v34 }
 0x446   : > { %7923 = vmatmul.mubr.msk.bf16.vlgmr.msra.gmra.mrb[28].mxu1 %vm3111_vm3, %v1896_v13  ;;  %v2615_v55 = vcombine.low %v2559_v36, %v2575_v30  ;;  %v2616_v17 = vcombine.high %v2559_v36, %v2575_v30 }
 0x447   : > { %7941 = vmatmul.mubr.msk.bf16.vlgmr.msra.gmra.mrb[20].mxu0 %vm3111_vm3, %v1899_v22  ;;  %7933 = vmatpush3.bf16.xpose.msra.mxu1 %v3622_v44  ;;  %v2631_v28 = vcombine.low %v2566_v32, %v2582_v60  ;;  %v2632_v42 = vcombine.high %v2566_v32, %v2582_v60 }
 0x448   : > { %7951 = vmatpush3.bf16.xpose.msra.mxu0 %v3760_v27  ;;  %7952 = vmatprep.mubr.msk.bf16.mxu0 %vm8671_vm2, %v8670_v41  ;;  %v2623_v46 = vrot.slane %v2615_v55, %v9306_v43  ;;  %v2630_v63 = vrot.slane %v2616_v17, %v9306_v43 }
 0x449   : > { %7934 = vmatprep.mubr.msk.bf16.mxu1 %vm8671_vm2, %v8670_v41  ;;  %7944 = vmatprep.subr.bf16.mxu1 %v8670_v41  ;;  %v2639_v2 = vrot.slane %v2631_v28, %v9306_v43  ;;  %v2646_v48 = vrot.slane %v2632_v42, %v9306_v43 }
 0x44a   : > { %7962 = vmatprep.subr.bf16.mxu0 %v8670_v41  ;;  %v7428_v24 = vcombine.low %v2623_v46, %v2630_v63  ;;  %v7430_v54 = vcombine.high %v2623_v46, %v2630_v63 }
 0x44b   : > { %v7432_v25 = vcombine.low %v2639_v2, %v2646_v48  ;;  %v7434_v58 = vcombine.high %v2639_v2, %v2646_v48 }
 0x44c   : > { %v2831_v38 = vrot.slane %v7428_v24, %v9297_v34  ;;  %v2847_v39 = vrot.slane %v7430_v54, %v9297_v34 }
 0x44d   : > { %v2863_v26 = vrot.slane %v7432_v25, %v9297_v34  ;;  %v2879_v16 = vrot.slane %v7434_v58, %v9297_v34 }
 0x44e   : > { %7935 = vmatmul.mubr.msk.bf16.vlgmr.msra.gmra.mrb[32].mxu1 %vm3111_vm3, %v1898_v0  ;;  %v2887_v53 = vcombine.low %v2831_v38, %v2847_v39  ;;  %v2888_v14 = vcombine.high %v2831_v38, %v2847_v39  ;;  %v2540_v0 = vpop.permute.xlu1 %2539 }
 0x44f   : > { %7953 = vmatmul.mubr.msk.bf16.vlgmr.msra.gmra.mrb[24].mxu0 %vm3111_vm3, %v1901_v49  ;;  %7945 = vmatpush3.bf16.xpose.msra.mxu1 %v3714_v31  ;;  %v2919_v6 = vcombine.low %v2863_v26, %v2879_v16  ;;  %v2920_v56 = vcombine.high %v2863_v26, %v2879_v16  ;;  %v2546_v49 = vpop.permute.xlu0 %2545  ;;  %v2583_v33 = vcombine.low %v2528_v8, %v2540_v0 }
 0x450   : > { %7946 = vmatprep.mubr.msk.bf16.mxu1 %vm8671_vm2, %v8670_v41  ;;  %7956 = vmatprep.subr.bf16.mxu1 %v8670_v41  ;;  %v2895_v3 = vrot.slane %v2887_v53, %v9306_v43  ;;  %v2902_v27 = vrot.slane %v2888_v14, %v9306_v43  ;;  %v2599_v31 = vcombine.low %v2534_v51, %v2546_v49 }
 0x451   : > { %7964 = vmatprep.mubr.msk.bf16.mxu0 %vm8671_vm2, %v8670_v41  ;;  %v2927_v19 = vrot.slane %v2919_v6, %v9306_v43  ;;  %v2934_v44 = vrot.slane %v2920_v56, %v9306_v43  ;;  %v2600_v61 = vcombine.high %v2534_v51, %v2546_v49  ;;  %v2584_v21 = vcombine.high %v2528_v8, %v2540_v0 }
 0x452   : > { %v2591_v52 = vrot.slane %v2583_v33, %v9297_v34 }
 0x453   : > { %v2951_v20 = vcombine.low %v2895_v3, %v2927_v19  ;;  %v2952_v50 = vcombine.high %v2895_v3, %v2927_v19  ;;  %v9771_v45 = vcombine.low %v2902_v27, %v2934_v44  ;;  %v9773_v59 = vcombine.high %v2902_v27, %v2934_v44 }
 0x454   : > { %v2598_v12 = vrot.slane %v2584_v21, %v9297_v34 }
 0x455   : > { %v3095_v1 = vpack.c.bf16 %v2951_v20, %v2951_v20  ;;  %v3096_v9 = vpack.c.bf16 %v2952_v50, %v2952_v50 }
 0x456   : > { %7947 = vmatmul.mubr.msk.bf16.vlgmr.msra.gmra.mrb[36].mxu1 %vm3111_vm3, %v1900_v10  ;;  %v2607_v10 = vrot.slane %v2599_v31, %v9297_v34 }
 0x457   : > { %7957 = vmatpush3.bf16.xpose.msra.mxu1 %v3806_v11  ;;  %7958 = vmatprep.mubr.msk.bf16.mxu1 %vm8671_vm2, %v8670_v41  ;;  %v4062_v22 = vsel %vm4060_vm4, %v3095_v1, 0  ;;  %v4108_v13 = vsel %vm4060_vm4, %v3096_v9, 0  ;;  %v2614_v11 = vrot.slane %v2600_v61, %v9297_v34 }
 0x458   : > { %7968 = vmatprep.subr.bf16.mxu1 %v8670_v41  ;;  %7963 = vmatpush3.bf16.msra.mxu0 %v4062_v22  ;;  %v2647_v15 = vcombine.low %v2591_v52, %v2607_v10  ;;  %v2648_v23 = vcombine.high %v2591_v52, %v2607_v10 }
 0x459   : > { %7974 = vmatprep.subr.bf16.mxu0 %v8670_v41  ;;  %v2663_v47 = vcombine.low %v2598_v12, %v2614_v11  ;;  %v2664_v62 = vcombine.high %v2598_v12, %v2614_v11 }
 0x45a   : > { %v2655_v36 = vrot.slane %v2647_v15, %v9306_v43  ;;  %v2662_v32 = vrot.slane %v2648_v23, %v9306_v43 }
 0x45b   : > { %v2671_v35 = vrot.slane %v2663_v47, %v9306_v43  ;;  %v2678_v37 = vrot.slane %v2664_v62, %v9306_v43 }
 0x45c   : > { %v7431_v30 = vcombine.high %v2655_v36, %v2662_v32 }
 0x45d   : > { %v7433_v60 = vcombine.low %v2671_v35, %v2678_v37  ;;  %v7435_v55 = vcombine.high %v2671_v35, %v2678_v37 }
 0x45e   : > { %7959 = vmatmul.mubr.msk.bf16.vlgmr.msra.gmra.mrb[40].mxu1 %vm3111_vm3, %v1902_v57  ;;  %v7429_v57 = vcombine.low %v2655_v36, %v2662_v32  ;;  %v2854_v38 = vrot.slane %v7431_v30, %v9297_v34 }
 0x45f   : > { %7970 = vmatprep.mubr.msk.bf16.mxu1 %vm8671_vm2, %v8670_v41  ;;  %7969 = vmatpush3.bf16.msra.mxu1 %v4108_v13  ;;  %v2870_v39 = vrot.slane %v7433_v60, %v9297_v34  ;;  %v2886_v26 = vrot.slane %v7435_v55, %v9297_v34 }
 0x460   : > { %7980 = vmatprep.subr.bf16.mxu1 %v8670_v41  ;;  %v2838_v58 = vrot.slane %v7429_v57, %v9297_v34 }
 0x461   : > { %v2935_v14 = vcombine.low %v2870_v39, %v2886_v26  ;;  %v2936_v44 = vcombine.high %v2870_v39, %v2886_v26 }
 0x462   : > { %v2903_v13 = vcombine.low %v2838_v58, %v2854_v38  ;;  %v2904_v27 = vcombine.high %v2838_v58, %v2854_v38 }
 0x463   : > { %v2943_v0 = vrot.slane %v2935_v14, %v9306_v43  ;;  %v2950_v61 = vrot.slane %v2936_v44, %v9306_v43 }
 0x464   : > { %v2911_v49 = vrot.slane %v2903_v13, %v9306_v43  ;;  %v2918_v31 = vrot.slane %v2904_v27, %v9306_v43 }
 0x466   : > { %v9807_v21 = vcombine.low %v2911_v49, %v2943_v0  ;;  %v9809_v10 = vcombine.high %v2911_v49, %v2943_v0  ;;  %v9811_v11 = vcombine.low %v2918_v31, %v2950_v61  ;;  %v9813_v52 = vcombine.high %v2918_v31, %v2950_v61 }
 0x4e3   : > { %v3152_v17 = vpop.f32.mrb[4].mxu1 }
 0x4e4   : > { %v9783_v28 = vmul.f32 0.25, %v3152_v17  ;;  %v7870_v42 = vpop.f32.mrb[5].mxu1 }
 0x4e5   : > { %v3155_v46 = vpop.f32.mrb[6].mxu1 }
 0x4e6   : > { %v7871_v63 = vpop.f32.mrb[7].mxu1  ;;  %v3865_v2 = vsel %vm3864_vm5, %v9783_v28, -inf }
 0x4e7   : > { %3866 = vmax.xlane.f32.xlu0 %v3865_v2 }
 0x4eb   : > { %v3198_v48 = vpop.f32.mrb[8].mxu1 }
 0x4ec   : > { %v7876_v24 = vpop.f32.mrb[9].mxu1  ;;  %v9793_v3 = vmul.f32 0.25, %v3198_v48 }
 0x4ed   : > { %v3201_v54 = vpop.f32.mrb[10].mxu1 }
 0x4ee   : > { %v7877_v25 = vpop.f32.mrb[11].mxu1  ;;  %v3868_v33 = vsel %vm3864_vm5, %v9793_v3, -inf }
 0x4f6   : > { %v3336_v16 = vpop.f32.mrb[4].mxu0 }
 0x4f7   : > { %v9791_v53 = vmul.f32 0.25, %v3336_v16  ;;  %v7894_v6 = vpop.f32.mrb[5].mxu0  ;;  %v3244_v20 = vpop.f32.mrb[12].mxu1 }
 0x4f8   : > { %v3339_v19 = vpop.f32.mrb[6].mxu0  ;;  %v9795_v1 = vmul.f32 0.25, %v3244_v20  ;;  %v7882_v22 = vpop.f32.mrb[13].mxu1 }
 0x4f9   : > { %v7895_v50 = vpop.f32.mrb[7].mxu0  ;;  %v3877_v9 = vsel %vm3864_vm5, %v9791_v53, -inf  ;;  %v3247_v56 = vpop.f32.mrb[14].mxu1 }
 0x4fa   : > { %3878 = vmax.xlane.f32.xlu1 %v3877_v9  ;;  %v7883_v8 = vpop.f32.mrb[15].mxu1  ;;  %v3871_v51 = vsel %vm3864_vm5, %v9795_v1, -inf }
 0x4fb   : > { %3872 = vmax.xlane.f32.xlu0 %v3871_v51 }
 0x4fe   : > { %3869 = vmax.xlane.f32.xlu1 %v3868_v33 }
 0x500   : > { %v3428_v12 = vpop.f32.mrb[8].mxu0  ;;  %v3290_v15 = vpop.f32.mrb[16].mxu1 }
 0x501   : > { %v9815_v23 = vmul.f32 0.25, %v3428_v12  ;;  %v7906_v47 = vpop.f32.mrb[9].mxu0  ;;  %v9817_v62 = vmul.f32 0.25, %v3290_v15  ;;  %v7888_v36 = vpop.f32.mrb[17].mxu1 }
 0x502   : > { %v3431_v32 = vpop.f32.mrb[10].mxu0  ;;  %v3293_v35 = vpop.f32.mrb[18].mxu1 }
 0x503   : > { %v7907_v37 = vpop.f32.mrb[11].mxu0  ;;  %v3883_v57 = vsel %vm3864_vm5, %v9815_v23, -inf  ;;  %v7889_v30 = vpop.f32.mrb[19].mxu1  ;;  %v3874_v60 = vsel %vm3864_vm5, %v9817_v62, -inf }
 0x504   : > { %3884 = vmax.xlane.f32.xlu1 %v3883_v57  ;;  %3875 = vmax.xlane.f32.xlu0 %v3874_v60 }
 0x508   : > { %v3382_v55 = vpop.f32.mrb[20].mxu1 }
 0x509   : > { %v9823_v17 = vmul.f32 0.25, %v3382_v55  ;;  %v7900_v42 = vpop.f32.mrb[21].mxu1 }
 0x50a   : > { %v3520_v46 = vpop.f32.mrb[12].mxu0  ;;  %v3385_v63 = vpop.f32.mrb[22].mxu1 }
 0x50b   : > { %v9825_v2 = vmul.f32 0.25, %v3520_v46  ;;  %v7918_v48 = vpop.f32.mrb[13].mxu0  ;;  %v7901_v24 = vpop.f32.mrb[23].mxu1  ;;  %v3880_v54 = vsel %vm3864_vm5, %v9823_v17, -inf }
 0x50c   : > { %v3523_v25 = vpop.f32.mrb[14].mxu0  ;;  %3881 = vmax.xlane.f32.xlu0 %v3880_v54 }
 0x50d   : > { %v7919_v58 = vpop.f32.mrb[15].mxu0  ;;  %v3889_v38 = vsel %vm3864_vm5, %v9825_v2, -inf }
 0x50e   : > { %3890 = vmax.xlane.f32.xlu1 %v3889_v38 }
 0x511   : > { %v3474_v26 = vpop.f32.mrb[24].mxu1 }
 0x512   : > { %v3612_v39 = vpop.f32.mrb[16].mxu0  ;;  %v9833_v19 = vmul.f32 0.25, %v3474_v26  ;;  %v7912_v20 = vpop.f32.mrb[25].mxu1 }
 0x513   : > { %v9831_v16 = vmul.f32 0.25, %v3612_v39  ;;  %v7930_v6 = vpop.f32.mrb[17].mxu0  ;;  %v3477_v9 = vpop.f32.mrb[26].mxu1 }
 0x514   : > { %v3615_v50 = vpop.f32.mrb[18].mxu0  ;;  %v7913_v14 = vpop.f32.mrb[27].mxu1  ;;  %v3886_v56 = vsel %vm3864_vm5, %v9833_v19, -inf }
 0x515   : > { %v7931_v22 = vpop.f32.mrb[19].mxu0  ;;  %v3895_v13 = vsel %vm3864_vm5, %v9831_v16, -inf  ;;  %3887 = vmax.xlane.f32.xlu0 %v3886_v56 }
 0x516   : > { %3896 = vmax.xlane.f32.xlu1 %v3895_v13 }
 0x519   : > { %v3566_v44 = vpop.f32.mrb[28].mxu1 }
 0x51a   : > { %v3704_v27 = vpop.f32.mrb[20].mxu0  ;;  %v9841_v49 = vmul.f32 0.25, %v3566_v44  ;;  %v7924_v0 = vpop.f32.mrb[29].mxu1 }
 0x51b   : > { %v9839_v8 = vmul.f32 0.25, %v3704_v27  ;;  %v7942_v51 = vpop.f32.mrb[21].mxu0  ;;  %v3569_v61 = vpop.f32.mrb[30].mxu1 }
 0x51c   : > { %v3707_v31 = vpop.f32.mrb[22].mxu0  ;;  %v7925_v15 = vpop.f32.mrb[31].mxu1  ;;  %v3892_v47 = vsel %vm3864_vm5, %v9841_v49, -inf }
 0x51d   : > { %v7943_v33 = vpop.f32.mrb[23].mxu0  ;;  %v3901_v12 = vsel %vm3864_vm5, %v9839_v8, -inf  ;;  %3893 = vmax.xlane.f32.xlu0 %v3892_v47 }
 0x51e   : > { %3902 = vmax.xlane.f32.xlu1 %v3901_v12 }
 0x521   : > { %v3658_v32 = vpop.f32.mrb[32].mxu1 }
 0x522   : > { %v3796_v36 = vpop.f32.mrb[24].mxu0  ;;  %v9849_v57 = vmul.f32 0.25, %v3658_v32  ;;  %v7936_v30 = vpop.f32.mrb[33].mxu1 }
 0x523   : > { %v9847_v35 = vmul.f32 0.25, %v3796_v36  ;;  %v7954_v37 = vpop.f32.mrb[25].mxu0  ;;  %v3661_v55 = vpop.f32.mrb[34].mxu1 }
 0x524   : > { %v3799_v60 = vpop.f32.mrb[26].mxu0  ;;  %v7937_v63 = vpop.f32.mrb[35].mxu1  ;;  %v3898_v48 = vsel %vm3864_vm5, %v9849_v57, -inf }
 0x525   : > { %v7955_v42 = vpop.f32.mrb[27].mxu0  ;;  %v3907_v46 = vsel %vm3864_vm5, %v9847_v35, -inf  ;;  %3899 = vmax.xlane.f32.xlu0 %v3898_v48 }
 0x526   : > { %3908 = vmax.xlane.f32.xlu1 %v3907_v46 }
 0x529   : > { %v3750_v24 = vpop.f32.mrb[36].mxu1 }
 0x52a   : > { %v9855_v54 = vmul.f32 0.25, %v3750_v24  ;;  %v7948_v25 = vpop.f32.mrb[37].mxu1 }
 0x52b   : > { %v3753_v58 = vpop.f32.mrb[38].mxu1 }
 0x52c   : > { %v7949_v38 = vpop.f32.mrb[39].mxu1  ;;  %v3904_v39 = vsel %vm3864_vm5, %v9855_v54, -inf }
 0x52d   : > { %3905 = vmax.xlane.f32.xlu0 %v3904_v39 }
 0x531   : > { %v3842_v26 = vpop.f32.mrb[40].mxu1 }
 0x532   : > { %v9859_v6 = vmul.f32 0.25, %v3842_v26  ;;  %v7960_v20 = vpop.f32.mrb[41].mxu1 }
 0x533   : > { %v3845_v50 = vpop.f32.mrb[42].mxu1 }
 0x534   : > { %v7961_v9 = vpop.f32.mrb[43].mxu1  ;;  %v3910_v22 = vsel %vm3864_vm5, %v9859_v6, -inf }
 0x535   : > { %3911 = vmax.xlane.f32.xlu0 %v3910_v22 }
 0x537   : > { %2517 = vrot.lane.b32.xlu1 %v9290_v29, %s8674_s13 }
 0x53b   : > { %2523 = vrot.lane.b32.xlu1 %v9290_v29, %s8672_s29 }
 0x53f   : > { %2529 = vrot.lane.b32.xlu1 %v9290_v29, %s8675_s28 }
 0x54b   : > { %2511 = vrot.lane.b32.xlu0 %v9290_v29, %s8673_s15 }
 0x574   : > { %v3867_v13 = vpop.xlane.xlu0 %3866 }
 0x575   : > { %v3913_v14 = vsub.f32 %v9783_v28, %v3867_v13 }
 0x577   : > { %v3929_v56 = vmul.f32 1.442695, %v3913_v14 }
 0x579   : > { %8313 = vpow2.f32 %v3929_v56 }
 0x583   : > { %v9872_v27 = vpop.eup %8313 }
 0x584   : > { %v3961_v44 = vsel %vm3864_vm5, %v9872_v27, 0.0 }
 0x585   : > { %3962 = vadd.xlane.f32.xlu1 %v3961_v44 }
 0x587   : > { %v3879_v51 = vpop.xlane.xlu1 %3878 }
 0x588   : > { %v3917_v0 = vsub.f32 %v9791_v53, %v3879_v51  ;;  %v3873_v12 = vpop.xlane.xlu0 %3872 }
 0x589   : > { %v3915_v28 = vsub.f32 %v9795_v1, %v3873_v12 }
 0x58a   : > { %v3937_v31 = vmul.f32 1.442695, %v3917_v0 }
 0x58b   : > { %v3870_v61 = vpop.xlane.xlu1 %3869  ;;  %v3933_v32 = vmul.f32 1.442695, %v3915_v28 }
 0x58c   : > { %8315 = vpow2.f32 %v3937_v31  ;;  %v3914_v33 = vsub.f32 %v9793_v3, %v3870_v61 }
 0x58e   : > { %v3931_v15 = vmul.f32 1.442695, %v3914_v33 }
 0x590   : > { %8317 = vpow2.f32 %v3931_v15 }
 0x591   : > { %v3885_v47 = vpop.xlane.xlu1 %3884  ;;  %v3876_v30 = vpop.xlane.xlu0 %3875 }
 0x592   : > { %v3919_v36 = vsub.f32 %v9815_v23, %v3885_v47  ;;  %v3916_v1 = vsub.f32 %v9817_v62, %v3876_v30 }
 0x594   : > { %v3941_v37 = vmul.f32 1.442695, %v3919_v36  ;;  %v3935_v24 = vmul.f32 1.442695, %v3916_v1 }
 0x596   : > { %v9880_v60 = vpop.eup %8315  ;;  %8319 = vpow2.f32 %v3941_v37 }
 0x597   : > { %v3973_v53 = vsel %vm3864_vm5, %v9880_v60, 0.0  ;;  %8321 = vpow2.f32 %v3933_v32 }
 0x598   : > { %3974 = vadd.xlane.f32.xlu0 %v3973_v53 }
 0x599   : > { %v3882_v3 = vpop.xlane.xlu0 %3881 }
 0x59a   : > { %v9884_v55 = vpop.eup %8317  ;;  %v3918_v42 = vsub.f32 %v9823_v17, %v3882_v3 }
 0x59b   : > { %v3891_v46 = vpop.xlane.xlu1 %3890  ;;  %v3964_v23 = vsel %vm3864_vm5, %v9884_v55, 0.0 }
 0x59c   : > { %v3921_v63 = vsub.f32 %v9825_v2, %v3891_v46  ;;  %v3939_v48 = vmul.f32 1.442695, %v3918_v42  ;;  %3965 = vadd.xlane.f32.xlu0 %v3964_v23 }
 0x59e   : > { %v3945_v25 = vmul.f32 1.442695, %v3921_v63  ;;  %8323 = vpow2.f32 %v3939_v48 }
 0x5a0   : > { %v9891_v58 = vpop.eup %8319  ;;  %8325 = vpow2.f32 %v3945_v25 }
 0x5a1   : > { %v3979_v38 = vsel %vm3864_vm5, %v9891_v58, 0.0  ;;  %v9895_v62 = vpop.eup %8321  ;;  %8327 = vpow2.f32 %v3935_v24 }
 0x5a2   : > { %3980 = vadd.xlane.f32.xlu1 %v3979_v38  ;;  %v3967_v2 = vsel %vm3864_vm5, %v9895_v62, 0.0  ;;  %v3888_v20 = vpop.xlane.xlu0 %3887 }
 0x5a3   : > { %v3897_v17 = vpop.xlane.xlu1 %3896  ;;  %v3920_v13 = vsub.f32 %v9833_v19, %v3888_v20 }
 0x5a4   : > { %v3923_v39 = vsub.f32 %v9831_v16, %v3897_v17 }
 0x5a5   : > { %v3943_v31 = vmul.f32 1.442695, %v3920_v13 }
 0x5a6   : > { %v3949_v26 = vmul.f32 1.442695, %v3923_v39  ;;  %3968 = vadd.xlane.f32.xlu1 %v3967_v2 }
 0x5a8   : > { %v9900_v50 = vpop.eup %8323  ;;  %8329 = vpow2.f32 %v3949_v26 }
 0x5a9   : > { %v3976_v9 = vsel %vm3864_vm5, %v9900_v50, 0.0 }
 0x5aa   : > { %v9904_v22 = vpop.eup %8325  ;;  %3977 = vadd.xlane.f32.xlu1 %v3976_v9  ;;  %v3894_v56 = vpop.xlane.xlu0 %3893 }
 0x5ab   : > { %v3903_v14 = vpop.xlane.xlu1 %3902  ;;  %v3985_v16 = vsel %vm3864_vm5, %v9904_v22, 0.0  ;;  %v9909_v44 = vpop.eup %8327  ;;  %v3922_v0 = vsub.f32 %v9841_v49, %v3894_v56  ;;  %v3097_v56 = vpack.c.bf16 %v9771_v45, %v9771_v45 }
 0x5ac   : > { %v3925_v51 = vsub.f32 %v9839_v8, %v3903_v14  ;;  %3986 = vadd.xlane.f32.xlu0 %v3985_v16  ;;  %v3970_v12 = vsel %vm3864_vm5, %v9909_v44, 0.0 }
 0x5ad   : > { %v3947_v33 = vmul.f32 1.442695, %v3922_v0 }
 0x5ae   : > { %v3953_v61 = vmul.f32 1.442695, %v3925_v51 }
 0x5b0   : > { %8331 = vpow2.f32 %v3953_v61  ;;  %3971 = vadd.xlane.f32.xlu0 %v3970_v12 }
 0x5b1   : > { %8333 = vpow2.f32 %v3947_v33 }
 0x5b2   : > { %v9915_v19 = vpop.eup %8329  ;;  %8335 = vpow2.f32 %v3943_v31  ;;  %v3900_v28 = vpop.xlane.xlu0 %3899  ;;  %v4154_v31 = vsel %vm4060_vm4, %v3097_v56, 0  ;;  %v3099_v56 = vpack.c.bf16 %v9807_v21, %v9807_v21 }
 0x5b3   : > { %v3991_v15 = vsel %vm3864_vm5, %v9915_v19, 0.0  ;;  %v3924_v8 = vsub.f32 %v9849_v57, %v3900_v28  ;;  %v3909_v48 = vpop.xlane.xlu1 %3908 }
 0x5b4   : > { %3992 = vadd.xlane.f32.xlu0 %v3991_v15  ;;  %v3927_v25 = vsub.f32 %v9847_v35, %v3909_v48 }
 0x5b5   : > { %v3951_v49 = vmul.f32 1.442695, %v3924_v8 }
 0x5b6   : > { %v3957_v17 = vmul.f32 1.442695, %v3927_v25 }
 0x5b7   : > { %8337 = vpow2.f32 %v3951_v49  ;;  %v2518_v9 = vpop.permute.xlu1 %2517 }
 0x5b8   : > { %v2687_v15 = vcombine.low %v9290_v29, %v2518_v9  ;;  %v2688_v45 = vcombine.high %v9290_v29, %v2518_v9 }
 0x5ba   : > { %v9920_v47 = vpop.eup %8331  ;;  %v3906_v37 = vpop.xlane.xlu0 %3905 }
 0x5bb   : > { %v9922_v36 = vpop.eup %8333  ;;  %v3997_v32 = vsel %vm3864_vm5, %v9920_v47, 0.0  ;;  %v3926_v53 = vsub.f32 %v9855_v54, %v3906_v37  ;;  %v2702_v37 = vrot.slane %v2688_v45, %v9297_v34 }
 0x5bc   : > { %v9926_v30 = vpop.eup %8335  ;;  %3998 = vadd.xlane.f32.xlu0 %v3997_v32  ;;  %v3988_v3 = vsel %vm3864_vm5, %v9922_v36, 0.0  ;;  %v2695_v32 = vrot.slane %v2687_v15, %v9297_v34  ;;  %v4246_v15 = vsel %vm4060_vm4, %v3099_v56, 0 }
 0x5bd   : > { %3989 = vadd.xlane.f32.xlu1 %v3988_v3  ;;  %v3955_v57 = vmul.f32 1.442695, %v3926_v53  ;;  %v3982_v1 = vsel %vm3864_vm5, %v9926_v30, 0.0 }
 0x5bf   : > { %8339 = vpow2.f32 %v3955_v57 }
 0x5c0   : > { %3983 = vadd.xlane.f32.xlu0 %v3982_v1 }
 0x5c1   : > { %v9933_v42 = vpop.eup %8337 }
 0x5c2   : > { %v3994_v46 = vsel %vm3864_vm5, %v9933_v42, 0.0  ;;  %v3912_v63 = vpop.xlane.xlu0 %3911 }
 0x5c3   : > { %3995 = vadd.xlane.f32.xlu1 %v3994_v46  ;;  %v3928_v24 = vsub.f32 %v9859_v6, %v3912_v63  ;;  %v2524_v6 = vpop.permute.xlu1 %2523 }
 0x5c5   : > { %v3959_v38 = vmul.f32 1.442695, %v3928_v24 }
 0x5c6   : > { %v2512_v0 = vpop.permute.xlu0 %2511 }
 0x5c7   : > { %8341 = vpow2.f32 %v3959_v38  ;;  %v9957_v13 = vpop.permute.xlu1 %2529  ;;  %v2703_v12 = vcombine.low %v2512_v0, %v2524_v6 }
 0x5c8   : > { %8343 = vpow2.f32 %v3957_v17 }
 0x5c9   : > { %v9937_v23 = vpop.eup %8339  ;;  %v2711_v28 = vrot.slane %v2703_v12, %v9297_v34 }
 0x5ca   : > { %v4000_v54 = vsel %vm3864_vm5, %v9937_v23, 0.0 }
 0x5cb   : > { %4001 = vadd.xlane.f32.xlu0 %v4000_v54  ;;  %v2751_v53 = vcombine.low %v2695_v32, %v2711_v28  ;;  %v2752_v3 = vcombine.high %v2695_v32, %v2711_v28 }
 0x5cd   : > { %v2759_v48 = vrot.slane %v2751_v53, %v9306_v43  ;;  %v2766_v24 = vrot.slane %v2752_v3, %v9306_v43 }
 0x5cf   : > { %v7436_v9 = vcombine.low %v2759_v48, %v2766_v24 }
 0x5d1   : > { %v9949_v39 = vpop.eup %8341 }
 0x5d2   : > { %v9951_v2 = vpop.eup %8343  ;;  %v4006_v26 = vsel %vm3864_vm5, %v9949_v39, 0.0 }
 0x5d3   : > { %v4003_v20 = vsel %vm3864_vm5, %v9951_v2, 0.0 }
 0x5d4   : > { %2541 = vrot.lane.b32.xlu1 %v9290_v29, %s8677_s8 }
 0x5d8   : > { %2547 = vrot.lane.b32.xlu1 %v9290_v29, %s8678_s26 }
 0x5e1   : > { %2535 = vrot.lane.b32.xlu0 %v9290_v29, %s8676_s14  ;;  %v3098_v29 = vpack.c.bf16 %v9773_v59, %v9773_v59  ;;  %v7438_v59 = vcombine.high %v2759_v48, %v2766_v24 }
 0x5fc   : > { %4007 = vadd.xlane.f32.xlu1 %v4006_v26 }
 0x600   : > { %4004 = vadd.xlane.f32.xlu0 %v4003_v20  ;;  %v4200_v20 = vsel %vm4060_vm4, %v3098_v29, 0 }
 0x612   : > { %v3963_v35 = vpop.xlane.xlu1 %3962 }
 0x613   : > { %8345 = vrcp.f32 %v3963_v35 }
 0x61d   : > { %v8346_v14 = vpop.eup %8345 }
 0x61e   : > { %v4025_v16 = vmul.f32 %v8346_v14, %v9872_v27  ;;  %v2704_v27 = vcombine.high %v2512_v0, %v2524_v6 }
 0x620   : > { %v4041_v51 = vpack.c.bf16 %v4025_v16, %v4025_v16  ;;  %v2718_v8 = vrot.slane %v2704_v27, %v9297_v34  ;;  %v2967_v16 = vrot.slane %v7436_v9, %v9297_v34  ;;  %v3102_v9 = vpack.c.bf16 %v9813_v52, %v9813_v52 }
 0x622   : > { %7965 = vmatmul.mubr.msk.bf16.vlgmr.msra.gmra.mrb[28].mxu0 %vm3864_vm5, %v4041_v51  ;;  %v2767_v57 = vcombine.low %v2702_v37, %v2718_v8  ;;  %v2768_v1 = vcombine.high %v2702_v37, %v2718_v8  ;;  %v2983_v51 = vrot.slane %v7438_v59, %v9297_v34 }
 0x623   : > { %7975 = vmatpush3.bf16.msra.mxu0 %v4154_v31  ;;  %7976 = vmatprep.mubr.msk.bf16.mxu0 %vm8671_vm2, %v8670_v41 }
 0x624   : > { %7986 = vmatprep.subr.bf16.mxu0 %v8670_v41  ;;  %v2775_v25 = vrot.slane %v2767_v57, %v9306_v43  ;;  %v2782_v38 = vrot.slane %v2768_v1, %v9306_v43  ;;  %v3023_v45 = vcombine.low %v2967_v16, %v2983_v51  ;;  %v3100_v57 = vpack.c.bf16 %v9809_v10, %v9809_v10 }
 0x625   : > { %v3975_v61 = vpop.xlane.xlu0 %3974 }
 0x626   : > { %v7442_v6 = vcombine.high %v2775_v25, %v2782_v38  ;;  %v4292_v10 = vsel %vm4060_vm4, %v3100_v57, 0 }
 0x628   : > { %v3015_v31 = vrot.slane %v7442_v6, %v9297_v34 }
 0x629   : > { %v3966_v33 = vpop.xlane.xlu0 %3965 }
 0x62a   : > { %8347 = vrcp.f32 %v3966_v33 }
 0x62f   : > { %v3981_v49 = vpop.xlane.xlu1 %3980 }
 0x633   : > { %v3969_v46 = vpop.xlane.xlu1 %3968 }
 0x634   : > { %v8348_v54 = vpop.eup %8347  ;;  %8349 = vrcp.f32 %v3969_v46 }
 0x635   : > { %v4026_v63 = vmul.f32 %v8348_v54, %v9884_v55  ;;  %8351 = vrcp.f32 %v3975_v61  ;;  %v7440_v55 = vcombine.low %v2775_v25, %v2782_v38 }
 0x637   : > { %v4042_v17 = vpack.c.bf16 %v4026_v63, %v4026_v63  ;;  %v2999_v0 = vrot.slane %v7440_v55, %v9297_v34  ;;  %v3978_v33 = vpop.xlane.xlu1 %3977  ;;  %v3024_v63 = vcombine.high %v2967_v16, %v2983_v51  ;;  %v4384_v16 = vsel %vm4060_vm4, %v3102_v9, 0 }
 0x639   : > { %v3987_v26 = vpop.xlane.xlu0 %3986  ;;  %7971 = vmatmul.mubr.msk.bf16.vlgmr.msra.gmra.mrb[44].mxu1 %vm3864_vm5, %v4042_v17  ;;  %v3055_v28 = vcombine.low %v2999_v0, %v3015_v31  ;;  %v3056_v29 = vcombine.high %v2999_v0, %v3015_v31 }
 0x63a   : > { %7981 = vmatpush3.bf16.msra.mxu1 %v4200_v20  ;;  %7982 = vmatprep.mubr.msk.bf16.mxu1 %vm8671_vm2, %v8670_v41 }
 0x63b   : > { %7992 = vmatprep.subr.bf16.mxu1 %v8670_v41  ;;  %v3063_v32 = vrot.slane %v3055_v28, %v9306_v43 }
 0x63d   : > { %v3972_v35 = vpop.xlane.xlu0 %3971 }
 0x63e   : > { %v8350_v14 = vpop.eup %8349  ;;  %8353 = vrcp.f32 %v3972_v35 }
 0x63f   : > { %v4027_v61 = vmul.f32 %v8350_v14, %v9895_v62  ;;  %8355 = vrcp.f32 %v3981_v49  ;;  %v8352_v27 = vpop.eup %8351  ;;  %v3101_v62 = vpack.c.bf16 %v9811_v11, %v9811_v11  ;;  %v3031_v49 = vrot.slane %v3023_v45, %v9306_v43 }
 0x640   : > { %8357 = vrcp.f32 %v3978_v33  ;;  %v4029_v21 = vmul.f32 %v8352_v27, %v9880_v60 }
 0x641   : > { %v4043_v12 = vpack.c.bf16 %v4027_v61, %v4027_v61  ;;  %v3993_v8 = vpop.xlane.xlu0 %3992  ;;  %8359 = vrcp.f32 %v3987_v26  ;;  %v4338_v46 = vsel %vm4060_vm4, %v3101_v62, 0  ;;  %v3087_v11 = vcombine.low %v3031_v49, %v3063_v32 }
 0x642   : > { %v4045_v60 = vpack.c.bf16 %v4029_v21, %v4029_v21  ;;  %v3070_v26 = vrot.slane %v3056_v29, %v9306_v43  ;;  %v3088_v52 = vcombine.high %v3031_v49, %v3063_v32 }
 0x643   : > { %7977 = vmatmul.mubr.msk.bf16.vlgmr.msra.gmra.mrb[32].mxu0 %vm3864_vm5, %v4043_v12  ;;  %v3103_v17 = vpack.c.bf16 %v3087_v11, %v3087_v11 }
 0x644   : > { %7987 = vmatpush3.bf16.msra.mxu0 %v4246_v15  ;;  %7988 = vmatprep.mubr.msk.bf16.mxu0 %vm8671_vm2, %v8670_v41  ;;  %v3104_v33 = vpack.c.bf16 %v3088_v52, %v3088_v52 }
 0x645   : > { %7998 = vmatprep.subr.bf16.mxu0 %v8670_v41 }
 0x648   : > { %v8354_v37 = vpop.eup %8353 }
 0x649   : > { %v4028_v53 = vmul.f32 %v8354_v37, %v9909_v44  ;;  %v10003_v3 = vpop.xlane.xlu0 %3998  ;;  %v8356_v1 = vpop.eup %8355 }
 0x64a   : > { %v8358_v48 = vpop.eup %8357  ;;  %v4031_v44 = vmul.f32 %v8356_v1, %v9891_v58  ;;  %v3990_v25 = vpop.xlane.xlu1 %3989  ;;  %v3038_v58 = vrot.slane %v3024_v63, %v9306_v43 }
 0x64b   : > { %v4044_v54 = vpack.c.bf16 %v4028_v53, %v4028_v53  ;;  %7989 = vmatmul.mubr.msk.bf16.vlgmr.msra.gmra.mrb[36].mxu0 %vm3864_vm5, %v4045_v60  ;;  %v4030_v38 = vmul.f32 %v8358_v48, %v9900_v50  ;;  %v8360_v59 = vpop.eup %8359  ;;  %v4430_v50 = vsel %vm4060_vm4, %v3103_v17, 0 }
 0x64c   : > { %7999 = vmatpush3.bf16.msra.mxu0 %v4338_v46  ;;  %8000 = vmatprep.mubr.msk.bf16.mxu0 %vm8671_vm2, %v8670_v41  ;;  %v4047_v20 = vpack.c.bf16 %v4031_v44, %v4031_v44  ;;  %v3089_v35 = vcombine.low %v3038_v58, %v3070_v26  ;;  %v4033_v14 = vmul.f32 %v8360_v59, %v9904_v22 }
 0x64d   : > { %7983 = vmatmul.mubr.msk.bf16.vlgmr.msra.gmra.mrb[48].mxu1 %vm3864_vm5, %v4044_v54  ;;  %v3984_v24 = vpop.xlane.xlu0 %3983  ;;  %8010 = vmatprep.subr.bf16.mxu0 %v8670_v41  ;;  %v4046_v6 = vpack.c.bf16 %v4030_v38, %v4030_v38  ;;  %v3090_v32 = vcombine.high %v3038_v58, %v3070_v26 }
 0x64e   : > { %7993 = vmatpush3.bf16.msra.mxu1 %v4292_v10  ;;  %8361 = vrcp.f32 %v3984_v24  ;;  %7994 = vmatprep.mubr.msk.bf16.mxu1 %vm8671_vm2, %v8670_v41  ;;  %v3105_v51 = vpack.c.bf16 %v3089_v35, %v3089_v35  ;;  %v4049_v22 = vpack.c.bf16 %v4033_v14, %v4033_v14 }
 0x64f   : > { %8004 = vmatprep.subr.bf16.mxu1 %v8670_v41  ;;  %8363 = vrcp.f32 %v3993_v8  ;;  %v4476_v8 = vsel %vm4060_vm4, %v3104_v33, 0  ;;  %v3106_v54 = vpack.c.bf16 %v3090_v32, %v3090_v32 }
 0x650   : > { %8365 = vrcp.f32 %v3990_v25  ;;  %v3996_v55 = vpop.xlane.xlu1 %3995  ;;  %v4522_v15 = vsel %vm4060_vm4, %v3105_v51, 0 }
 0x651   : > { %8367 = vrcp.f32 %v3996_v55 }
 0x652   : > { %8369 = vrcp.f32 %v10003_v3  ;;  %v4568_v3 = vsel %vm4060_vm4, %v3106_v54, 0 }
 0x653   : > { %8001 = vmatmul.mubr.msk.bf16.vlgmr.msra.gmra.mrb[40].mxu0 %vm3864_vm5, %v4047_v20 }
 0x654   : > { %8011 = vmatpush3.bf16.msra.mxu0 %v4430_v50  ;;  %8012 = vmatprep.mubr.msk.bf16.mxu0 %vm8671_vm2, %v8670_v41  ;;  %v2542_v56 = vpop.permute.xlu1 %2541 }
 0x655   : > { %7995 = vmatmul.mubr.msk.bf16.vlgmr.msra.gmra.mrb[52].mxu1 %vm3864_vm5, %v4046_v6  ;;  %8022 = vmatprep.subr.bf16.mxu0 %v8670_v41  ;;  %v2719_v28 = vcombine.low %v9957_v13, %v2542_v56  ;;  %v2720_v21 = vcombine.high %v9957_v13, %v2542_v56 }
 0x656   : > { %8005 = vmatpush3.bf16.msra.mxu1 %v4384_v16  ;;  %8006 = vmatprep.mubr.msk.bf16.mxu1 %vm8671_vm2, %v8670_v41 }
 0x657   : > { %8016 = vmatprep.subr.bf16.mxu1 %v8670_v41  ;;  %v2734_v57 = vrot.slane %v2720_v21, %v9297_v34 }
 0x658   : > { %v8362_v0 = vpop.eup %8361  ;;  %v4002_v61 = vpop.xlane.xlu0 %4001 }
 0x659   : > { %v4032_v31 = vmul.f32 %v8362_v0, %v9926_v30  ;;  %v8364_v12 = vpop.eup %8363  ;;  %v2548_v62 = vpop.permute.xlu1 %2547  ;;  %8371 = vrcp.f32 %v4002_v61 }
 0x65a   : > { %v8366_v45 = vpop.eup %8365  ;;  %v4035_v30 = vmul.f32 %v8364_v12, %v9915_v19  ;;  %v2727_v19 = vrot.slane %v2719_v28, %v9297_v34 }
 0x65b   : > { %v4048_v27 = vpack.c.bf16 %v4032_v31, %v4032_v31  ;;  %8013 = vmatmul.mubr.msk.bf16.vlgmr.msra.gmra.mrb[44].mxu0 %vm3864_vm5, %v4049_v22  ;;  %v4034_v13 = vmul.f32 %v8366_v45, %v9922_v36  ;;  %v8368_v44 = vpop.eup %8367 }
 0x65c   : > { %8023 = vmatpush3.bf16.msra.mxu0 %v4522_v15  ;;  %8024 = vmatprep.mubr.msk.bf16.mxu0 %vm8671_vm2, %v8670_v41  ;;  %v2536_v49 = vpop.permute.xlu0 %2535  ;;  %v4051_v46 = vpack.c.bf16 %v4035_v30, %v4035_v30  ;;  %v4036_v9 = vmul.f32 %v8368_v44, %v9933_v42  ;;  %v8370_v56 = vpop.eup %8369 }
 0x65d   : > { %8007 = vmatmul.mubr.msk.bf16.vlgmr.msra.gmra.mrb[56].mxu1 %vm3864_vm5, %v4048_v27  ;;  %8034 = vmatprep.subr.bf16.mxu0 %v8670_v41  ;;  %v2735_v37 = vcombine.low %v2536_v49, %v2548_v62  ;;  %v2736_v53 = vcombine.high %v2536_v49, %v2548_v62  ;;  %v4050_v36 = vpack.c.bf16 %v4034_v13, %v4034_v13 }
 0x65e   : > { %8017 = vmatpush3.bf16.msra.mxu1 %v4476_v8  ;;  %8018 = vmatprep.mubr.msk.bf16.mxu1 %vm8671_vm2, %v8670_v41  ;;  %v4052_v51 = vpack.c.bf16 %v4036_v9, %v4036_v9  ;;  %v4037_v45 = vmul.f32 %v8370_v56, %v9920_v47 }
 0x65f   : > { %8028 = vmatprep.subr.bf16.mxu1 %v8670_v41  ;;  %v2743_v60 = vrot.slane %v2735_v37, %v9297_v34  ;;  %v2750_v1 = vrot.slane %v2736_v53, %v9297_v34 }
 0x660   : > { %v4053_v37 = vpack.c.bf16 %v4037_v45, %v4037_v45 }
 0x661   : > { %v2783_v11 = vcombine.low %v2727_v19, %v2743_v60  ;;  %v2784_v63 = vcombine.high %v2727_v19, %v2743_v60  ;;  %v2799_v29 = vcombine.low %v2734_v57, %v2750_v1  ;;  %v2800_v48 = vcombine.high %v2734_v57, %v2750_v1 }
 0x663   : > { %8025 = vmatmul.mubr.msk.bf16.vlgmr.msra.gmra.mrb[48].mxu0 %vm3864_vm5, %v4051_v46  ;;  %v2791_v10 = vrot.slane %v2783_v11, %v9306_v43  ;;  %v2798_v24 = vrot.slane %v2784_v63, %v9306_v43  ;;  %v2807_v25 = vrot.slane %v2799_v29, %v9306_v43  ;;  %v2814_v38 = vrot.slane %v2800_v48, %v9306_v43  ;;  %v8372_v22 = vpop.eup %8371 }
 0x664   : > { %8036 = vmatprep.mubr.msk.bf16.mxu0 %vm8671_vm2, %v8670_v41  ;;  %v4038_v28 = vmul.f32 %v8372_v22, %v9937_v23 }
 0x665   : > { %8019 = vmatmul.mubr.msk.bf16.vlgmr.msra.gmra.mrb[60].mxu1 %vm3864_vm5, %v4050_v36  ;;  %v7437_v17 = vcombine.low %v2791_v10, %v2798_v24  ;;  %v7439_v58 = vcombine.high %v2791_v10, %v2798_v24  ;;  %v7441_v26 = vcombine.low %v2807_v25, %v2814_v38  ;;  %v7443_v20 = vcombine.high %v2807_v25, %v2814_v38 }
 0x666   : > { %8029 = vmatpush3.bf16.msra.mxu1 %v4568_v3  ;;  %8030 = vmatprep.mubr.msk.bf16.mxu1 %vm8671_vm2, %v8670_v41  ;;  %v4054_v53 = vpack.c.bf16 %v4038_v28, %v4038_v28 }
 0x667   : > { %8040 = vmatprep.subr.bf16.mxu1 %v8670_v41  ;;  %v2974_v59 = vrot.slane %v7437_v17, %v9297_v34  ;;  %v2990_v55 = vrot.slane %v7439_v58, %v9297_v34  ;;  %v3006_v6 = vrot.slane %v7441_v26, %v9297_v34  ;;  %v3022_v50 = vrot.slane %v7443_v20, %v9297_v34 }
 0x669   : > { %v3039_v35 = vcombine.low %v2974_v59, %v2990_v55  ;;  %v3071_v14 = vcombine.low %v3006_v6, %v3022_v50  ;;  %v3040_v16 = vcombine.high %v2974_v59, %v2990_v55  ;;  %v3072_v52 = vcombine.high %v3006_v6, %v3022_v50 }
 0x66b   : > { %v3047_v42 = vrot.slane %v3039_v35, %v9306_v43  ;;  %v3079_v0 = vrot.slane %v3071_v14, %v9306_v43  ;;  %v3054_v31 = vrot.slane %v3040_v16, %v9306_v43  ;;  %v3086_v61 = vrot.slane %v3072_v52, %v9306_v43 }
 0x66d   : > { %8031 = vmatmul.mubr.msk.bf16.vlgmr.msra.gmra.mrb[64].mxu1 %vm3864_vm5, %v4052_v51  ;;  %v3091_v33 = vcombine.low %v3047_v42, %v3079_v0  ;;  %v3092_v12 = vcombine.high %v3047_v42, %v3079_v0  ;;  %v3093_v27 = vcombine.low %v3054_v31, %v3086_v61  ;;  %v3094_v15 = vcombine.high %v3054_v31, %v3086_v61 }
 0x66e   : > { %8042 = vmatprep.mubr.msk.bf16.mxu1 %vm8671_vm2, %v8670_v41 }
 0x66f   : > { %v3107_v21 = vpack.c.bf16 %v3091_v33, %v3091_v33  ;;  %v3108_v30 = vpack.c.bf16 %v3092_v12, %v3092_v12  ;;  %v3109_v49 = vpack.c.bf16 %v3093_v27, %v3093_v27  ;;  %v3110_v32 = vpack.c.bf16 %v3094_v15, %v3094_v15 }
 0x671   : > { %v4614_v8 = vsel %vm4060_vm4, %v3107_v21, 0  ;;  %v4660_v62 = vsel %vm4060_vm4, %v3108_v30, 0  ;;  %v4706_v47 = vsel %vm4060_vm4, %v3109_v49, 0  ;;  %v4752_v23 = vsel %vm4060_vm4, %v3110_v32, 0 }
 0x672   : > { %8035 = vmatpush3.bf16.msra.mxu0 %v4614_v8  ;;  %8041 = vmatpush3.bf16.msra.mxu1 %v4660_v62 }
 0x673   : > { %8046 = vmatprep.subr.bf16.mxu0 %v8670_v41  ;;  %8052 = vmatprep.subr.bf16.mxu1 %v8670_v41 }
 0x675   : > { %8037 = vmatmul.mubr.msk.bf16.vlgmr.msra.gmra.mrb[52].mxu0 %vm3864_vm5, %v4053_v37  ;;  %8043 = vmatmul.mubr.msk.bf16.vlgmr.msra.gmra.mrb[68].mxu1 %vm3864_vm5, %v4054_v53 }
 0x676   : > { %8047 = vmatpush3.bf16.msra.mxu0 %v4706_v47  ;;  %8053 = vmatpush3.bf16.msra.mxu1 %v4752_v23 }
 0x677   : > { %8054 = vmatprep.mubr.msk.bf16.mxu1 %vm8671_vm2, %v8670_v41  ;;  %8048 = vmatprep.mubr.msk.bf16.mxu0 %vm8671_vm2, %v8670_v41 }
 0x678   : > { %8058 = vmatprep.subr.bf16.mxu0 %v8670_v41 }
 0x689   : > { %v4008_v13 = vpop.xlane.xlu1 %4007 }
 0x68a   : > { %8373 = vrcp.f32 %v4008_v13 }
 0x68d   : > { %v4005_v19 = vpop.xlane.xlu0 %4004 }
 0x68e   : > { %8375 = vrcp.f32 %v4005_v19 }
 0x694   : > { %v8374_v57 = vpop.eup %8373 }
 0x695   : > { %v4040_v60 = vmul.f32 %v8374_v57, %v9949_v39 }
 0x697   : > { %v4056_v46 = vpack.c.bf16 %v4040_v60, %v4040_v60 }
 0x698   : > { %v8376_v1 = vpop.eup %8375 }
 0x699   : > { %v4039_v54 = vmul.f32 %v8376_v1, %v9951_v2  ;;  %8055 = vmatmul.mubr.msk.bf16.vlgmr.msra.gmra.mrb[72].mxu1 %vm3864_vm5, %v4056_v46 }
 0x69a   : > { %5795 = vmatprep.mubr.bf16.mxu1 %v8669_v40 }
 0x69b   : > { %v4055_v11 = vpack.c.bf16 %v4039_v54, %v4039_v54 }
 0x69d   : > { %8049 = vmatmul.mubr.msk.bf16.vlgmr.msra.gmra.mrb[56].mxu0 %vm3864_vm5, %v4055_v11 }
 0x69e   : > { %8074 = vmatprep.mubr.msk.bf16.mxu0 %vm8671_vm2, %v8670_v41 }
 0x6f5   : > { %v4098_v63 = vpop.f32.mrb[28].mxu0 }
 0x6f6   : > { %v7966_v29 = vpop.f32.mrb[29].mxu0 }
 0x6f7   : > { %v4101_v48 = vpop.f32.mrb[30].mxu0 }
 0x6f8   : > { %v7967_v36 = vpop.f32.mrb[31].mxu0 }
 0x70c   : > { %v4144_v44 = vpop.f32.mrb[44].mxu1 }
 0x70d   : > { %v7972_v39 = vpop.f32.mrb[45].mxu1 }
 0x70e   : > { %v4147_v10 = vpop.f32.mrb[46].mxu1 }
 0x70f   : > { %v7973_v24 = vpop.f32.mrb[47].mxu1 }
 0x716   : > { %v4190_v25 = vpop.f32.mrb[32].mxu0 }
 0x717   : > { %v4794_v2 = vcombine.low %v4098_v63, %v4190_v25  ;;  %v4795_v38 = vcombine.high %v4098_v63, %v4190_v25  ;;  %v7978_v3 = vpop.f32.mrb[33].mxu0 }
 0x718   : > { %v4193_v17 = vpop.f32.mrb[34].mxu0 }
 0x719   : > { %v7979_v58 = vpop.f32.mrb[35].mxu0  ;;  %v4802_v16 = vrot.slane %v4794_v2, %v9297_v34  ;;  %v4809_v52 = vrot.slane %v4795_v38, %v9297_v34 }
 0x71e   : > { %v10100_v26 = vpop.f32.mrb[36].mxu0 }
 0x71f   : > { %v7990_v20 = vpop.f32.mrb[37].mxu0 }
 0x720   : > { %v4236_v9 = vpop.f32.mrb[48].mxu1  ;;  %v4285_v59 = vpop.f32.mrb[38].mxu0 }
 0x721   : > { %v4810_v55 = vcombine.low %v4144_v44, %v4236_v9  ;;  %v4811_v6 = vcombine.high %v4144_v44, %v4236_v9  ;;  %v7984_v50 = vpop.f32.mrb[49].mxu1  ;;  %v7991_v35 = vpop.f32.mrb[39].mxu0 }
 0x722   : > { %v4239_v14 = vpop.f32.mrb[50].mxu1 }
 0x723   : > { %v4818_v56 = vrot.slane %v4810_v55, %v9297_v34  ;;  %v4825_v51 = vrot.slane %v4811_v6, %v9297_v34  ;;  %v7985_v42 = vpop.f32.mrb[51].mxu1 }
 0x725   : > { %v4858_v0 = vcombine.low %v4802_v16, %v4818_v56  ;;  %v4859_v31 = vcombine.high %v4802_v16, %v4818_v56  ;;  %v4874_v61 = vcombine.low %v4809_v52, %v4825_v51  ;;  %v4875_v22 = vcombine.high %v4809_v52, %v4825_v51 }
 0x726   : > { %v4374_v33 = vpop.f32.mrb[40].mxu0 }
 0x727   : > { %v4866_v12 = vrot.slane %v4858_v0, %v9306_v43  ;;  %v4873_v27 = vrot.slane %v4859_v31, %v9306_v43  ;;  %v4882_v15 = vrot.slane %v4874_v61, %v9306_v43  ;;  %v4889_v45 = vrot.slane %v4875_v22, %v9306_v43  ;;  %v8002_v28 = vpop.f32.mrb[41].mxu0 }
 0x728   : > { %v4328_v21 = vpop.f32.mrb[52].mxu1  ;;  %v4826_v30 = vcombine.low %v10100_v26, %v4374_v33  ;;  %v4827_v8 = vcombine.high %v10100_v26, %v4374_v33  ;;  %v4377_v62 = vpop.f32.mrb[42].mxu0 }
 0x729   : > { %v7476_v49 = vcombine.low %v4866_v12, %v4873_v27  ;;  %v7478_v32 = vcombine.high %v4866_v12, %v4873_v27  ;;  %v7480_v37 = vcombine.low %v4882_v15, %v4889_v45  ;;  %v7482_v53 = vcombine.high %v4882_v15, %v4889_v45  ;;  %v7996_v47 = vpop.f32.mrb[53].mxu1  ;;  %v8003_v23 = vpop.f32.mrb[43].mxu0 }
 0x72a   : > { %v4331_v13 = vpop.f32.mrb[54].mxu1  ;;  %v4834_v6 = vrot.slane %v4826_v30, %v9297_v34  ;;  %v4841_v50 = vrot.slane %v4827_v8, %v9297_v34 }
 0x72b   : > { %v5074_v19 = vrot.slane %v7476_v49, %v9297_v34  ;;  %v5090_v57 = vrot.slane %v7478_v32, %v9297_v34  ;;  %v5106_v60 = vrot.slane %v7480_v37, %v9297_v34  ;;  %v5122_v1 = vrot.slane %v7482_v53, %v9297_v34  ;;  %v7997_v46 = vpop.f32.mrb[55].mxu1 }
 0x72d   : > { %v5131_v54 = vcombine.high %v5074_v19, %v5090_v57  ;;  %v5163_v11 = vcombine.high %v5106_v60, %v5122_v1  ;;  %v5130_v63 = vcombine.low %v5074_v19, %v5090_v57  ;;  %v5162_v29 = vcombine.low %v5106_v60, %v5122_v1 }
 0x72e   : > { %v10116_v48 = vpop.f32.mrb[44].mxu0 }
 0x72f   : > { %v8014_v36 = vpop.f32.mrb[45].mxu0  ;;  %v10119_v44 = vrot.slane %v5131_v54, %v9306_v43  ;;  %v10122_v39 = vrot.slane %v5163_v11, %v9306_v43  ;;  %v10125_v10 = vrot.slane %v5130_v63, %v9306_v43  ;;  %v10128_v24 = vrot.slane %v5162_v29, %v9306_v43 }
 0x730   : > { %v4420_v25 = vpop.f32.mrb[56].mxu1  ;;  %v4469_v2 = vpop.f32.mrb[46].mxu0 }
 0x731   : > { %v4842_v38 = vcombine.low %v4328_v21, %v4420_v25  ;;  %v4843_v3 = vcombine.high %v4328_v21, %v4420_v25  ;;  %v8008_v17 = vpop.f32.mrb[57].mxu1  ;;  %v8015_v58 = vpop.f32.mrb[47].mxu0  ;;  %v5196_v26 = vcombine.low %v10119_v44, %v10122_v39  ;;  %v5194_v20 = vcombine.low %v10125_v10, %v10128_v24 }
 0x732   : > { %v4423_v9 = vpop.f32.mrb[58].mxu1  ;;  %v5195_v59 = vcombine.high %v10125_v10, %v10128_v24  ;;  %v5197_v55 = vcombine.high %v10119_v44, %v10122_v39  ;;  %v8310_v44 = vld [vmem:[%s9090_s20 + $0x28] sm:$0xff]  }
 0x733   : > { %v4850_v35 = vrot.slane %v4842_v38, %v9297_v34  ;;  %v4857_v14 = vrot.slane %v4843_v3, %v9297_v34  ;;  %v8009_v16 = vpop.f32.mrb[59].mxu1 }
 0x735   : > { %v4890_v52 = vcombine.low %v4834_v6, %v4850_v35  ;;  %v4891_v56 = vcombine.high %v4834_v6, %v4850_v35  ;;  %v4906_v51 = vcombine.low %v4841_v50, %v4857_v14  ;;  %v4907_v42 = vcombine.high %v4841_v50, %v4857_v14 }
 0x736   : > { %v4558_v0 = vpop.f32.mrb[48].mxu0 }
 0x737   : > { %v4898_v31 = vrot.slane %v4890_v52, %v9306_v43  ;;  %v4905_v61 = vrot.slane %v4891_v56, %v9306_v43  ;;  %v4914_v22 = vrot.slane %v4906_v51, %v9306_v43  ;;  %v4921_v33 = vrot.slane %v4907_v42, %v9306_v43  ;;  %v8026_v12 = vpop.f32.mrb[49].mxu0 }
 0x738   : > { %v4512_v27 = vpop.f32.mrb[60].mxu1  ;;  %v4930_v15 = vcombine.low %v10116_v48, %v4558_v0  ;;  %v4931_v45 = vcombine.high %v10116_v48, %v4558_v0  ;;  %v4561_v28 = vpop.f32.mrb[50].mxu0 }
 0x739   : > { %v7477_v21 = vcombine.low %v4898_v31, %v4905_v61  ;;  %v7479_v30 = vcombine.high %v4898_v31, %v4905_v61  ;;  %v7481_v8 = vcombine.low %v4914_v22, %v4921_v33  ;;  %v7483_v62 = vcombine.high %v4914_v22, %v4921_v33  ;;  %v8020_v49 = vpop.f32.mrb[61].mxu1  ;;  %v8027_v32 = vpop.f32.mrb[51].mxu0 }
 0x73a   : > { %v4515_v37 = vpop.f32.mrb[62].mxu1  ;;  %v4938_v6 = vrot.slane %v4930_v15, %v9297_v34  ;;  %v4945_v50 = vrot.slane %v4931_v45, %v9297_v34 }
 0x73b   : > { %v5081_v53 = vrot.slane %v7477_v21, %v9297_v34  ;;  %v5097_v47 = vrot.slane %v7479_v30, %v9297_v34  ;;  %v5113_v23 = vrot.slane %v7481_v8, %v9297_v34  ;;  %v5129_v13 = vrot.slane %v7483_v62, %v9297_v34  ;;  %v8021_v19 = vpop.f32.mrb[63].mxu1 }
 0x73d   : > { %v5146_v57 = vcombine.low %v5081_v53, %v5097_v47  ;;  %v5178_v60 = vcombine.low %v5113_v23, %v5129_v13  ;;  %v5147_v1 = vcombine.high %v5081_v53, %v5097_v47  ;;  %v5179_v46 = vcombine.high %v5113_v23, %v5129_v13 }
 0x73f   : > { %v10153_v54 = vrot.slane %v5146_v57, %v9306_v43  ;;  %v10156_v11 = vrot.slane %v5178_v60, %v9306_v43  ;;  %v10159_v63 = vrot.slane %v5147_v1, %v9306_v43  ;;  %v10162_v29 = vrot.slane %v5179_v46, %v9306_v43  ;;  %v8305_v1 = vld [vmem:[%s9090_s20] sm:$0xff]  }
 0x740   : > { %v4604_v48 = vpop.f32.mrb[64].mxu1  ;;  %8059 = vmatpush3.bf16.msra.mxu0 %v8305_v1  ;;  %v8311_v1 = vld [vmem:[%s9090_s20 + $0x30] sm:$0xff]  }
 0x741   : > { %v4946_v36 = vcombine.low %v4512_v27, %v4604_v48  ;;  %v4947_v25 = vcombine.high %v4512_v27, %v4604_v48  ;;  %v8032_v2 = vpop.f32.mrb[65].mxu1  ;;  %v5199_v38 = vcombine.high %v10153_v54, %v10156_v11  ;;  %v5198_v3 = vcombine.low %v10153_v54, %v10156_v11  ;;  %8060 = vmatprep.subr.bf16.mxu0 %v8670_v41 }
 0x742   : > { %v4607_v17 = vpop.f32.mrb[66].mxu1  ;;  %v5201_v58 = vcombine.high %v10159_v63, %v10162_v29  ;;  %v5200_v9 = vcombine.low %v10159_v63, %v10162_v29  ;;  %v8306_v2 = vld [vmem:[%s9090_s20 + $0x8] sm:$0xff]  }
 0x743   : > { %v4954_v35 = vrot.slane %v4946_v36, %v9297_v34  ;;  %v4961_v14 = vrot.slane %v4947_v25, %v9297_v34  ;;  %v8033_v16 = vpop.f32.mrb[67].mxu1 }
 0x744   : > { %8061 = vmatpush3.bf16.msra.mxu0 %v8306_v2 }
 0x745   : > { %v4994_v52 = vcombine.low %v4938_v6, %v4954_v35  ;;  %v4995_v56 = vcombine.high %v4938_v6, %v4954_v35  ;;  %v5010_v51 = vcombine.low %v4945_v50, %v4961_v14  ;;  %v5011_v42 = vcombine.high %v4945_v50, %v4961_v14  ;;  %8062 = vmatprep.subr.bf16.mxu0 %v8670_v41 }
 0x747   : > { %v5002_v0 = vrot.slane %v4994_v52, %v9306_v43  ;;  %v5009_v31 = vrot.slane %v4995_v56, %v9306_v43  ;;  %v5018_v61 = vrot.slane %v5010_v51, %v9306_v43  ;;  %v5025_v22 = vrot.slane %v5011_v42, %v9306_v43  ;;  %v8307_v56 = vld [vmem:[%s9090_s20 + $0x10] sm:$0xff]   ;;  %v8308_v51 = vld [vmem:[%s9090_s20 + $0x18] sm:$0xff]  }
 0x748   : > { %v10180_v45 = vpop.f32.mrb[52].mxu0  ;;  %v4696_v28 = vpop.f32.mrb[68].mxu1  ;;  %8063 = vmatpush3.bf16.msra.mxu0 %v8307_v56 }
 0x749   : > { %v7484_v33 = vcombine.low %v5002_v0, %v5009_v31  ;;  %v7486_v12 = vcombine.high %v5002_v0, %v5009_v31  ;;  %v7488_v27 = vcombine.low %v5018_v61, %v5025_v22  ;;  %v7490_v15 = vcombine.high %v5018_v61, %v5025_v22  ;;  %v8038_v21 = vpop.f32.mrb[53].mxu0  ;;  %v8044_v30 = vpop.f32.mrb[69].mxu1  ;;  %8064 = vmatprep.subr.bf16.mxu0 %v8670_v41 }
 0x74a   : > { %v4653_v37 = vpop.f32.mrb[54].mxu0  ;;  %v4699_v53 = vpop.f32.mrb[70].mxu1 }
 0x74b   : > { %v5210_v8 = vrot.slane %v7484_v33, %v9297_v34  ;;  %v5226_v62 = vrot.slane %v7486_v12, %v9297_v34  ;;  %v5242_v49 = vrot.slane %v7488_v27, %v9297_v34  ;;  %v5258_v32 = vrot.slane %v7490_v15, %v9297_v34  ;;  %v8039_v47 = vpop.f32.mrb[55].mxu0  ;;  %v8045_v23 = vpop.f32.mrb[71].mxu1 }
 0x74c   : > { %8065 = vmatpush3.bf16.msra.mxu0 %v8308_v51 }
 0x74d   : > { %v5267_v13 = vcombine.high %v5210_v8, %v5226_v62  ;;  %v5299_v19 = vcombine.high %v5242_v49, %v5258_v32  ;;  %v5266_v57 = vcombine.low %v5210_v8, %v5226_v62  ;;  %v5298_v60 = vcombine.low %v5242_v49, %v5258_v32  ;;  %8066 = vmatprep.subr.bf16.mxu0 %v8670_v41 }
 0x74f   : > { %v5281_v46 = vrot.slane %v5267_v13, %v9306_v43  ;;  %v5313_v48 = vrot.slane %v5299_v19, %v9306_v43  ;;  %v10190_v36 = vrot.slane %v5266_v57, %v9306_v43  ;;  %v10193_v25 = vrot.slane %v5298_v60, %v9306_v43 }
 0x751   : > { %v5332_v17 = vcombine.low %v5281_v46, %v5313_v48  ;;  %v5331_v6 = vcombine.high %v10190_v36, %v10193_v25  ;;  %v5330_v50 = vcombine.low %v10190_v36, %v10193_v25  ;;  %v5333_v35 = vcombine.high %v5281_v46, %v5313_v48 }
 0x753   : > { %v8243_v14 = vpack.i.bf16 %v5332_v17, %v5196_v26  ;;  %v8238_v16 = vpack.i.bf16 %v5331_v6, %v5195_v59  ;;  %v8248_v52 = vpack.i.bf16 %v5333_v35, %v5197_v55  ;;  %v8309_v26 = vld [vmem:[%s9090_s20 + $0x20] sm:$0xff]  }
 0x754   : > { %8067 = vmatpush3.bf16.msra.mxu0 %v8309_v26 }
 0x755   : > { %8244 = vrot.lane.b32.xlu1 %v8243_v14, %s8677_s8  ;;  %8239 = vrot.lane.b32.xlu0 %v8238_v16, %s8678_s26 }
 0x756   : > { %8068 = vmatprep.subr.bf16.mxu0 %v8670_v41 }
 0x758   : > { %8069 = vmatpush3.bf16.msra.mxu0 %v8310_v44 }
 0x759   : > { %8249 = vrot.lane.b32.xlu0 %v8248_v52, %s8676_s14  ;;  %8070 = vmatprep.subr.bf16.mxu0 %v8670_v41  ;;  %v8312_v52 = vld [vmem:[%s9090_s20 + $0x38] sm:$0xff]  }
 0x75c   : > { %8071 = vmatpush3.bf16.msra.mxu0 %v8311_v1 }
 0x75d   : > { %8072 = vmatprep.subr.bf16.mxu0 %v8670_v41 }
 0x760   : > { %8073 = vmatpush3.bf16.msra.mxu0 %v8312_v52 }
 0x76c   : > { %v4788_v39 = vpop.f32.mrb[72].mxu1 }
 0x76d   : > { %v4978_v59 = vcombine.low %v4696_v28, %v4788_v39  ;;  %v4979_v55 = vcombine.high %v4696_v28, %v4788_v39  ;;  %v8056_v42 = vpop.f32.mrb[73].mxu1 }
 0x76e   : > { %v4791_v0 = vpop.f32.mrb[74].mxu1 }
 0x76f   : > { %v8057_v31 = vpop.f32.mrb[75].mxu1  ;;  %v4986_v15 = vrot.slane %v4978_v59, %v9297_v34  ;;  %v4993_v21 = vrot.slane %v4979_v55, %v9297_v34 }
 0x770   : > { %v4742_v61 = vpop.f32.mrb[56].mxu0 }
 0x771   : > { %v4962_v22 = vcombine.low %v10180_v45, %v4742_v61  ;;  %v4963_v33 = vcombine.high %v10180_v45, %v4742_v61  ;;  %v8050_v12 = vpop.f32.mrb[57].mxu0 }
 0x772   : > { %v4745_v27 = vpop.f32.mrb[58].mxu0 }
 0x773   : > { %v4970_v30 = vrot.slane %v4962_v22, %v9297_v34  ;;  %v4977_v8 = vrot.slane %v4963_v33, %v9297_v34  ;;  %v8051_v28 = vpop.f32.mrb[59].mxu0 }
 0x775   : > { %v5026_v62 = vcombine.low %v4970_v30, %v4986_v15  ;;  %v5027_v49 = vcombine.high %v4970_v30, %v4986_v15  ;;  %v5042_v32 = vcombine.low %v4977_v8, %v4993_v21  ;;  %v5043_v37 = vcombine.high %v4977_v8, %v4993_v21 }
 0x777   : > { %v5034_v53 = vrot.slane %v5026_v62, %v9306_v43  ;;  %v5041_v45 = vrot.slane %v5027_v49, %v9306_v43  ;;  %v5050_v47 = vrot.slane %v5042_v32, %v9306_v43  ;;  %v5057_v23 = vrot.slane %v5043_v37, %v9306_v43 }
 0x779   : > { %v7485_v13 = vcombine.low %v5034_v53, %v5041_v45  ;;  %v7487_v19 = vcombine.high %v5034_v53, %v5041_v45  ;;  %v7489_v57 = vcombine.low %v5050_v47, %v5057_v23  ;;  %v7491_v60 = vcombine.high %v5050_v47, %v5057_v23 }
 0x77b   : > { %v5217_v46 = vrot.slane %v7485_v13, %v9297_v34  ;;  %v5233_v48 = vrot.slane %v7487_v19, %v9297_v34  ;;  %v5249_v2 = vrot.slane %v7489_v57, %v9297_v34  ;;  %v5265_v17 = vrot.slane %v7491_v60, %v9297_v34  ;;  %v7492_v60 = vld [vmem:[%s10728_s6] ss:$0 sm:$0xff] }
 0x77d   : > { %v5282_v6 = vcombine.low %v5217_v46, %v5233_v48  ;;  %v5314_v35 = vcombine.low %v5249_v2, %v5265_v17  ;;  %v5283_v14 = vcombine.high %v5217_v46, %v5233_v48  ;;  %v5315_v16 = vcombine.high %v5249_v2, %v5265_v17 }
 0x77f   : > { %v5290_v56 = vrot.slane %v5282_v6, %v9306_v43  ;;  %v5322_v51 = vrot.slane %v5314_v35, %v9306_v43  ;;  %v5297_v26 = vrot.slane %v5283_v14, %v9306_v43  ;;  %v5329_v44 = vrot.slane %v5315_v16, %v9306_v43  ;;  %v8385_v35 = vld [vmem:[#allocation2] sm:$0xff]  ;;  %v8386_v16 = vld [vmem:[#allocation2 + $0x8] sm:$0xff] }
 0x781   : > { %v5335_v39 = vcombine.high %v5290_v56, %v5322_v51  ;;  %v5334_v59 = vcombine.low %v5290_v56, %v5322_v51  ;;  %v5337_v34 = vcombine.high %v5297_v26, %v5329_v44  ;;  %v5336_v55 = vcombine.low %v5297_v26, %v5329_v44  ;;  %v5572_v56 = vld [vmem:[%s9092_s7 + $0x8] sm:$0xff]  ;;  %v5574_v51 = vld [vmem:[%s9092_s7 + $0x18] sm:$0xff]  ;;  %v5571_v26 = vld [vmem:[%s9092_s7] sm:$0xff] }
 0x782   : > { %v5636_v44 = vunpack.c.l.s8.bf16 %v5572_v56 }
 0x783   : > { %v8258_v42 = vpack.i.bf16 %v5335_v39, %v5199_v38  ;;  %v8253_v41 = vpack.i.bf16 %v5334_v59, %v5198_v3  ;;  %v8268_v0 = vpack.i.bf16 %v5337_v34, %v5201_v58  ;;  %v8263_v43 = vpack.i.bf16 %v5336_v55, %v5200_v9  ;;  %v5573_v34 = vld [vmem:[%s9092_s7 + $0x10] sm:$0xff] }
 0x784   : > { %v5638_v39 = vunpack.c.l.s8.bf16 %v5574_v51  ;;  %v5635_v59 = vunpack.c.l.s8.bf16 %v5571_v26  ;;  %v5652_v55 = vunpack.c.h.s8.bf16 %v5572_v56  ;;  %5763 = vmatprep.subr.bf16.mxu1 %v5636_v44 }
 0x785   : > { %8259 = vrot.lane.b32.xlu0 %v8258_v42, %s8672_s29  ;;  %8254 = vrot.lane.b32.xlu1 %v8253_v41, %s8675_s28  ;;  %v5637_v42 = vunpack.c.l.s8.bf16 %v5573_v34  ;;  %v5654_v41 = vunpack.c.h.s8.bf16 %v5574_v51  ;;  %s10731_s29 = sld [smem:[#allocation31_spill]] }
 0x786   : > { %5806 = vmatprep.subr.bf16.mxu0 %v5638_v39  ;;  %5764 = vmatpush1.bf16.msra.mxu1 %v5635_v59 }
 0x787   : > { %5765 = vmatprep.subr.bf16.mxu1 %v5652_v55 }
 0x789   : > { %8269 = vrot.lane.b32.xlu0 %v8268_v0, %s8673_s15  ;;  %8264 = vrot.lane.b32.xlu1 %v8263_v43, %s8674_s13  ;;  %v5651_v0 = vunpack.c.h.s8.bf16 %v5571_v26  ;;  %v5653_v43 = vunpack.c.h.s8.bf16 %v5573_v34  ;;  %s10738_s13 = sld [smem:[#allocation41_spill]] (!%p7507_p10) }
 0x78b   : > { %5766 = vmatpush1.bf16.msra.mxu1 %v5651_v0  ;;  %s10732_s15 = scalar_lea.vmem %s10731_s29, %s9112_s4 }
 0x7c7   : > { %v8240_v38 = vpop.permute.xlu0 %8239  ;;  %v8245_v11 = vpop.permute.xlu1 %8244 }
 0x7c8   : > { %v8242_v31 = vunpack.i.h.bf16 %v8240_v38  ;;  %v8241_v54 = vunpack.i.l.bf16 %v8240_v38  ;;  %v8247_v61 = vunpack.i.h.bf16 %v8245_v11  ;;  %v8246_v58 = vunpack.i.l.bf16 %v8245_v11 }
 0x7ca   : > { %v5394_v63 = vsel %vm3111_vm3, %v5194_v20, %v8241_v54  ;;  %v5395_v29 = vsel %vm3111_vm3, %v5330_v50, %v8242_v31 }
 0x7cb   : > { %v8250_v3 = vpop.permute.xlu0 %8249  ;;  %v5398_v27 = vsel %vm5396_vm6, %v5395_v29, %v8247_v61  ;;  %v5397_v15 = vsel %vm5396_vm6, %v5394_v63, %v8246_v58  ;;  %v5588_v29 = vld [vmem:[%s9092_s7 + $0x88] sm:$0xff] }
 0x7cc   : > { %v8252_v9 = vunpack.i.h.bf16 %v8250_v3  ;;  %v8251_v22 = vunpack.i.l.bf16 %v8250_v3 }
 0x7ce   : > { %v5400_v8 = vsel %vm5399_vm7, %v5397_v15, %v8251_v22  ;;  %v5401_v28 = vsel %vm5399_vm7, %v5398_v27, %v8252_v9  ;;  %v5590_v9 = vld [vmem:[%s9092_s7 + $0x98] sm:$0xff]  ;;  %v5587_v22 = vld [vmem:[%s9092_s7 + $0x80] sm:$0xff]  ;;  %v5589_v15 = vld [vmem:[%s9092_s7 + $0x90] sm:$0xff] }
 0x7cf   : > { %v5667_v27 = vunpack.c.l.s8.bf16 %v5587_v22 }
 0x7f7   : > { %v8260_v33 = vpop.permute.xlu0 %8259  ;;  %v8255_v12 = vpop.permute.xlu1 %8254 }
 0x7f8   : > { %v8257_v21 = vunpack.i.h.bf16 %v8255_v12  ;;  %v8256_v30 = vunpack.i.l.bf16 %v8255_v12  ;;  %v8262_v10 = vunpack.i.h.bf16 %v8260_v33  ;;  %v8261_v24 = vunpack.i.l.bf16 %v8260_v33 }
 0x7f9   : > { %v5668_v33 = vunpack.c.l.s8.bf16 %v5588_v29  ;;  %v5670_v12 = vunpack.c.l.s8.bf16 %v5590_v9 }
 0x7fa   : > { %v5403_v20 = vsel %vm5402_vm8, %v5400_v8, %v8256_v30  ;;  %v5404_v62 = vsel %vm5402_vm8, %v5401_v28, %v8257_v21  ;;  %v5669_v21 = vunpack.c.l.s8.bf16 %v5589_v15  ;;  %v5684_v30 = vunpack.c.h.s8.bf16 %v5588_v29 }
 0x7fb   : > { %v8270_v36 = vpop.permute.xlu0 %8269  ;;  %v8265_v25 = vpop.permute.xlu1 %8264  ;;  %v5406_v53 = vsel %vm5405_vm9, %v5403_v20, %v8261_v24  ;;  %v5407_v45 = vsel %vm5405_vm9, %v5404_v62, %v8262_v10  ;;  %5767 = vmatprep.subr.bf16.mxu1 %v5668_v33  ;;  %v5686_v8 = vunpack.c.h.s8.bf16 %v5590_v9  ;;  %v5683_v28 = vunpack.c.h.s8.bf16 %v5587_v22  ;;  %v5604_v24 = vld [vmem:[%s9092_s7 + $0x108] sm:$0xff]  ;;  %v5606_v20 = vld [vmem:[%s9092_s7 + $0x118] sm:$0xff] }
 0x7fc   : > { %v8272_v50 = vunpack.i.h.bf16 %v8270_v36  ;;  %v8271_v49 = vunpack.i.l.bf16 %v8270_v36  ;;  %v8267_v32 = vunpack.i.h.bf16 %v8265_v25  ;;  %v8266_v37 = vunpack.i.l.bf16 %v8265_v25  ;;  %5768 = vmatpush1.bf16.msra.mxu1 %v5667_v27  ;;  %v5603_v25 = vld [vmem:[%s9092_s7 + $0x100] sm:$0xff]  ;;  %v5594_v27 = vld [vmem:[%s9092_s7 + $0xb8] sm:$0xff] }
 0x7fd   : > { %v5685_v10 = vunpack.c.h.s8.bf16 %v5589_v15  ;;  %v5700_v62 = vunpack.c.l.s8.bf16 %v5604_v24  ;;  %v5702_v36 = vunpack.c.l.s8.bf16 %v5606_v20  ;;  %5769 = vmatprep.subr.bf16.mxu1 %v5684_v30 }
 0x7fe   : > { %v5409_v47 = vsel %vm5408_vm10, %v5406_v53, %v8266_v37  ;;  %v5410_v23 = vsel %vm5408_vm10, %v5407_v45, %v8267_v32  ;;  %v5716_v37 = vunpack.c.h.s8.bf16 %v5604_v24  ;;  %v5718_v53 = vunpack.c.h.s8.bf16 %v5606_v20  ;;  %v5620_v45 = vld [vmem:[%s9092_s7 + $0x188] sm:$0xff] }
 0x7ff   : > { %v5412_v13 = vsel %vm5411_vm11, %v5409_v47, %v8271_v49  ;;  %v5413_v19 = vsel %vm5411_vm11, %v5410_v23, %v8272_v50  ;;  %v5605_v50 = vld [vmem:[%s9092_s7 + $0x110] sm:$0xff]  ;;  %v5699_v49 = vunpack.c.l.s8.bf16 %v5603_v25  ;;  %v5622_v47 = vld [vmem:[%s9092_s7 + $0x198] sm:$0xff]  ;;  %v5715_v23 = vunpack.c.h.s8.bf16 %v5603_v25  ;;  %v5608_v25 = vld [vmem:[%s9092_s7 + $0x128] sm:$0xff] }
 0x800   : > { %v5414_v57 = vpack.c.bf16 %v5413_v19, %v5412_v13  ;;  %5770 = vmatpush1.bf16.msra.mxu1 %v5683_v28  ;;  %v5701_v32 = vunpack.c.l.s8.bf16 %v5605_v50  ;;  %v5717_v13 = vunpack.c.h.s8.bf16 %v5605_v50  ;;  %v5732_v19 = vunpack.c.l.s8.bf16 %v5620_v45  ;;  %v5591_v28 = vld [vmem:[%s9092_s7 + $0xa0] sm:$0xff]  ;;  %v5610_v50 = vld [vmem:[%s9092_s7 + $0x138] sm:$0xff] }
 0x801   : > { %5771 = vmatprep.subr.bf16.mxu1 %v5700_v62  ;;  %v5671_v24 = vunpack.c.l.s8.bf16 %v5591_v28 }
 0x802   : > { %8075 = vmatmul.mubr.bf16.vlgmr.msra.gmra.mrb[60].mxu0 %v5414_v57  ;;  %v5734_v57 = vunpack.c.l.s8.bf16 %v5622_v47 }
 0x803   : > { %5838 = vmatprep.mubr.bf16.mxu0 %v8669_v40  ;;  %5807 = vmatpush1.bf16.msra.mxu0 %v5637_v42  ;;  %v7501_v42 = vld [vmem:[%s10730_s9] ss:$0 sm:$0xff] }
 0x804   : > { %5808 = vmatprep.subr.bf16.mxu0 %v5654_v41  ;;  %5772 = vmatpush1.bf16.msra.mxu1 %v5699_v49  ;;  %v5687_v49 = vunpack.c.h.s8.bf16 %v5591_v28 }
 0x805   : > { %5773 = vmatprep.subr.bf16.mxu1 %v5716_v37  ;;  %v5704_v37 = vunpack.c.l.s8.bf16 %v5608_v25 }
 0x807   : > { %5809 = vmatpush1.bf16.msra.mxu0 %v5653_v43 }
 0x808   : > { %5810 = vmatprep.subr.bf16.mxu0 %v5670_v12  ;;  %5774 = vmatpush1.bf16.msra.mxu1 %v5715_v23  ;;  %v5592_v12 = vld [vmem:[%s9092_s7 + $0xa8] sm:$0xff] }
 0x809   : > { %5775 = vmatprep.subr.bf16.mxu1 %v5732_v19  ;;  %v5672_v30 = vunpack.c.l.s8.bf16 %v5592_v12  ;;  %v5688_v62 = vunpack.c.h.s8.bf16 %v5592_v12  ;;  %v5720_v19 = vunpack.c.h.s8.bf16 %v5608_v25 }
 0x80b   : > { %5811 = vmatpush1.bf16.msra.mxu0 %v5669_v21 }
 0x80c   : > { %5812 = vmatprep.subr.bf16.mxu0 %v5686_v8  ;;  %v5674_v8 = vunpack.c.l.s8.bf16 %v5594_v27 }
 0x80f   : > { %5813 = vmatpush1.bf16.msra.mxu0 %v5685_v10  ;;  %v5593_v10 = vld [vmem:[%s9092_s7 + $0xb0] sm:$0xff] }
 0x810   : > { %5814 = vmatprep.subr.bf16.mxu0 %v5702_v36  ;;  %v5673_v20 = vunpack.c.l.s8.bf16 %v5593_v10  ;;  %v5690_v36 = vunpack.c.h.s8.bf16 %v5594_v27 }
 0x813   : > { %5815 = vmatpush1.bf16.msra.mxu0 %v5701_v32  ;;  %v5689_v32 = vunpack.c.h.s8.bf16 %v5593_v10 }
 0x814   : > { %5816 = vmatprep.subr.bf16.mxu0 %v5718_v53  ;;  %v5706_v53 = vunpack.c.l.s8.bf16 %v5610_v50 }
 0x817   : > { %5817 = vmatpush1.bf16.msra.mxu0 %v5717_v13 }
 0x818   : > { %5818 = vmatprep.subr.bf16.mxu0 %v5734_v57  ;;  %v5722_v57 = vunpack.c.h.s8.bf16 %v5610_v50 }
 0x8d5   : > { %v5520_v1 = vpop.f32.mrb[60].mxu0 }
 0x8d6   : > { %v5521_v46 = vadd.f32 %v7492_v60, %v5520_v1  ;;  %v8076_v48 = vpop.f32.mrb[61].mxu0  ;;  %v5621_v1 = vld [vmem:[%s9092_s7 + $0x190] sm:$0xff] }
 0x8d7   : > { %v5523_v2 = vpop.f32.mrb[62].mxu0  ;;  %v5733_v48 = vunpack.c.l.s8.bf16 %v5621_v1 }
 0x8d8   : > { %v5524_v17 = vadd.f32 %v7492_v60, %v5523_v2  ;;  %v8077_v6 = vpop.f32.mrb[63].mxu0  ;;  %v5527_v14 = vadd.f32 %v8385_v35, %v5521_v46  ;;  %v5619_v60 = vld [vmem:[%s9092_s7 + $0x180] sm:$0xff]  ;;  %v5748_v2 = vunpack.c.h.s8.bf16 %v5620_v45  ;;  %v5578_v35 = vld [vmem:[%s9092_s7 + $0x38] sm:$0xff] }
 0x8d9   : > { %v5731_v46 = vunpack.c.l.s8.bf16 %v5619_v60  ;;  %v5576_v6 = vld [vmem:[%s9092_s7 + $0x28] sm:$0xff]  ;;  %5819 = vmatpush1.bf16.msra.mxu0 %v5733_v48  ;;  %v5642_v56 = vunpack.c.l.s8.bf16 %v5578_v35  ;;  %v5658_v33 = vunpack.c.h.s8.bf16 %v5578_v35  ;;  %v5607_v45 = vld [vmem:[%s9092_s7 + $0x120] sm:$0xff]  ;;  %v5625_v35 = vld [vmem:[%s9092_s7 + $0x1b0] sm:$0xff] }
 0x8da   : > { %5531 = vadd.xlane.f32.xlu1 %v5527_v14  ;;  %v5528_v52 = vadd.f32 %v8386_v16, %v5524_v17  ;;  %v5750_v17 = vunpack.c.h.s8.bf16 %v5622_v47  ;;  %v5749_v16 = vunpack.c.h.s8.bf16 %v5621_v1  ;;  %v5609_v47 = vld [vmem:[%s9092_s7 + $0x130] sm:$0xff]  ;;  %v5703_v23 = vunpack.c.l.s8.bf16 %v5607_v45  ;;  %v5626_v1 = vld [vmem:[%s9092_s7 + $0x1b8] sm:$0xff] }
 0x8db   : > { %5776 = vmatpush1.bf16.msra.mxu1 %v5731_v46  ;;  %v5705_v13 = vunpack.c.l.s8.bf16 %v5609_v47  ;;  %v5719_v46 = vunpack.c.h.s8.bf16 %v5607_v45  ;;  %v5721_v48 = vunpack.c.h.s8.bf16 %v5609_v47 }
 0x8dc   : > { %5533 = vadd.xlane.f32.xlu0 %v5528_v52  ;;  %5777 = vmatprep.subr.bf16.mxu1 %v5748_v2 }
 0x8dd   : > { %5820 = vmatprep.subr.bf16.mxu0 %v5750_v17  ;;  %v5738_v17 = vunpack.c.l.s8.bf16 %v5626_v1 }
 0x8de   : > { %5821 = vmatpush1.bf16.msra.mxu0 %v5749_v16  ;;  %v5737_v16 = vunpack.c.l.s8.bf16 %v5625_v35 }
 0x8df   : > { %5892 = vmatprep.subr.bf16.mxu0 %v5642_v56  ;;  %v5754_v56 = vunpack.c.h.s8.bf16 %v5626_v1 }
 0x967   : > { %v5532_v38 = vpop.xlane.xlu1 %5531 }
 0x968   : > { %v5536_v31 = vmul.f32 0.0078125, %v5532_v38 }
 0x969   : > { %v5534_v54 = vpop.xlane.xlu0 %5533 }
 0x96a   : > { %v10277_v11 = vsub.f32 %v5527_v14, %v5536_v31  ;;  %v5537_v3 = vmul.f32 0.0078125, %v5534_v54  ;;  %v5747_v14 = vunpack.c.h.s8.bf16 %v5619_v60  ;;  %v7502_v31 = vld [vmem:[%s10732_s15] ss:$0 sm:$0xff]  ;;  %v5624_v60 = vld [vmem:[%s9092_s7 + $0x1a8] sm:$0xff] }
 0x96b   : > { %v5736_v2 = vunpack.c.l.s8.bf16 %v5624_v60 }
 0x96c   : > { %v10279_v61 = vsub.f32 %v5528_v52, %v5537_v3  ;;  %v5540_v58 = vmul.f32 %v10277_v11, %v10277_v11  ;;  %v5640_v52 = vunpack.c.l.s8.bf16 %v5576_v6  ;;  %5778 = vmatpush1.bf16.msra.mxu1 %v5747_v14  ;;  %v5575_v3 = vld [vmem:[%s9092_s7 + $0x20] sm:$0xff] }
 0x96d   : > { %v5639_v9 = vunpack.c.l.s8.bf16 %v5575_v3  ;;  %v5655_v15 = vunpack.c.h.s8.bf16 %v5575_v3 }
 0x96e   : > { %5542 = vadd.xlane.f32.xlu0 %v5540_v58  ;;  %v5541_v63 = vmul.f32 %v10279_v61, %v10279_v61  ;;  %5849 = vmatprep.subr.bf16.mxu1 %v5640_v52  ;;  %v5577_v58 = vld [vmem:[%s9092_s7 + $0x30] sm:$0xff]  ;;  %v5752_v52 = vunpack.c.h.s8.bf16 %v5624_v60 }
 0x96f   : > { %v5641_v22 = vunpack.c.l.s8.bf16 %v5577_v58  ;;  %v5657_v21 = vunpack.c.h.s8.bf16 %v5577_v58 }
 0x970   : > { %5544 = vadd.xlane.f32.xlu1 %v5541_v63 }
 0x9fb   : > { %v5543_v51 = vpop.xlane.xlu0 %5542 }
 0x9fc   : > { %v5546_v26 = vmul.f32 0.0078125, %v5543_v51  ;;  %v5580_v51 = vld [vmem:[%s9092_s7 + $0x48] sm:$0xff] }
 0x9fd   : > { %v5545_v44 = vpop.xlane.xlu1 %5544 }
 0x9fe   : > { %v5548_v39 = vadd.f32 1e-05, %v5546_v26  ;;  %v5547_v59 = vmul.f32 0.0078125, %v5545_v44  ;;  %v5582_v26 = vld [vmem:[%s9092_s7 + $0x58] sm:$0xff] }
 0xa00   : > { %8377 = vrsqrt.f32 %v5548_v39  ;;  %v5549_v34 = vadd.f32 1e-05, %v5547_v59  ;;  %v5753_v39 = vunpack.c.h.s8.bf16 %v5625_v35  ;;  %v5644_v59 = vunpack.c.l.s8.bf16 %v5580_v51 }
 0xa02   : > { %8379 = vrsqrt.f32 %v5549_v34  ;;  %v5646_v34 = vunpack.c.l.s8.bf16 %v5582_v26 }
 0xa0a   : > { %v8378_v55 = vpop.eup %8377 }
 0xa0b   : > { %v5552_v41 = vmul.f32 %v8378_v55, %v10277_v11  ;;  %v5579_v55 = vld [vmem:[%s9092_s7 + $0x40] sm:$0xff] }
 0xa0c   : > { %v8380_v0 = vpop.eup %8379  ;;  %v5659_v3 = vunpack.c.h.s8.bf16 %v5579_v55 }
 0xa0d   : > { %v5560_v43 = vmul.f32 %v7501_v42, %v5552_v41  ;;  %v5553_v38 = vmul.f32 %v8380_v0, %v10279_v61  ;;  %v5656_v61 = vunpack.c.h.s8.bf16 %v5576_v6  ;;  %v5623_v6 = vld [vmem:[%s9092_s7 + $0x1a0] sm:$0xff]  ;;  %v5643_v41 = vunpack.c.l.s8.bf16 %v5579_v55 }
 0xa0e   : > { %v5735_v14 = vunpack.c.l.s8.bf16 %v5623_v6  ;;  %v5751_v44 = vunpack.c.h.s8.bf16 %v5623_v6 }
 0xa0f   : > { %v5561_v54 = vmul.f32 %v7501_v42, %v5553_v38  ;;  %v10313_v63 = vadd.f32 %v7502_v31, %v5560_v43  ;;  %v5581_v42 = vld [vmem:[%s9092_s7 + $0x50] sm:$0xff]  ;;  %v5660_v43 = vunpack.c.h.s8.bf16 %v5580_v51  ;;  %v5662_v38 = vunpack.c.h.s8.bf16 %v5582_v26 }
 0xa10   : > { %v5645_v0 = vunpack.c.l.s8.bf16 %v5581_v42  ;;  %v5661_v58 = vunpack.c.h.s8.bf16 %v5581_v42 }
 0xa11   : > { %v10315_v29 = vadd.f32 %v7502_v31, %v5561_v54  ;;  %v5596_v31 = vld [vmem:[%s9092_s7 + $0xc8] sm:$0xff]  ;;  %v5598_v54 = vld [vmem:[%s9092_s7 + $0xd8] sm:$0xff] }
 0xa13   : > { %v10319_v11 = vpack.c.bf16 %v10315_v29, %v10313_v63 }
 0xa15   : > { %5796 = vmatmul.mubr.bf16.vlgmr.msra.gmra.mrb[76].mxu1 %v10319_v11  ;;  %5839 = vmatmul.mubr.bf16.vlgmr.msra.gmra.mrb[64].mxu0 %v10319_v11 }
 0xa16   : > { %5850 = vmatpush1.bf16.msra.mxu1 %v5639_v9  ;;  %5893 = vmatpush1.bf16.msra.mxu0 %v5641_v22  ;;  %v5676_v9 = vunpack.c.l.s8.bf16 %v5596_v31  ;;  %v5678_v22 = vunpack.c.l.s8.bf16 %v5598_v54 }
 0xa17   : > { %5851 = vmatprep.subr.bf16.mxu1 %v5656_v61  ;;  %5894 = vmatprep.subr.bf16.mxu0 %v5658_v33  ;;  %v5595_v61 = vld [vmem:[%s9092_s7 + $0xc0] sm:$0xff]  ;;  %v5597_v33 = vld [vmem:[%s9092_s7 + $0xd0] sm:$0xff] }
 0xa18   : > { %5881 = vmatprep.mubr.bf16.mxu1 %v8669_v40  ;;  %5924 = vmatprep.mubr.bf16.mxu0 %v8669_v40  ;;  %v5675_v12 = vunpack.c.l.s8.bf16 %v5595_v61  ;;  %v5677_v27 = vunpack.c.l.s8.bf16 %v5597_v33  ;;  %v5691_v28 = vunpack.c.h.s8.bf16 %v5595_v61  ;;  %v5693_v10 = vunpack.c.h.s8.bf16 %v5597_v33 }
 0xa1a   : > { %5852 = vmatpush1.bf16.msra.mxu1 %v5655_v15  ;;  %5895 = vmatpush1.bf16.msra.mxu0 %v5657_v21  ;;  %v5692_v15 = vunpack.c.h.s8.bf16 %v5596_v31  ;;  %v5694_v21 = vunpack.c.h.s8.bf16 %v5598_v54 }
 0xa1b   : > { %5853 = vmatprep.subr.bf16.mxu1 %v5672_v30  ;;  %5896 = vmatprep.subr.bf16.mxu0 %v5674_v8  ;;  %v5612_v30 = vld [vmem:[%s9092_s7 + $0x148] sm:$0xff]  ;;  %v5614_v8 = vld [vmem:[%s9092_s7 + $0x158] sm:$0xff] }
 0xa1e   : > { %5854 = vmatpush1.bf16.msra.mxu1 %v5671_v24  ;;  %5897 = vmatpush1.bf16.msra.mxu0 %v5673_v20  ;;  %v5708_v24 = vunpack.c.l.s8.bf16 %v5612_v30  ;;  %v5710_v20 = vunpack.c.l.s8.bf16 %v5614_v8 }
 0xa1f   : > { %5855 = vmatprep.subr.bf16.mxu1 %v5688_v62  ;;  %5898 = vmatprep.subr.bf16.mxu0 %v5690_v36  ;;  %v5611_v62 = vld [vmem:[%s9092_s7 + $0x140] sm:$0xff]  ;;  %v5613_v36 = vld [vmem:[%s9092_s7 + $0x150] sm:$0xff] }
 0xa20   : > { %v5707_v25 = vunpack.c.l.s8.bf16 %v5611_v62  ;;  %v5709_v50 = vunpack.c.l.s8.bf16 %v5613_v36  ;;  %v5723_v45 = vunpack.c.h.s8.bf16 %v5611_v62  ;;  %v5725_v47 = vunpack.c.h.s8.bf16 %v5613_v36 }
 0xa22   : > { %5856 = vmatpush1.bf16.msra.mxu1 %v5687_v49  ;;  %5899 = vmatpush1.bf16.msra.mxu0 %v5689_v32  ;;  %v5724_v49 = vunpack.c.h.s8.bf16 %v5612_v30  ;;  %v5726_v32 = vunpack.c.h.s8.bf16 %v5614_v8 }
 0xa23   : > { %5857 = vmatprep.subr.bf16.mxu1 %v5704_v37  ;;  %5900 = vmatprep.subr.bf16.mxu0 %v5706_v53  ;;  %v5628_v37 = vld [vmem:[%s9092_s7 + $0x1c8] sm:$0xff]  ;;  %v5630_v53 = vld [vmem:[%s9092_s7 + $0x1d8] sm:$0xff] }
 0xa26   : > { %5858 = vmatpush1.bf16.msra.mxu1 %v5703_v23  ;;  %5901 = vmatpush1.bf16.msra.mxu0 %v5705_v13  ;;  %v5740_v23 = vunpack.c.l.s8.bf16 %v5628_v37  ;;  %v5742_v13 = vunpack.c.l.s8.bf16 %v5630_v53 }
 0xa27   : > { %5859 = vmatprep.subr.bf16.mxu1 %v5720_v19  ;;  %5902 = vmatprep.subr.bf16.mxu0 %v5722_v57  ;;  %v5627_v19 = vld [vmem:[%s9092_s7 + $0x1c0] sm:$0xff]  ;;  %v5629_v57 = vld [vmem:[%s9092_s7 + $0x1d0] sm:$0xff] }
 0xa28   : > { %v5739_v60 = vunpack.c.l.s8.bf16 %v5627_v19  ;;  %v5741_v1 = vunpack.c.l.s8.bf16 %v5629_v57  ;;  %v5755_v6 = vunpack.c.h.s8.bf16 %v5627_v19  ;;  %v5757_v35 = vunpack.c.h.s8.bf16 %v5629_v57 }
 0xa2a   : > { %5860 = vmatpush1.bf16.msra.mxu1 %v5719_v46  ;;  %5903 = vmatpush1.bf16.msra.mxu0 %v5721_v48  ;;  %v5756_v46 = vunpack.c.h.s8.bf16 %v5628_v37  ;;  %v5758_v48 = vunpack.c.h.s8.bf16 %v5630_v53 }
 0xa2b   : > { %5861 = vmatprep.subr.bf16.mxu1 %v5736_v2  ;;  %5904 = vmatprep.subr.bf16.mxu0 %v5738_v17  ;;  %v5584_v2 = vld [vmem:[%s9092_s7 + $0x68] sm:$0xff]  ;;  %v5586_v17 = vld [vmem:[%s9092_s7 + $0x78] sm:$0xff] }
 0xa2e   : > { %5862 = vmatpush1.bf16.msra.mxu1 %v5735_v14  ;;  %5905 = vmatpush1.bf16.msra.mxu0 %v5737_v16  ;;  %v5648_v14 = vunpack.c.l.s8.bf16 %v5584_v2  ;;  %v5650_v16 = vunpack.c.l.s8.bf16 %v5586_v17 }
 0xa2f   : > { %5863 = vmatprep.subr.bf16.mxu1 %v5752_v52  ;;  %5906 = vmatprep.subr.bf16.mxu0 %v5754_v56  ;;  %v5583_v52 = vld [vmem:[%s9092_s7 + $0x60] sm:$0xff]  ;;  %v5585_v56 = vld [vmem:[%s9092_s7 + $0x70] sm:$0xff] }
 0xa30   : > { %v5647_v51 = vunpack.c.l.s8.bf16 %v5583_v52  ;;  %v5649_v26 = vunpack.c.l.s8.bf16 %v5585_v56  ;;  %v5663_v55 = vunpack.c.h.s8.bf16 %v5583_v52  ;;  %v5665_v42 = vunpack.c.h.s8.bf16 %v5585_v56 }
 0xa32   : > { %5864 = vmatpush1.bf16.msra.mxu1 %v5751_v44  ;;  %5907 = vmatpush1.bf16.msra.mxu0 %v5753_v39  ;;  %v5664_v44 = vunpack.c.h.s8.bf16 %v5584_v2  ;;  %v5666_v39 = vunpack.c.h.s8.bf16 %v5586_v17 }
 0xa33   : > { %5935 = vmatprep.subr.bf16.mxu1 %v5644_v59  ;;  %5978 = vmatprep.subr.bf16.mxu0 %v5646_v34  ;;  %v5600_v59 = vld [vmem:[%s9092_s7 + $0xe8] sm:$0xff]  ;;  %v5602_v34 = vld [vmem:[%s9092_s7 + $0xf8] sm:$0xff] }
 0xa35   : > { %5882 = vmatmul.mubr.bf16.vlgmr.msra.gmra.mrb[80].mxu1 %v10319_v11  ;;  %5925 = vmatmul.mubr.bf16.vlgmr.msra.gmra.mrb[68].mxu0 %v10319_v11 }
 0xa36   : > { %5936 = vmatpush1.bf16.msra.mxu1 %v5643_v41  ;;  %5979 = vmatpush1.bf16.msra.mxu0 %v5645_v0  ;;  %v5680_v41 = vunpack.c.l.s8.bf16 %v5600_v59  ;;  %v5682_v0 = vunpack.c.l.s8.bf16 %v5602_v34 }
 0xa37   : > { %5937 = vmatprep.subr.bf16.mxu1 %v5660_v43  ;;  %5980 = vmatprep.subr.bf16.mxu0 %v5662_v38  ;;  %v5599_v43 = vld [vmem:[%s9092_s7 + $0xe0] sm:$0xff]  ;;  %v5601_v38 = vld [vmem:[%s9092_s7 + $0xf0] sm:$0xff] }
 0xa38   : > { %5967 = vmatprep.mubr.bf16.mxu1 %v8669_v40  ;;  %6010 = vmatprep.mubr.bf16.mxu0 %v8669_v40  ;;  %v5679_v31 = vunpack.c.l.s8.bf16 %v5599_v43  ;;  %v5681_v54 = vunpack.c.l.s8.bf16 %v5601_v38  ;;  %v5695_v61 = vunpack.c.h.s8.bf16 %v5599_v43  ;;  %v5697_v33 = vunpack.c.h.s8.bf16 %v5601_v38 }
 0xa3a   : > { %5938 = vmatpush1.bf16.msra.mxu1 %v5659_v3  ;;  %5981 = vmatpush1.bf16.msra.mxu0 %v5661_v58  ;;  %v5696_v3 = vunpack.c.h.s8.bf16 %v5600_v59  ;;  %v5698_v58 = vunpack.c.h.s8.bf16 %v5602_v34 }
 0xa3b   : > { %5939 = vmatprep.subr.bf16.mxu1 %v5676_v9  ;;  %5982 = vmatprep.subr.bf16.mxu0 %v5678_v22  ;;  %v5616_v9 = vld [vmem:[%s9092_s7 + $0x168] sm:$0xff]  ;;  %v5618_v22 = vld [vmem:[%s9092_s7 + $0x178] sm:$0xff] }
 0xa3c   : > { %v5728_v8 = vunpack.c.h.s8.bf16 %v5616_v9 }
 0xa3e   : > { %5940 = vmatpush1.bf16.msra.mxu1 %v5675_v12  ;;  %5983 = vmatpush1.bf16.msra.mxu0 %v5677_v27  ;;  %v5714_v12 = vunpack.c.l.s8.bf16 %v5618_v22  ;;  %v5615_v27 = vld [vmem:[%s9092_s7 + $0x160] sm:$0xff] }
 0xa3f   : > { %5941 = vmatprep.subr.bf16.mxu1 %v5692_v15  ;;  %5984 = vmatprep.subr.bf16.mxu0 %v5694_v21  ;;  %v5617_v15 = vld [vmem:[%s9092_s7 + $0x170] sm:$0xff]  ;;  %v5711_v21 = vunpack.c.l.s8.bf16 %v5615_v27 }
 0xa40   : > { %v5713_v30 = vunpack.c.l.s8.bf16 %v5617_v15  ;;  %v5729_v62 = vunpack.c.h.s8.bf16 %v5617_v15 }
 0xa42   : > { %5942 = vmatpush1.bf16.msra.mxu1 %v5691_v28  ;;  %5985 = vmatpush1.bf16.msra.mxu0 %v5693_v10  ;;  %v5730_v28 = vunpack.c.h.s8.bf16 %v5618_v22  ;;  %v5632_v10 = vld [vmem:[%s9092_s7 + $0x1e8] sm:$0xff] }
 0xa43   : > { %5943 = vmatprep.subr.bf16.mxu1 %v5708_v24  ;;  %5986 = vmatprep.subr.bf16.mxu0 %v5710_v20  ;;  %v5634_v24 = vld [vmem:[%s9092_s7 + $0x1f8] sm:$0xff]  ;;  %v5727_v20 = vunpack.c.h.s8.bf16 %v5615_v27  ;;  %v5744_v36 = vunpack.c.l.s8.bf16 %v5632_v10  ;;  %v5760_v53 = vunpack.c.h.s8.bf16 %v5632_v10 }
 0xa46   : > { %5944 = vmatpush1.bf16.msra.mxu1 %v5707_v25  ;;  %5987 = vmatpush1.bf16.msra.mxu0 %v5709_v50  ;;  %v5746_v25 = vunpack.c.l.s8.bf16 %v5634_v24  ;;  %v5631_v50 = vld [vmem:[%s9092_s7 + $0x1e0] sm:$0xff] }
 0xa47   : > { %5945 = vmatprep.subr.bf16.mxu1 %v5724_v49  ;;  %5988 = vmatprep.subr.bf16.mxu0 %v5726_v32  ;;  %v5633_v49 = vld [vmem:[%s9092_s7 + $0x1f0] sm:$0xff]  ;;  %v5743_v32 = vunpack.c.l.s8.bf16 %v5631_v50 }
 0xa48   : > { %v5745_v37 = vunpack.c.l.s8.bf16 %v5633_v49  ;;  %v5761_v19 = vunpack.c.h.s8.bf16 %v5633_v49 }
 0xa4a   : > { %5946 = vmatpush1.bf16.msra.mxu1 %v5723_v45  ;;  %5989 = vmatpush1.bf16.msra.mxu0 %v5725_v47  ;;  %v5762_v45 = vunpack.c.h.s8.bf16 %v5634_v24  ;;  %v6391_v47 = vld [vmem:[%s9100_s22 + $0x20] sm:$0xff] }
 0xa4b   : > { %5947 = vmatprep.subr.bf16.mxu1 %v5740_v23  ;;  %5990 = vmatprep.subr.bf16.mxu0 %v5742_v13  ;;  %v6399_v23 = vld [vmem:[%s9100_s22 + $0x60] sm:$0xff]  ;;  %v5759_v13 = vunpack.c.h.s8.bf16 %v5631_v50  ;;  %v6459_v57 = vunpack.c.l.s8.bf16 %v6391_v47  ;;  %v6460_v17 = vunpack.c.h.s8.bf16 %v6391_v47 }
 0xa4e   : > { %5948 = vmatpush1.bf16.msra.mxu1 %v5739_v60  ;;  %5991 = vmatpush1.bf16.msra.mxu0 %v5741_v1  ;;  %v6475_v60 = vunpack.c.l.s8.bf16 %v6399_v23  ;;  %v6387_v1 = vld [vmem:[%s9100_s22] sm:$0xff] }
 0xa4f   : > { %5949 = vmatprep.subr.bf16.mxu1 %v5756_v46  ;;  %5992 = vmatprep.subr.bf16.mxu0 %v5758_v48  ;;  %v6395_v46 = vld [vmem:[%s9100_s22 + $0x40] sm:$0xff]  ;;  %v6451_v48 = vunpack.c.l.s8.bf16 %v6387_v1 }
 0xa50   : > { %v6467_v2 = vunpack.c.l.s8.bf16 %v6395_v46  ;;  %v6468_v52 = vunpack.c.h.s8.bf16 %v6395_v46 }
 0xa52   : > { %5950 = vmatpush1.bf16.msra.mxu1 %v5755_v6  ;;  %5993 = vmatpush1.bf16.msra.mxu0 %v5757_v35  ;;  %v6476_v6 = vunpack.c.h.s8.bf16 %v6399_v23  ;;  %v6392_v35 = vld [vmem:[%s9100_s22 + $0x28] sm:$0xff] }
 0xa53   : > { %6021 = vmatprep.subr.bf16.mxu1 %v5648_v14  ;;  %6064 = vmatprep.subr.bf16.mxu0 %v5650_v16  ;;  %v6400_v14 = vld [vmem:[%s9100_s22 + $0x68] sm:$0xff]  ;;  %v6452_v16 = vunpack.c.h.s8.bf16 %v6387_v1  ;;  %v6461_v56 = vunpack.c.l.s8.bf16 %v6392_v35 }
 0xa54   : > { %v6478_v34 = vunpack.c.h.s8.bf16 %v6400_v14 }
 0xa55   : > { %5968 = vmatmul.mubr.bf16.vlgmr.msra.gmra.mrb[84].mxu1 %v10319_v11  ;;  %6011 = vmatmul.mubr.bf16.vlgmr.msra.gmra.mrb[72].mxu0 %v10319_v11 }
 0xa56   : > { %6022 = vmatpush1.bf16.msra.mxu1 %v5647_v51  ;;  %6065 = vmatpush1.bf16.msra.mxu0 %v5649_v26  ;;  %v6477_v51 = vunpack.c.l.s8.bf16 %v6400_v14  ;;  %v6388_v26 = vld [vmem:[%s9100_s22 + $0x8] sm:$0xff] }
 0xa57   : > { %6023 = vmatprep.subr.bf16.mxu1 %v5664_v44  ;;  %6066 = vmatprep.subr.bf16.mxu0 %v5666_v39  ;;  %v6396_v44 = vld [vmem:[%s9100_s22 + $0x48] sm:$0xff]  ;;  %v6453_v39 = vunpack.c.l.s8.bf16 %v6388_v26 }
 0xa58   : > { %6053 = vmatprep.mubr.bf16.mxu1 %v8669_v40  ;;  %6096 = vmatprep.mubr.bf16.mxu0 %v8669_v40  ;;  %v5712_v40 = vunpack.c.l.s8.bf16 %v5616_v9  ;;  %v6469_v59 = vunpack.c.l.s8.bf16 %v6396_v44 }
 0xa5a   : > { %6024 = vmatpush1.bf16.msra.mxu1 %v5663_v55  ;;  %6067 = vmatpush1.bf16.msra.mxu0 %v5665_v42  ;;  %v6393_v55 = vld [vmem:[%s9100_s22 + $0x30] sm:$0xff] }
 0xa5b   : > { %6025 = vmatprep.subr.bf16.mxu1 %v5680_v41  ;;  %6068 = vmatprep.subr.bf16.mxu0 %v5682_v0  ;;  %v6401_v42 = vld [vmem:[%s9100_s22 + $0x70] sm:$0xff]  ;;  %v6454_v41 = vunpack.c.h.s8.bf16 %v6388_v26  ;;  %v6470_v0 = vunpack.c.h.s8.bf16 %v6396_v44  ;;  %v6463_v43 = vunpack.c.l.s8.bf16 %v6393_v55  ;;  %v6464_v9 = vunpack.c.h.s8.bf16 %v6393_v55 }
 0xa5c   : > { %v6479_v38 = vunpack.c.l.s8.bf16 %v6401_v42  ;;  %v6480_v22 = vunpack.c.h.s8.bf16 %v6401_v42 }
 0xa5e   : > { %6026 = vmatpush1.bf16.msra.mxu1 %v5679_v31  ;;  %6069 = vmatpush1.bf16.msra.mxu0 %v5681_v54  ;;  %v6389_v31 = vld [vmem:[%s9100_s22 + $0x10] sm:$0xff] }
 0xa5f   : > { %6027 = vmatprep.subr.bf16.mxu1 %v5696_v3  ;;  %6070 = vmatprep.subr.bf16.mxu0 %v5698_v58  ;;  %v6397_v54 = vld [vmem:[%s9100_s22 + $0x50] sm:$0xff]  ;;  %v6455_v3 = vunpack.c.l.s8.bf16 %v6389_v31 }
 0xa60   : > { %v6471_v58 = vunpack.c.l.s8.bf16 %v6397_v54 }
 0xa62   : > { %6028 = vmatpush1.bf16.msra.mxu1 %v5695_v61  ;;  %6071 = vmatpush1.bf16.msra.mxu0 %v5697_v33  ;;  %v6394_v61 = vld [vmem:[%s9100_s22 + $0x38] sm:$0xff] }
 0xa63   : > { %6029 = vmatprep.subr.bf16.mxu1 %v5712_v40  ;;  %6072 = vmatprep.subr.bf16.mxu0 %v5714_v12  ;;  %v6402_v33 = vld [vmem:[%s9100_s22 + $0x78] sm:$0xff]  ;;  %v6456_v40 = vunpack.c.h.s8.bf16 %v6389_v31  ;;  %v6472_v12 = vunpack.c.h.s8.bf16 %v6397_v54  ;;  %v6465_v27 = vunpack.c.l.s8.bf16 %v6394_v61  ;;  %v6466_v10 = vunpack.c.h.s8.bf16 %v6394_v61  ;;  %v6411_v61 = vld [vmem:[%s9100_s22 + $0xc0] sm:$0xff] }
 0xa64   : > { %v6481_v15 = vunpack.c.l.s8.bf16 %v6402_v33  ;;  %v6482_v24 = vunpack.c.h.s8.bf16 %v6402_v33 }
 0xa66   : > { %6030 = vmatpush1.bf16.msra.mxu1 %v5711_v21  ;;  %6073 = vmatpush1.bf16.msra.mxu0 %v5713_v30  ;;  %v6390_v21 = vld [vmem:[%s9100_s22 + $0x18] sm:$0xff] }
 0xa67   : > { %6031 = vmatprep.subr.bf16.mxu1 %v5728_v8  ;;  %6074 = vmatprep.subr.bf16.mxu0 %v5730_v28  ;;  %v6398_v30 = vld [vmem:[%s9100_s22 + $0x58] sm:$0xff]  ;;  %v6457_v8 = vunpack.c.l.s8.bf16 %v6390_v21 }
 0xa68   : > { %v6473_v28 = vunpack.c.l.s8.bf16 %v6398_v30 }
 0xa6a   : > { %6032 = vmatpush1.bf16.msra.mxu1 %v5727_v20  ;;  %6075 = vmatpush1.bf16.msra.mxu0 %v5729_v62  ;;  %v10396_v20 = vld [vmem:[%s9100_s22 + $0xa0] sm:$0xff] }
 0xa6b   : > { %6033 = vmatprep.subr.bf16.mxu1 %v5744_v36  ;;  %6076 = vmatprep.subr.bf16.mxu0 %v5746_v25  ;;  %v10399_v62 = vld [vmem:[%s9100_s22 + $0xe0] sm:$0xff]  ;;  %v6458_v36 = vunpack.c.h.s8.bf16 %v6390_v21  ;;  %v6474_v25 = vunpack.c.h.s8.bf16 %v6398_v30  ;;  %v6491_v50 = vunpack.c.l.s8.bf16 %v10396_v20 }
 0xa6c   : > { %v6507_v49 = vunpack.c.l.s8.bf16 %v10399_v62 }
 0xa6e   : > { %6034 = vmatpush1.bf16.msra.mxu1 %v5743_v32  ;;  %6077 = vmatpush1.bf16.msra.mxu0 %v5745_v37  ;;  %v10404_v32 = vld [vmem:[%s9136_s11] sm:$0xff]  ;;  %v10407_v37 = vsub.s32 3, %v9209_v4 }
 0xa6f   : > { %6035 = vmatprep.subr.bf16.mxu1 %v5760_v53  ;;  %6078 = vmatprep.subr.bf16.mxu0 %v5762_v45  ;;  %v10410_v53 = vld [vmem:[%s9098_s19] sm:$0xff]  ;;  %v6114_v45 = vrot.slane %v10404_v32, %v9216_v7  ;;  %v6122_v47 = vrot.slane %v10404_v32, %v9285_v18  ;;  %v6118_v23 = vrot.slane %v10404_v32, %v9212_v5 }
 0xa70   : > { %v6234_v46 = vrot.slane %v10410_v53, %v9212_v5 }
 0xa72   : > { %6036 = vmatpush1.bf16.msra.mxu1 %v5759_v13  ;;  %6079 = vmatpush1.bf16.msra.mxu0 %v5761_v19  ;;  %v6126_v13 = vrot.slane %v10404_v32, %v10407_v37  ;;  %v6230_v19 = vrot.slane %v10410_v53, %v9216_v7 }
 0xa73   : > { %7626 = vmatprep.subr.bf16.mxu1 %v6459_v57  ;;  %7648 = vmatprep.subr.bf16.mxu0 %v6475_v60  ;;  %v6238_v57 = vrot.slane %v10410_v53, %v9285_v18 }
 0xa75   : > { %6054 = vmatmul.mubr.bf16.vlgmr.msra.gmra.mrb[88].mxu1 %v10319_v11  ;;  %6097 = vmatmul.mubr.bf16.vlgmr.msra.gmra.mrb[76].mxu0 %v10319_v11  ;;  %v6462_v11 = vunpack.c.h.s8.bf16 %v6392_v35 }
 0xa76   : > { %7627 = vmatpush3.bf16.msra.mxu1 %v6451_v48  ;;  %7649 = vmatpush3.bf16.msra.mxu0 %v6467_v2  ;;  %v6242_v48 = vrot.slane %v10410_v53, %v10407_v37 }
 0xa77   : > { %7628 = vmatprep.subr.bf16.mxu1 %v6460_v17  ;;  %7650 = vmatprep.subr.bf16.mxu0 %v6476_v6 }
 0xa7a   : > { %7629 = vmatpush3.bf16.msra.mxu1 %v6452_v16  ;;  %7651 = vmatpush3.bf16.msra.mxu0 %v6468_v52 }
 0xa7b   : > { %7630 = vmatprep.subr.bf16.mxu1 %v6461_v56  ;;  %7652 = vmatprep.subr.bf16.mxu0 %v6477_v51 }
 0xa7e   : > { %7631 = vmatpush3.bf16.msra.mxu1 %v6453_v39  ;;  %7653 = vmatpush3.bf16.msra.mxu0 %v6469_v59 }
 0xa7f   : > { %7632 = vmatprep.subr.bf16.mxu1 %v6462_v11  ;;  %7654 = vmatprep.subr.bf16.mxu0 %v6478_v34 }
 0xa82   : > { %7633 = vmatpush3.bf16.msra.mxu1 %v6454_v41  ;;  %7655 = vmatpush3.bf16.msra.mxu0 %v6470_v0 }
 0xa83   : > { %7634 = vmatprep.subr.bf16.mxu1 %v6463_v43  ;;  %7656 = vmatprep.subr.bf16.mxu0 %v6479_v38 }
 0xa86   : > { %7635 = vmatpush3.bf16.msra.mxu1 %v6455_v3  ;;  %7657 = vmatpush3.bf16.msra.mxu0 %v6471_v58 }
 0xa87   : > { %7636 = vmatprep.subr.bf16.mxu1 %v6464_v9  ;;  %7658 = vmatprep.subr.bf16.mxu0 %v6480_v22  ;;  %v6403_v22 = vld [vmem:[%s9100_s22 + $0x80] sm:$0xff] }
 0xa8a   : > { %7637 = vmatpush3.bf16.msra.mxu1 %v6456_v40  ;;  %7659 = vmatpush3.bf16.msra.mxu0 %v6472_v12 }
 0xa8b   : > { %7638 = vmatprep.subr.bf16.mxu1 %v6465_v27  ;;  %7660 = vmatprep.subr.bf16.mxu0 %v6481_v15 }
 0xa8e   : > { %7639 = vmatpush3.bf16.msra.mxu1 %v6457_v8  ;;  %7661 = vmatpush3.bf16.msra.mxu0 %v6473_v28  ;;  %v6483_v28 = vunpack.c.l.s8.bf16 %v6403_v22 }
 0xa8f   : > { %7640 = vmatprep.subr.bf16.mxu1 %v6466_v10  ;;  %7662 = vmatprep.subr.bf16.mxu0 %v6482_v24  ;;  %v6499_v10 = vunpack.c.l.s8.bf16 %v6411_v61  ;;  %v6492_v24 = vunpack.c.h.s8.bf16 %v10396_v20 }
 0xa92   : > { %7641 = vmatpush3.bf16.msra.mxu1 %v6458_v36  ;;  %7663 = vmatpush3.bf16.msra.mxu0 %v6474_v25  ;;  %v6508_v36 = vunpack.c.h.s8.bf16 %v10399_v62  ;;  %v6408_v25 = vld [vmem:[%s9100_s22 + $0xa8] sm:$0xff] }
 0xa93   : > { %7670 = vmatprep.subr.bf16.mxu1 %v6491_v50  ;;  %7692 = vmatprep.subr.bf16.mxu0 %v6507_v49  ;;  %v6416_v50 = vld [vmem:[%s9100_s22 + $0xe8] sm:$0xff]  ;;  %v6484_v49 = vunpack.c.h.s8.bf16 %v6403_v22 }
 0xa94   : > { %v6509_v20 = vunpack.c.l.s8.bf16 %v6416_v50 }
 0xae8   : > { %v5797_v60 = vpop.f32.mrb[76].mxu1  ;;  %v5840_v1 = vpop.f32.mrb[64].mxu0 }
 0xae9   : > { %v6191_v2 = vmul.f32 %v6114_v45, %v5797_v60  ;;  %v6193_v17 = vmul.f32 %v6122_v47, %v5840_v1  ;;  %v5799_v6 = vpop.f32.mrb[77].mxu1  ;;  %v5842_v35 = vpop.f32.mrb[65].mxu0  ;;  %v6510_v60 = vunpack.c.h.s8.bf16 %v6416_v50  ;;  %v6409_v1 = vld [vmem:[%s9100_s22 + $0xb0] sm:$0xff] }
 0xaea   : > { %v6192_v14 = vmul.f32 %v6118_v23, %v5799_v6  ;;  %v6194_v16 = vmul.f32 %v6126_v13, %v5842_v35  ;;  %v5801_v52 = vpop.f32.mrb[78].mxu1  ;;  %v5844_v56 = vpop.f32.mrb[66].mxu0  ;;  %v6405_v35 = vld [vmem:[%s9100_s22 + $0x90] sm:$0xff] }
 0xaeb   : > { %v6307_v51 = vadd.f32 %v6230_v19, %v6191_v2  ;;  %v6309_v26 = vadd.f32 %v6238_v57, %v6193_v17  ;;  %v6207_v44 = vmul.f32 %v6114_v45, %v5801_v52  ;;  %v6209_v39 = vmul.f32 %v6122_v47, %v5844_v56  ;;  %v5803_v59 = vpop.f32.mrb[79].mxu1  ;;  %v5846_v11 = vpop.f32.mrb[67].mxu0 }
 0xaec   : > { %v6308_v34 = vadd.f32 %v6234_v46, %v6192_v14  ;;  %v6310_v55 = vadd.f32 %v6242_v48, %v6194_v16  ;;  %v6208_v42 = vmul.f32 %v6118_v23, %v5803_v59  ;;  %v6210_v41 = vmul.f32 %v6126_v13, %v5846_v11  ;;  %v6404_v23 = vld [vmem:[%s9100_s22 + $0x88] sm:$0xff]  ;;  %v6413_v14 = vld [vmem:[%s9100_s22 + $0xd0] sm:$0xff]  ;;  %v10453_v11 = vld [vmem:[%s9100_s22 + $0xb8] sm:$0xff] }
 0xaed   : > { %v6323_v0 = vadd.f32 %v6230_v19, %v6207_v44  ;;  %v6325_v43 = vadd.f32 %v6238_v57, %v6209_v39  ;;  %v6339_v54 = vmax.f32 %v6307_v51, 0.0  ;;  %v6341_v3 = vmax.f32 %v6309_v26, 0.0  ;;  %v6412_v13 = vld [vmem:[%s9100_s22 + $0xc8] sm:$0xff] }
 0xaee   : > { %v6324_v38 = vadd.f32 %v6234_v46, %v6208_v42  ;;  %v6326_v31 = vadd.f32 %v6242_v48, %v6210_v41  ;;  %v6340_v33 = vmax.f32 %v6308_v34, 0.0  ;;  %v6342_v40 = vmax.f32 %v6310_v55, 0.0  ;;  %v6417_v46 = vld [vmem:[%s9100_s22 + $0xf0] sm:$0xff]  ;;  %v6418_v42 = vld [vmem:[%s9100_s22 + $0xf8] sm:$0xff] }
 0xaef   : > { %v6355_v58 = vmax.f32 %v6323_v0, 0.0  ;;  %v6357_v9 = vmax.f32 %v6325_v43, 0.0  ;;  %v6500_v45 = vunpack.c.h.s8.bf16 %v6411_v61  ;;  %v6493_v47 = vunpack.c.l.s8.bf16 %v6408_v25 }
 0xaf0   : > { %v6356_v12 = vmax.f32 %v6324_v38, 0.0  ;;  %v6358_v27 = vmax.f32 %v6326_v31, 0.0  ;;  %v6485_v62 = vunpack.c.l.s8.bf16 %v6404_v23  ;;  %v6501_v19 = vunpack.c.l.s8.bf16 %v6412_v13  ;;  %v10465_v38 = vld [vmem:[%s9100_s22 + $0x98] sm:$0xff] }
 0xaf1   : > { %v6371_v15 = vpack.c.bf16 %v6355_v58, %v6339_v54  ;;  %v6373_v21 = vpack.c.bf16 %v6357_v9, %v6341_v3  ;;  %v6494_v57 = vunpack.c.h.s8.bf16 %v6408_v25  ;;  %v6486_v48 = vunpack.c.h.s8.bf16 %v6404_v23  ;;  %v6414_v58 = vld [vmem:[%s9100_s22 + $0xd8] sm:$0xff]  ;;  %v6423_v23 = vld [vmem:[%s9100_s22 + $0x120] sm:$0xff] }
 0xaf2   : > { %v6372_v30 = vpack.c.bf16 %v6356_v12, %v6340_v33  ;;  %v6374_v8 = vpack.c.bf16 %v6358_v27, %v6342_v40  ;;  %v6502_v2 = vunpack.c.h.s8.bf16 %v6412_v13  ;;  %v6495_v17 = vunpack.c.l.s8.bf16 %v6409_v1  ;;  %v6431_v13 = vld [vmem:[%s9100_s22 + $0x160] sm:$0xff] }
 0xaf3   : > { %v6511_v6 = vunpack.c.l.s8.bf16 %v6417_v46  ;;  %v10441_v16 = vsub.s32 4, %v9209_v4  ;;  %v10444_v52 = vsub.s32 6, %v9209_v4  ;;  %v6487_v56 = vunpack.c.l.s8.bf16 %v6405_v35 }
 0xaf4   : > { %6611 = vmatprep.mubr.bf16.mxu1 %v6372_v30  ;;  %6652 = vmatprep.mubr.bf16.mxu0 %v6374_v8  ;;  %v6503_v51 = vunpack.c.l.s8.bf16 %v6413_v14  ;;  %v10447_v26 = vsub.s32 5, %v9209_v4  ;;  %v10450_v44 = vsub.s32 7, %v9209_v4  ;;  %v6496_v39 = vunpack.c.h.s8.bf16 %v6409_v1 }
 0xaf5   : > { %6612 = vmatmul.mubr.bf16.vlgmr.msra.gmra.mrb[92].mxu1 %v6371_v15  ;;  %6653 = vmatmul.mubr.bf16.vlgmr.msra.gmra.mrb[80].mxu0 %v6373_v21  ;;  %v6512_v59 = vunpack.c.h.s8.bf16 %v6417_v46  ;;  %v6130_v34 = vrot.slane %v10404_v32, %v10441_v16  ;;  %v6138_v55 = vrot.slane %v10404_v32, %v10444_v52  ;;  %v6488_v0 = vunpack.c.h.s8.bf16 %v6405_v35 }
 0xaf6   : > { %7671 = vmatpush3.bf16.msra.mxu1 %v6483_v28  ;;  %7693 = vmatpush3.bf16.msra.mxu0 %v6499_v10  ;;  %v6134_v4 = vrot.slane %v10404_v32, %v10447_v26  ;;  %v6142_v41 = vrot.slane %v10404_v32, %v10450_v44  ;;  %v6504_v43 = vunpack.c.h.s8.bf16 %v6413_v14  ;;  %v6246_v31 = vrot.slane %v10410_v53, %v10441_v16 }
 0xaf7   : > { %7672 = vmatprep.subr.bf16.mxu1 %v6492_v24  ;;  %7694 = vmatprep.subr.bf16.mxu0 %v6508_v36  ;;  %v6254_v54 = vrot.slane %v10410_v53, %v10444_v52  ;;  %v6497_v3 = vunpack.c.l.s8.bf16 %v10453_v11  ;;  %v6250_v32 = vrot.slane %v10410_v53, %v10447_v26  ;;  %v6258_v61 = vrot.slane %v10410_v53, %v10450_v44 }
 0xaf8   : > { %v6513_v33 = vunpack.c.l.s8.bf16 %v6418_v42  ;;  %v6489_v21 = vunpack.c.l.s8.bf16 %v10465_v38  ;;  %v6498_v30 = vunpack.c.h.s8.bf16 %v10453_v11  ;;  %v6505_v36 = vunpack.c.l.s8.bf16 %v6414_v58  ;;  %v6419_v11 = vld [vmem:[%s9100_s22 + $0x100] sm:$0xff] }
 0xaf9   : > { %v6514_v25 = vunpack.c.h.s8.bf16 %v6418_v42  ;;  %v6523_v35 = vunpack.c.l.s8.bf16 %v6423_v23  ;;  %v6539_v14 = vunpack.c.l.s8.bf16 %v6431_v13 }
 0xafa   : > { %7673 = vmatpush3.bf16.msra.mxu1 %v6484_v49  ;;  %7695 = vmatpush3.bf16.msra.mxu0 %v6500_v45 }
 0xafb   : > { %7674 = vmatprep.subr.bf16.mxu1 %v6493_v47  ;;  %7696 = vmatprep.subr.bf16.mxu0 %v6509_v20 }
 0xafe   : > { %7675 = vmatpush3.bf16.msra.mxu1 %v6485_v62  ;;  %7697 = vmatpush3.bf16.msra.mxu0 %v6501_v19 }
 0xaff   : > { %7676 = vmatprep.subr.bf16.mxu1 %v6494_v57  ;;  %7698 = vmatprep.subr.bf16.mxu0 %v6510_v60 }
 0xb02   : > { %7677 = vmatpush3.bf16.msra.mxu1 %v6486_v48  ;;  %7699 = vmatpush3.bf16.msra.mxu0 %v6502_v2  ;;  %v6490_v48 = vunpack.c.h.s8.bf16 %v10465_v38  ;;  %v6506_v2 = vunpack.c.h.s8.bf16 %v6414_v58  ;;  %v6524_v58 = vunpack.c.h.s8.bf16 %v6423_v23  ;;  %v10493_v23 = vld [vmem:[%s9136_s11 + $0x8] sm:$0xff] }
 0xb03   : > { %7678 = vmatprep.subr.bf16.mxu1 %v6495_v17  ;;  %7700 = vmatprep.subr.bf16.mxu0 %v6511_v6 }
 0xb06   : > { %7679 = vmatpush3.bf16.msra.mxu1 %v6487_v56  ;;  %7701 = vmatpush3.bf16.msra.mxu0 %v6503_v51 }
 0xb07   : > { %7680 = vmatprep.subr.bf16.mxu1 %v6496_v39  ;;  %7702 = vmatprep.subr.bf16.mxu0 %v6512_v59 }
 0xb08   : > { %v5883_v9 = vpop.f32.mrb[80].mxu1  ;;  %v5926_v22 = vpop.f32.mrb[68].mxu0 }
 0xb09   : > { %v6195_v40 = vmul.f32 %v6130_v34, %v5883_v9  ;;  %v6197_v12 = vmul.f32 %v6138_v55, %v5926_v22  ;;  %v5885_v27 = vpop.f32.mrb[81].mxu1  ;;  %v5928_v15 = vpop.f32.mrb[69].mxu0  ;;  %v6540_v9 = vunpack.c.h.s8.bf16 %v6431_v13  ;;  %v6424_v22 = vld [vmem:[%s9100_s22 + $0x128] sm:$0xff] }
 0xb0a   : > { %v6196_v8 = vmul.f32 %v6134_v4, %v5885_v27  ;;  %v6198_v28 = vmul.f32 %v6142_v41, %v5928_v15  ;;  %v5887_v10 = vpop.f32.mrb[82].mxu1  ;;  %v5930_v24 = vpop.f32.mrb[70].mxu0  ;;  %7681 = vmatpush3.bf16.msra.mxu1 %v6488_v0  ;;  %7703 = vmatpush3.bf16.msra.mxu0 %v6504_v43  ;;  %v6420_v27 = vld [vmem:[%s9100_s22 + $0x108] sm:$0xff] }
 0xb0b   : > { %v6311_v53 = vadd.f32 %v6246_v31, %v6195_v40  ;;  %v6313_v50 = vadd.f32 %v6254_v54, %v6197_v12  ;;  %v6211_v49 = vmul.f32 %v6130_v34, %v5887_v10  ;;  %v6213_v45 = vmul.f32 %v6138_v55, %v5930_v24  ;;  %v5889_v47 = vpop.f32.mrb[83].mxu1  ;;  %v5932_v20 = vpop.f32.mrb[71].mxu0  ;;  %7682 = vmatprep.subr.bf16.mxu1 %v6497_v3  ;;  %v6427_v34 = vld [vmem:[%s9100_s22 + $0x140] sm:$0xff]  ;;  %v6428_v15 = vld [vmem:[%s9100_s22 + $0x148] sm:$0xff]  ;;  %v6425_v10 = vld [vmem:[%s9100_s22 + $0x130] sm:$0xff] }
 0xb0c   : > { %v6312_v62 = vadd.f32 %v6250_v32, %v6196_v8  ;;  %v6314_v19 = vadd.f32 %v6258_v61, %v6198_v28  ;;  %v6212_v57 = vmul.f32 %v6134_v4, %v5889_v47  ;;  %v6214_v60 = vmul.f32 %v6142_v41, %v5932_v20  ;;  %7704 = vmatprep.subr.bf16.mxu0 %v6513_v33  ;;  %v6433_v24 = vld [vmem:[%s9100_s22 + $0x170] sm:$0xff] }
 0xb0d   : > { %v6327_v1 = vadd.f32 %v6246_v31, %v6211_v49  ;;  %v6329_v46 = vadd.f32 %v6254_v54, %v6213_v45  ;;  %v6343_v56 = vmax.f32 %v6311_v53, 0.0  ;;  %v6345_v51 = vmax.f32 %v6313_v50, 0.0  ;;  %v6421_v49 = vld [vmem:[%s9100_s22 + $0x110] sm:$0xff] }
 0xb0e   : > { %v6328_v17 = vadd.f32 %v6250_v32, %v6212_v57  ;;  %v6330_v6 = vadd.f32 %v6258_v61, %v6214_v60  ;;  %7683 = vmatpush3.bf16.msra.mxu1 %v6489_v21  ;;  %7705 = vmatpush3.bf16.msra.mxu0 %v6505_v36  ;;  %v6344_v55 = vmax.f32 %v6312_v62, 0.0  ;;  %v6346_v42 = vmax.f32 %v6314_v19, 0.0  ;;  %v6432_v32 = vld [vmem:[%s9100_s22 + $0x168] sm:$0xff]  ;;  %v6429_v45 = vld [vmem:[%s9100_s22 + $0x150] sm:$0xff]  ;;  %v10499_v57 = vld [vmem:[%s9100_s22 + $0x138] sm:$0xff] }
 0xb0f   : > { %v6359_v39 = vmax.f32 %v6327_v1, 0.0  ;;  %v6361_v59 = vmax.f32 %v6329_v46, 0.0  ;;  %7684 = vmatprep.subr.bf16.mxu1 %v6498_v30  ;;  %7706 = vmatprep.subr.bf16.mxu0 %v6514_v25  ;;  %v6515_v54 = vunpack.c.l.s8.bf16 %v6419_v11  ;;  %v6531_v3 = vunpack.c.l.s8.bf16 %v6427_v34  ;;  %v10496_v19 = vld [vmem:[%s9098_s19 + $0x8] sm:$0xff] }
 0xb10   : > { %v6360_v4 = vmax.f32 %v6328_v17, 0.0  ;;  %v6362_v41 = vmax.f32 %v6330_v6, 0.0  ;;  %v6516_v61 = vunpack.c.h.s8.bf16 %v6419_v11  ;;  %v6532_v33 = vunpack.c.h.s8.bf16 %v6427_v34  ;;  %v6434_v46 = vld [vmem:[%s9100_s22 + $0x178] sm:$0xff] }
 0xb11   : > { %v6375_v0 = vpack.c.bf16 %v6359_v39, %v6343_v56  ;;  %v6377_v43 = vpack.c.bf16 %v6361_v59, %v6345_v51  ;;  %v6525_v40 = vunpack.c.l.s8.bf16 %v6424_v22  ;;  %v6541_v12 = vunpack.c.l.s8.bf16 %v6432_v32  ;;  %v6430_v39 = vld [vmem:[%s9100_s22 + $0x158] sm:$0xff] }
 0xb12   : > { %7685 = vmatpush3.bf16.msra.mxu1 %v6490_v48  ;;  %7707 = vmatpush3.bf16.msra.mxu0 %v6506_v2  ;;  %v6376_v38 = vpack.c.bf16 %v6360_v4, %v6344_v55  ;;  %v6378_v31 = vpack.c.bf16 %v6362_v41, %v6346_v42  ;;  %v6517_v21 = vunpack.c.l.s8.bf16 %v6420_v27  ;;  %v6533_v30 = vunpack.c.l.s8.bf16 %v6428_v15 }
 0xb13   : > { %7714 = vmatprep.subr.bf16.mxu1 %v6523_v35  ;;  %7736 = vmatprep.subr.bf16.mxu0 %v6539_v14  ;;  %v6526_v8 = vunpack.c.h.s8.bf16 %v6424_v22  ;;  %v6542_v28 = vunpack.c.h.s8.bf16 %v6432_v32  ;;  %v6518_v36 = vunpack.c.h.s8.bf16 %v6420_v27  ;;  %v6534_v25 = vunpack.c.h.s8.bf16 %v6428_v15  ;;  %v10511_v35 = vld [vmem:[%s9100_s22 + $0x118] sm:$0xff] }
 0xb14   : > { %6693 = vmatprep.mubr.bf16.mxu1 %v6376_v38  ;;  %6734 = vmatprep.mubr.bf16.mxu0 %v6378_v31  ;;  %v6527_v53 = vunpack.c.l.s8.bf16 %v6425_v10  ;;  %v6543_v50 = vunpack.c.l.s8.bf16 %v6433_v24  ;;  %v6519_v47 = vunpack.c.l.s8.bf16 %v6421_v49  ;;  %v6535_v20 = vunpack.c.l.s8.bf16 %v6429_v45 }
 0xb15   : > { %6694 = vmatmul.mubr.bf16.vlgmr.msra.gmra.mrb[96].mxu1 %v6375_v0  ;;  %6735 = vmatmul.mubr.bf16.vlgmr.msra.gmra.mrb[84].mxu0 %v6377_v43  ;;  %v6528_v13 = vunpack.c.h.s8.bf16 %v6425_v10  ;;  %v6544_v62 = vunpack.c.h.s8.bf16 %v6433_v24  ;;  %v6146_v60 = vrot.slane %v10493_v23, %v9216_v7  ;;  %v6154_v1 = vrot.slane %v10493_v23, %v9285_v18 }
 0xb16   : > { %7715 = vmatpush3.bf16.msra.mxu1 %v6515_v54  ;;  %7737 = vmatpush3.bf16.msra.mxu0 %v6531_v3  ;;  %v6150_v48 = vrot.slane %v10493_v23, %v9212_v5  ;;  %v6158_v2 = vrot.slane %v10493_v23, %v10407_v37  ;;  %v6520_v17 = vunpack.c.h.s8.bf16 %v6421_v49  ;;  %v6536_v6 = vunpack.c.h.s8.bf16 %v6429_v45 }
 0xb17   : > { %7716 = vmatprep.subr.bf16.mxu1 %v6524_v58  ;;  %7738 = vmatprep.subr.bf16.mxu0 %v6540_v9  ;;  %v6262_v14 = vrot.slane %v10496_v19, %v9216_v7  ;;  %v6270_v56 = vrot.slane %v10496_v19, %v9285_v18  ;;  %v6529_v51 = vunpack.c.l.s8.bf16 %v10499_v57  ;;  %v6266_v34 = vrot.slane %v10496_v19, %v9212_v5 }
 0xb18   : > { %v6274_v55 = vrot.slane %v10496_v19, %v10407_v37  ;;  %v6545_v42 = vunpack.c.l.s8.bf16 %v6434_v46  ;;  %v6521_v18 = vunpack.c.l.s8.bf16 %v10511_v35  ;;  %v6530_v43 = vunpack.c.h.s8.bf16 %v10499_v57 }
 0xb19   : > { %v6537_v5 = vunpack.c.l.s8.bf16 %v6430_v39  ;;  %v6546_v58 = vunpack.c.h.s8.bf16 %v6434_v46  ;;  %v6522_v10 = vunpack.c.h.s8.bf16 %v10511_v35  ;;  %v6538_v24 = vunpack.c.h.s8.bf16 %v6430_v39  ;;  %v6440_v39 = vld [vmem:[%s9100_s22 + $0x1a8] sm:$0xff] }
 0xb1a   : > { %7717 = vmatpush3.bf16.msra.mxu1 %v6516_v61  ;;  %7739 = vmatpush3.bf16.msra.mxu0 %v6532_v33 }
 0xb1b   : > { %7718 = vmatprep.subr.bf16.mxu1 %v6525_v40  ;;  %7740 = vmatprep.subr.bf16.mxu0 %v6541_v12  ;;  %v6439_v40 = vld [vmem:[%s9100_s22 + $0x1a0] sm:$0xff] }
 0xb1c   : > { %v6447_v12 = vld [vmem:[%s9100_s22 + $0x1e0] sm:$0xff] }
 0xb1e   : > { %7719 = vmatpush3.bf16.msra.mxu1 %v6517_v21  ;;  %7741 = vmatpush3.bf16.msra.mxu0 %v6533_v30 }
 0xb1f   : > { %7720 = vmatprep.subr.bf16.mxu1 %v6526_v8  ;;  %7742 = vmatprep.subr.bf16.mxu0 %v6542_v28 }
 0xb22   : > { %7721 = vmatpush3.bf16.msra.mxu1 %v6518_v36  ;;  %7743 = vmatpush3.bf16.msra.mxu0 %v6534_v25 }
 0xb23   : > { %7722 = vmatprep.subr.bf16.mxu1 %v6527_v53  ;;  %7744 = vmatprep.subr.bf16.mxu0 %v6543_v50  ;;  %v6555_v53 = vunpack.c.l.s8.bf16 %v6439_v40  ;;  %v6571_v50 = vunpack.c.l.s8.bf16 %v6447_v12 }
 0xb26   : > { %7723 = vmatpush3.bf16.msra.mxu1 %v6519_v47  ;;  %7745 = vmatpush3.bf16.msra.mxu0 %v6535_v20 }
 0xb27   : > { %7724 = vmatprep.subr.bf16.mxu1 %v6528_v13  ;;  %7746 = vmatprep.subr.bf16.mxu0 %v6544_v62  ;;  %v6435_v13 = vld [vmem:[%s9100_s22 + $0x180] sm:$0xff] }
 0xb28   : > { %v5969_v59 = vpop.f32.mrb[84].mxu1  ;;  %v6012_v11 = vpop.f32.mrb[72].mxu0  ;;  %v6443_v62 = vld [vmem:[%s9100_s22 + $0x1c0] sm:$0xff]  ;;  %v6547_v35 = vunpack.c.l.s8.bf16 %v6435_v13 }
 0xb29   : > { %v6199_v4 = vmul.f32 %v6146_v60, %v5969_v59  ;;  %v6201_v41 = vmul.f32 %v6154_v1, %v6012_v11  ;;  %v5971_v7 = vpop.f32.mrb[85].mxu1  ;;  %v6014_v0 = vpop.f32.mrb[73].mxu0  ;;  %v6448_v59 = vld [vmem:[%s9100_s22 + $0x1e8] sm:$0xff]  ;;  %v6548_v11 = vunpack.c.h.s8.bf16 %v6435_v13 }
 0xb2a   : > { %v6200_v38 = vmul.f32 %v6150_v48, %v5971_v7  ;;  %v6202_v31 = vmul.f32 %v6158_v2, %v6014_v0  ;;  %v5973_v54 = vpop.f32.mrb[86].mxu1  ;;  %v6016_v3 = vpop.f32.mrb[74].mxu0  ;;  %7725 = vmatpush3.bf16.msra.mxu1 %v6520_v17  ;;  %7747 = vmatpush3.bf16.msra.mxu0 %v6536_v6 }
 0xb2b   : > { %v6315_v37 = vadd.f32 %v6262_v14, %v6199_v4  ;;  %v6317_v9 = vadd.f32 %v6270_v56, %v6201_v41  ;;  %v6215_v22 = vmul.f32 %v6146_v60, %v5973_v54  ;;  %v6217_v32 = vmul.f32 %v6154_v1, %v6016_v3  ;;  %v5975_v61 = vpop.f32.mrb[87].mxu1  ;;  %v6018_v33 = vpop.f32.mrb[75].mxu0  ;;  %7726 = vmatprep.subr.bf16.mxu1 %v6529_v51  ;;  %v6436_v4 = vld [vmem:[%s9100_s22 + $0x188] sm:$0xff] }
 0xb2c   : > { %v6316_v27 = vadd.f32 %v6266_v34, %v6200_v38  ;;  %v6318_v15 = vadd.f32 %v6274_v55, %v6202_v31  ;;  %v6216_v21 = vmul.f32 %v6150_v48, %v5975_v61  ;;  %v6218_v30 = vmul.f32 %v6158_v2, %v6018_v33  ;;  %7748 = vmatprep.subr.bf16.mxu0 %v6545_v42  ;;  %v6444_v41 = vld [vmem:[%s9100_s22 + $0x1c8] sm:$0xff]  ;;  %v6441_v38 = vld [vmem:[%s9100_s22 + $0x1b0] sm:$0xff] }
 0xb2d   : > { %v6331_v8 = vadd.f32 %v6262_v14, %v6215_v22  ;;  %v6333_v28 = vadd.f32 %v6270_v56, %v6217_v32  ;;  %v6347_v49 = vmax.f32 %v6315_v37, 0.0  ;;  %v6349_v45 = vmax.f32 %v6317_v9, 0.0  ;;  %v6449_v31 = vld [vmem:[%s9100_s22 + $0x1f0] sm:$0xff] }
 0xb2e   : > { %v6332_v36 = vadd.f32 %v6266_v34, %v6216_v21  ;;  %v6334_v25 = vadd.f32 %v6274_v55, %v6218_v30  ;;  %7727 = vmatpush3.bf16.msra.mxu1 %v6521_v18  ;;  %7749 = vmatpush3.bf16.msra.mxu0 %v6537_v5  ;;  %v6348_v57 = vmax.f32 %v6316_v27, 0.0  ;;  %v6350_v60 = vmax.f32 %v6318_v15, 0.0  ;;  %v6437_v37 = vld [vmem:[%s9100_s22 + $0x190] sm:$0xff]  ;;  %v6450_v15 = vld [vmem:[%s9100_s22 + $0x1f8] sm:$0xff] }
 0xb2f   : > { %v6363_v47 = vmax.f32 %v6331_v8, 0.0  ;;  %v6365_v20 = vmax.f32 %v6333_v28, 0.0  ;;  %7728 = vmatprep.subr.bf16.mxu1 %v6530_v43  ;;  %7750 = vmatprep.subr.bf16.mxu0 %v6546_v58  ;;  %v6563_v14 = vunpack.c.l.s8.bf16 %v6443_v62  ;;  %v6556_v56 = vunpack.c.h.s8.bf16 %v6439_v40  ;;  %v6445_v9 = vld [vmem:[%s9100_s22 + $0x1d0] sm:$0xff]  ;;  %v6442_v40 = vld [vmem:[%s9100_s22 + $0x1b8] sm:$0xff] }
 0xb30   : > { %v6364_v1 = vmax.f32 %v6332_v36, 0.0  ;;  %v6366_v46 = vmax.f32 %v6334_v25, 0.0  ;;  %v6572_v51 = vunpack.c.h.s8.bf16 %v6447_v12  ;;  %v6564_v34 = vunpack.c.h.s8.bf16 %v6443_v62 }
 0xb31   : > { %v6379_v48 = vpack.c.bf16 %v6363_v47, %v6347_v49  ;;  %v6381_v2 = vpack.c.bf16 %v6365_v20, %v6349_v45  ;;  %v6557_v55 = vunpack.c.l.s8.bf16 %v6440_v39  ;;  %v6573_v42 = vunpack.c.l.s8.bf16 %v6448_v59 }
 0xb32   : > { %7729 = vmatpush3.bf16.msra.mxu1 %v6522_v10  ;;  %7751 = vmatpush3.bf16.msra.mxu0 %v6538_v24  ;;  %v6380_v17 = vpack.c.bf16 %v6364_v1, %v6348_v57  ;;  %v6382_v6 = vpack.c.bf16 %v6366_v46, %v6350_v60  ;;  %v6549_v7 = vunpack.c.l.s8.bf16 %v6436_v4  ;;  %v6565_v0 = vunpack.c.l.s8.bf16 %v6444_v41  ;;  %v6438_v10 = vld [vmem:[%s9100_s22 + $0x198] sm:$0xff] }
 0xb33   : > { %7758 = vmatprep.subr.bf16.mxu1 %v6555_v53  ;;  %7780 = vmatprep.subr.bf16.mxu0 %v6571_v50  ;;  %v6558_v18 = vunpack.c.h.s8.bf16 %v6440_v39  ;;  %v6574_v43 = vunpack.c.h.s8.bf16 %v6448_v59  ;;  %v6550_v54 = vunpack.c.h.s8.bf16 %v6436_v4  ;;  %v6566_v3 = vunpack.c.h.s8.bf16 %v6444_v41  ;;  %v6446_v53 = vld [vmem:[%s9100_s22 + $0x1d8] sm:$0xff] }
 0xb34   : > { %6775 = vmatprep.mubr.bf16.mxu1 %v6380_v17  ;;  %6816 = vmatprep.mubr.bf16.mxu0 %v6382_v6  ;;  %v6559_v5 = vunpack.c.l.s8.bf16 %v6441_v38  ;;  %v6575_v58 = vunpack.c.l.s8.bf16 %v6449_v31  ;;  %v6551_v22 = vunpack.c.l.s8.bf16 %v6437_v37  ;;  %v6567_v32 = vunpack.c.l.s8.bf16 %v6445_v9 }
 0xb35   : > { %6776 = vmatmul.mubr.bf16.vlgmr.msra.gmra.mrb[100].mxu1 %v6379_v48  ;;  %6817 = vmatmul.mubr.bf16.vlgmr.msra.gmra.mrb[88].mxu0 %v6381_v2  ;;  %v6560_v61 = vunpack.c.h.s8.bf16 %v6441_v38  ;;  %v6576_v33 = vunpack.c.h.s8.bf16 %v6449_v31  ;;  %v6162_v12 = vrot.slane %v10493_v23, %v10441_v16  ;;  %v6170_v27 = vrot.slane %v10493_v23, %v10444_v52 }
 0xb36   : > { %7759 = vmatpush3.bf16.msra.mxu1 %v6547_v35  ;;  %7781 = vmatpush3.bf16.msra.mxu0 %v6563_v14  ;;  %v6166_v21 = vrot.slane %v10493_v23, %v10447_v26  ;;  %v6174_v30 = vrot.slane %v10493_v23, %v10450_v44  ;;  %v6552_v8 = vunpack.c.h.s8.bf16 %v6437_v37  ;;  %v6568_v28 = vunpack.c.h.s8.bf16 %v6445_v9 }
 0xb37   : > { %7760 = vmatprep.subr.bf16.mxu1 %v6556_v56  ;;  %7782 = vmatprep.subr.bf16.mxu0 %v6572_v51  ;;  %v6278_v24 = vrot.slane %v10496_v19, %v10441_v16  ;;  %v6286_v36 = vrot.slane %v10496_v19, %v10444_v52  ;;  %v6561_v25 = vunpack.c.l.s8.bf16 %v6442_v40  ;;  %v6282_v45 = vrot.slane %v10496_v19, %v10447_v26 }
 0xb38   : > { %v6290_v23 = vrot.slane %v10496_v19, %v10450_v44  ;;  %v6577_v47 = vunpack.c.l.s8.bf16 %v6450_v15  ;;  %v6553_v57 = vunpack.c.l.s8.bf16 %v6438_v10  ;;  %v6562_v60 = vunpack.c.h.s8.bf16 %v6442_v40 }
 0xb39   : > { %v6569_v2 = vunpack.c.l.s8.bf16 %v6446_v53  ;;  %v6578_v17 = vunpack.c.h.s8.bf16 %v6450_v15  ;;  %v6554_v4 = vunpack.c.h.s8.bf16 %v6438_v10  ;;  %v6570_v41 = vunpack.c.h.s8.bf16 %v6446_v53 }
 0xb3a   : > { %7761 = vmatpush3.bf16.msra.mxu1 %v6548_v11  ;;  %7783 = vmatpush3.bf16.msra.mxu0 %v6564_v34 }
 0xb3b   : > { %7762 = vmatprep.subr.bf16.mxu1 %v6557_v55  ;;  %7784 = vmatprep.subr.bf16.mxu0 %v6573_v42 }
 0xb3e   : > { %7763 = vmatpush3.bf16.msra.mxu1 %v6549_v7  ;;  %7785 = vmatpush3.bf16.msra.mxu0 %v6565_v0 }
 0xb3f   : > { %7764 = vmatprep.subr.bf16.mxu1 %v6558_v18  ;;  %7786 = vmatprep.subr.bf16.mxu0 %v6574_v43 }
 0xb42   : > { %7765 = vmatpush3.bf16.msra.mxu1 %v6550_v54  ;;  %7787 = vmatpush3.bf16.msra.mxu0 %v6566_v3 }
 0xb43   : > { %7766 = vmatprep.subr.bf16.mxu1 %v6559_v5  ;;  %7788 = vmatprep.subr.bf16.mxu0 %v6575_v58 }
 0xb46   : > { %7767 = vmatpush3.bf16.msra.mxu1 %v6551_v22  ;;  %7789 = vmatpush3.bf16.msra.mxu0 %v6567_v32 }
 0xb47   : > { %7768 = vmatprep.subr.bf16.mxu1 %v6560_v61  ;;  %7790 = vmatprep.subr.bf16.mxu0 %v6576_v33 }
 0xb48   : > { %v6055_v50 = vpop.f32.mrb[88].mxu1  ;;  %v6098_v49 = vpop.f32.mrb[76].mxu0 }
 0xb49   : > { %v6203_v20 = vmul.f32 %v6162_v12, %v6055_v50  ;;  %v6205_v13 = vmul.f32 %v6170_v27, %v6098_v49  ;;  %v6057_v62 = vpop.f32.mrb[89].mxu1  ;;  %v6100_v16 = vpop.f32.mrb[77].mxu0 }
 0xb4a   : > { %v6204_v52 = vmul.f32 %v6166_v21, %v6057_v62  ;;  %v6206_v1 = vmul.f32 %v6174_v30, %v6100_v16  ;;  %v6059_v46 = vpop.f32.mrb[90].mxu1  ;;  %v6102_v48 = vpop.f32.mrb[78].mxu0  ;;  %7769 = vmatpush3.bf16.msra.mxu1 %v6552_v8  ;;  %7791 = vmatpush3.bf16.msra.mxu0 %v6568_v28 }
 0xb4b   : > { %v6319_v6 = vadd.f32 %v6278_v24, %v6203_v20  ;;  %v6321_v26 = vadd.f32 %v6286_v36, %v6205_v13  ;;  %v6219_v35 = vmul.f32 %v6162_v12, %v6059_v46  ;;  %v6221_v14 = vmul.f32 %v6170_v27, %v6102_v48  ;;  %v6061_v44 = vpop.f32.mrb[91].mxu1  ;;  %v6104_v19 = vpop.f32.mrb[79].mxu0  ;;  %7770 = vmatprep.subr.bf16.mxu1 %v6561_v25 }
 0xb4c   : > { %v6320_v56 = vadd.f32 %v6282_v45, %v6204_v52  ;;  %v6322_v51 = vadd.f32 %v6290_v23, %v6206_v1  ;;  %v6220_v39 = vmul.f32 %v6166_v21, %v6061_v44  ;;  %v6222_v59 = vmul.f32 %v6174_v30, %v6104_v19  ;;  %7792 = vmatprep.subr.bf16.mxu0 %v6577_v47 }
 0xb4d   : > { %v6335_v11 = vadd.f32 %v6278_v24, %v6219_v35  ;;  %v6337_v34 = vadd.f32 %v6286_v36, %v6221_v14  ;;  %v6351_v7 = vmax.f32 %v6319_v6, 0.0  ;;  %v6353_v0 = vmax.f32 %v6321_v26, 0.0 }
 0xb4e   : > { %v6336_v55 = vadd.f32 %v6282_v45, %v6220_v39  ;;  %v6338_v42 = vadd.f32 %v6290_v23, %v6222_v59  ;;  %7771 = vmatpush3.bf16.msra.mxu1 %v6553_v57  ;;  %7793 = vmatpush3.bf16.msra.mxu0 %v6569_v2  ;;  %v6352_v38 = vmax.f32 %v6320_v56, 0.0  ;;  %v6354_v31 = vmax.f32 %v6322_v51, 0.0 }
 0xb4f   : > { %v6367_v18 = vmax.f32 %v6335_v11, 0.0  ;;  %v6369_v43 = vmax.f32 %v6337_v34, 0.0  ;;  %7772 = vmatprep.subr.bf16.mxu1 %v6562_v60  ;;  %7794 = vmatprep.subr.bf16.mxu0 %v6578_v17 }
 0xb50   : > { %v6368_v54 = vmax.f32 %v6336_v55, 0.0  ;;  %v6370_v3 = vmax.f32 %v6338_v42, 0.0 }
 0xb51   : > { %v6383_v5 = vpack.c.bf16 %v6367_v18, %v6351_v7  ;;  %v6385_v58 = vpack.c.bf16 %v6369_v43, %v6353_v0 }
 0xb52   : > { %7773 = vmatpush3.bf16.msra.mxu1 %v6554_v4  ;;  %7795 = vmatpush3.bf16.msra.mxu0 %v6570_v41  ;;  %v6384_v37 = vpack.c.bf16 %v6368_v54, %v6352_v38  ;;  %v6386_v9 = vpack.c.bf16 %v6370_v3, %v6354_v31 }
 0xb54   : > { %6857 = vmatprep.mubr.bf16.mxu1 %v6384_v37  ;;  %6898 = vmatprep.mubr.bf16.mxu0 %v6386_v9 }
 0xb55   : > { %6858 = vmatmul.mubr.bf16.vlgmr.msra.gmra.mrb[104].mxu1 %v6383_v5  ;;  %6899 = vmatmul.mubr.bf16.vlgmr.msra.gmra.mrb[92].mxu0 %v6385_v58  ;;  %v7503_v58 = vld [vmem:[%s909_s18] ss:$0 sm:$0xff] }
 0xbc8   : > { %v7642_v22 = vpop.f32.mrb[92].mxu1  ;;  %v7664_v32 = vpop.f32.mrb[80].mxu0 }
 0xbc9   : > { %v7643_v61 = vpop.f32.mrb[93].mxu1  ;;  %v7665_v33 = vpop.f32.mrb[81].mxu0 }
 0xbca   : > { %v7644_v40 = vadd.f32 %v7643_v61, %v7642_v22  ;;  %v7666_v12 = vadd.f32 %v7665_v33, %v7664_v32  ;;  %v7645_v27 = vpop.f32.mrb[94].mxu1  ;;  %v7667_v15 = vpop.f32.mrb[82].mxu0  ;;  %v7504_v22 = vld [vmem:[%s912_s2] ss:$0 sm:$0xff] }
 0xbcb   : > { %v7646_v21 = vpop.f32.mrb[95].mxu1  ;;  %v7668_v30 = vpop.f32.mrb[83].mxu0 }
 0xbcc   : > { %v6655_v8 = vadd.f32 %v7666_v12, %v7644_v40  ;;  %v7647_v28 = vadd.f32 %v7646_v21, %v7645_v27  ;;  %v7669_v10 = vadd.f32 %v7668_v30, %v7667_v15 }
 0xbce   : > { %v6658_v24 = vadd.f32 %v7669_v10, %v7647_v28 }
 0xbe8   : > { %v7686_v36 = vpop.f32.mrb[96].mxu1  ;;  %v7708_v25 = vpop.f32.mrb[84].mxu0 }
 0xbe9   : > { %v7687_v53 = vpop.f32.mrb[97].mxu1  ;;  %v7709_v50 = vpop.f32.mrb[85].mxu0 }
 0xbea   : > { %v7688_v49 = vadd.f32 %v7687_v53, %v7686_v36  ;;  %v7710_v45 = vadd.f32 %v7709_v50, %v7708_v25  ;;  %v7689_v23 = vpop.f32.mrb[98].mxu1  ;;  %v7711_v47 = vpop.f32.mrb[86].mxu0 }
 0xbeb   : > { %v7690_v20 = vpop.f32.mrb[99].mxu1  ;;  %v7712_v13 = vpop.f32.mrb[87].mxu0 }
 0xbec   : > { %v6696_v62 = vadd.f32 %v7688_v49, %v6655_v8  ;;  %v7691_v16 = vadd.f32 %v7690_v20, %v7689_v23  ;;  %v7713_v57 = vadd.f32 %v7712_v13, %v7711_v47  ;;  %v7505_v47 = vld [vmem:[%s915_s23] ss:$0 sm:$0xff]  ;;  %s10737_s23 = sld [smem:[#allocation39_spill]] (!%p7507_p10) }
 0xbee   : > { %v6737_v60 = vadd.f32 %v7710_v45, %v6696_v62  ;;  %v6699_v52 = vadd.f32 %v7691_v16, %v6658_v24  ;;  %v7506_v62 = vld [vmem:[%s918_s21] ss:$0 sm:$0xff] }
 0xbf0   : > { %v6740_v1 = vadd.f32 %v7713_v57, %v6699_v52 }
 0xc08   : > { %v7730_v46 = vpop.f32.mrb[100].mxu1  ;;  %v7752_v48 = vpop.f32.mrb[88].mxu0 }
 0xc09   : > { %v7731_v2 = vpop.f32.mrb[101].mxu1  ;;  %v7753_v17 = vpop.f32.mrb[89].mxu0 }
 0xc0a   : > { %v7732_v6 = vadd.f32 %v7731_v2, %v7730_v46  ;;  %v7754_v26 = vadd.f32 %v7753_v17, %v7752_v48  ;;  %v7733_v35 = vpop.f32.mrb[102].mxu1  ;;  %v7755_v14 = vpop.f32.mrb[90].mxu0  ;;  %v8387_v46 = vld [vmem:[%s10737_s23] sm:$0xff] (!%p7507_p10)   ;;  %v8681_v48 = vmov (!%p7507_p10), 0.0   ;;  %v8388_v2 = vld [vmem:[%s10737_s23 + $0x8] sm:$0xff] (!%p7507_p10)  }
 0xc0b   : > { %v7734_v44 = vpop.f32.mrb[103].mxu1  ;;  %v7756_v19 = vpop.f32.mrb[91].mxu0  ;;  %8078 = vmatprep.subr.bf16.mxu0 (!%p7507_p10), %v8681_v48  ;;  %8094 = vmatprep.mubr.msk.bf16.mxu0 (!%p7507_p10), %vm8682_vm12, %v8681_v48 }
 0xc0c   : > { %v6778_v56 = vadd.f32 %v7732_v6, %v6737_v60  ;;  %v7735_v51 = vadd.f32 %v7734_v44, %v7733_v35  ;;  %v7757_v39 = vadd.f32 %v7756_v19, %v7755_v14  ;;  %8079 = vmatpush3.bf16.msra.mxu0 (!%p7507_p10), %v8387_v46  ;;  %v8389_v14 = vld [vmem:[%s10737_s23 + $0x10] sm:$0xff] (!%p7507_p10)  }
 0xc0d   : > { %8080 = vmatprep.subr.bf16.mxu0 (!%p7507_p10), %v8681_v48 }
 0xc0e   : > { %v6819_v59 = vadd.f32 %v7754_v26, %v6778_v56  ;;  %v6781_v11 = vadd.f32 %v7735_v51, %v6740_v1  ;;  %v8390_v56 = vld [vmem:[%s10737_s23 + $0x18] sm:$0xff] (!%p7507_p10)  }
 0xc10   : > { %v6822_v34 = vadd.f32 %v7757_v39, %v6781_v11  ;;  %8081 = vmatpush3.bf16.msra.mxu0 (!%p7507_p10), %v8388_v2 }
 0xc11   : > { %8082 = vmatprep.subr.bf16.mxu0 (!%p7507_p10), %v8681_v48 }
 0xc14   : > { %8083 = vmatpush3.bf16.msra.mxu0 (!%p7507_p10), %v8389_v14 }
 0xc15   : > { %8084 = vmatprep.subr.bf16.mxu0 (!%p7507_p10), %v8681_v48 }
 0xc18   : > { %8085 = vmatpush3.bf16.msra.mxu0 (!%p7507_p10), %v8390_v56 }
 0xc19   : > { %8086 = vmatprep.subr.bf16.mxu0 (!%p7507_p10), %v8681_v48 }
 0xc28   : > { %v7774_v55 = vpop.f32.mrb[104].mxu1  ;;  %v7796_v42 = vpop.f32.mrb[92].mxu0 }
 0xc29   : > { %v7775_v4 = vpop.f32.mrb[105].mxu1  ;;  %v7797_v41 = vpop.f32.mrb[93].mxu0 }
 0xc2a   : > { %v7776_v7 = vadd.f32 %v7775_v4, %v7774_v55  ;;  %v7798_v0 = vadd.f32 %v7797_v41, %v7796_v42  ;;  %v7777_v18 = vpop.f32.mrb[106].mxu1  ;;  %v7799_v43 = vpop.f32.mrb[94].mxu0  ;;  %v8392_v55 = vld [vmem:[%s10737_s23 + $0x28] sm:$0xff] (!%p7507_p10)   ;;  %v8393_v41 = vld [vmem:[%s10737_s23 + $0x30] sm:$0xff] (!%p7507_p10)  }
 0xc2b   : > { %v7778_v38 = vpop.f32.mrb[107].mxu1  ;;  %v7800_v31 = vpop.f32.mrb[95].mxu0 }
 0xc2c   : > { %v6860_v54 = vadd.f32 %v7776_v7, %v6819_v59  ;;  %v7779_v3 = vadd.f32 %v7778_v38, %v7777_v18  ;;  %v7801_v5 = vadd.f32 %v7800_v31, %v7799_v43  ;;  %v8391_v59 = vld [vmem:[%s10737_s23 + $0x20] sm:$0xff] (!%p7507_p10)   ;;  %v8394_v18 = vld [vmem:[%s10737_s23 + $0x38] sm:$0xff] (!%p7507_p10)   ;;  %v7508_v31 = vld [vmem:[#allocation13] ss:$0 sm:$0xff] (!%p7507_p10) }
 0xc2d   : > { %8087 = vmatpush3.bf16.msra.mxu0 (!%p7507_p10), %v8391_v59 }
 0xc2e   : > { %v6901_v37 = vadd.f32 %v7798_v0, %v6860_v54  ;;  %v6863_v9 = vadd.f32 %v7779_v3, %v6822_v34  ;;  %8088 = vmatprep.subr.bf16.mxu0 (!%p7507_p10), %v8681_v48 }
 0xc30   : > { %v6914_v32 = vmul.f32 %v7503_v58, %v6901_v37  ;;  %v6904_v61 = vadd.f32 %v7801_v5, %v6863_v9 }
 0xc31   : > { %8089 = vmatpush3.bf16.msra.mxu0 (!%p7507_p10), %v8392_v55 }
 0xc32   : > { %v6915_v33 = vmul.f32 %v7503_v58, %v6904_v61  ;;  %v6923_v40 = vadd.f32 %v7504_v22, %v6914_v32  ;;  %8090 = vmatprep.subr.bf16.mxu0 (!%p7507_p10), %v8681_v48 }
 0xc34   : > { %v6925_v12 = vadd.f32 %v6923_v40, %v10313_v63  ;;  %v6924_v27 = vadd.f32 %v7504_v22, %v6915_v33 }
 0xc35   : > { %8091 = vmatpush3.bf16.msra.mxu0 (!%p7507_p10), %v8393_v41 }
 0xc36   : > { %6929 = vadd.xlane.f32.xlu0 %v6925_v12  ;;  %v6926_v15 = vadd.f32 %v6924_v27, %v10315_v29  ;;  %8092 = vmatprep.subr.bf16.mxu0 (!%p7507_p10), %v8681_v48 }
 0xc38   : > { %6931 = vadd.xlane.f32.xlu1 %v6926_v15 }
 0xc39   : > { %8093 = vmatpush3.bf16.msra.mxu0 (!%p7507_p10), %v8394_v18 }
 0xcc3   : > { %v6930_v21 = vpop.xlane.xlu0 %6929 }
 0xcc4   : > { %v6933_v30 = vmul.f32 0.0078125, %v6930_v21 }
 0xcc5   : > { %v6932_v8 = vpop.xlane.xlu1 %6931 }
 0xcc6   : > { %v6935_v28 = vsub.f32 %v6925_v12, %v6933_v30  ;;  %v6934_v10 = vmul.f32 0.0078125, %v6932_v8 }
 0xcc8   : > { %v6936_v24 = vsub.f32 %v6926_v15, %v6934_v10  ;;  %v6937_v36 = vmul.f32 %v6935_v28, %v6935_v28 }
 0xcca   : > { %6939 = vadd.xlane.f32.xlu0 %v6937_v36  ;;  %v6938_v25 = vmul.f32 %v6936_v24, %v6936_v24 }
 0xccc   : > { %6941 = vadd.xlane.f32.xlu1 %v6938_v25 }
 0xd57   : > { %v6940_v53 = vpop.xlane.xlu0 %6939 }
 0xd58   : > { %v6943_v50 = vmul.f32 0.0078125, %v6940_v53 }
 0xd59   : > { %v6942_v63 = vpop.xlane.xlu1 %6941 }
 0xd5a   : > { %v6945_v49 = vadd.f32 1e-05, %v6943_v50  ;;  %v6944_v45 = vmul.f32 0.0078125, %v6942_v63 }
 0xd5c   : > { %8381 = vrsqrt.f32 %v6945_v49  ;;  %v6946_v29 = vadd.f32 1e-05, %v6944_v45 }
 0xd5e   : > { %8383 = vrsqrt.f32 %v6946_v29 }
 0xd66   : > { %v8382_v23 = vpop.eup %8381 }
 0xd67   : > { %v6949_v20 = vmul.f32 %v8382_v23, %v6935_v28 }
 0xd68   : > { %v8384_v13 = vpop.eup %8383 }
 0xd69   : > { %v6957_v16 = vmul.f32 %v7505_v47, %v6949_v20  ;;  %v6950_v57 = vmul.f32 %v8384_v13, %v6936_v24  ;;  %6972 = sbr.rel (%p7507_p10) target bundleno = 3671 (0xe57), region = 132 }
 0xd6b   : > { %v6965_v60 = vadd.f32 %v7506_v62, %v6957_v16  ;;  %v6958_v52 = vmul.f32 %v7505_v47, %v6950_v57 }
 0xd6d   : > { %6967 = vst [vmem:[#allocation2] sm:$0xff] %v6965_v60  ;;  %v6966_v1 = vadd.f32 %v7506_v62, %v6958_v52  ;;  %v6973_v17 = vrot.slane (!%p7507_p10), %v6965_v60, 4 }
 0xd6f   : > { %6968 = vst [vmem:[#allocation2 + $0x8] sm:$0xff] %v6966_v1  ;;  %v6979_v6 = vrot.slane (!%p7507_p10), %v6966_v1, 4  ;;  %v6974_v26 = vadd.f32 (!%p7507_p10), %v6973_v17, %v6965_v60 }
 0xd71   : > { %v6980_v35 = vadd.f32 %v6979_v6, %v6966_v1  ;;  %v6975_v44 = vrot.slane %v6974_v26, 2 }
 0xd73   : > { %v6981_v19 = vrot.slane %v6980_v35, 2  ;;  %v6976_v51 = vadd.f32 %v6975_v44, %v6974_v26 }
 0xd75   : > { %v6982_v39 = vadd.f32 %v6981_v19, %v6980_v35  ;;  %v6977_v11 = vrot.slane %v6976_v51, 1 }
 0xd77   : > { %v6983_v34 = vrot.slane %v6982_v39, 1  ;;  %v6978_v42 = vadd.f32 %v6977_v11, %v6976_v51 }
 0xd79   : > { %v6984_v4 = vadd.f32 %v6983_v34, %v6982_v39  ;;  %v6986_v7 = vmul.f32 0.125, %v6978_v42 }
 0xd7b   : > { %v6987_v0 = vmul.f32 0.125, %v6984_v4 }
 0xd7d   : > { %v6991_v43 = vsel %vm6990_vm13, %v6987_v0, %v6986_v7 }
 0xd7e   : > { %v7518_v38 = vpack.c.bf16 %v6991_v43, %v6991_v43 }
 0xd80   : > { %8095 = vmatmul.mubr.msk.bf16.vlgmr.msra.gmra.mrb[0].mxu0 %vm7517_vm15, %v7518_v38 }
 0xe53   : > { %v7101_v54 = vpop.f32.mrb[0].mxu0 }
 0xe54   : > { %v7102_v3 = vadd.f32 %v7508_v31, %v7101_v54  ;;  %v8096_v5 = vpop.f32.mrb[1].mxu0 }
 0xe55   : > { %v7104_v58 = vpop.f32.mrb[2].mxu0 }
 0xe56   : > { %7107 = vst [vmem:[%s10738_s13] sm:$0xff] %v7102_v3  ;;  %v8097_v37 = vpop.f32.mrb[3].mxu0 }
 0xe57 PF: > { %s10739_s21 = sld [smem:[#allocation20_spill]]  ;;  %s10740_s28 = sld [smem:[#allocation19_spill]] }
 0xe58   : > { %s10741_s20 = sld [smem:[#allocation21_spill]]  ;;  %s10742_s0 = smov %s8643_s30 }
 0xe5d   : > { %p36_p3 = scmp.ge.s32.totalorder %s10739_s21, 4   ;;  %s10743_s30 = smov %s10740_s28 }
 0xe5f   :  { %38 = sbr.rel (!%p36_p3) target bundleno = 28 (0x1c), region = 224 }
 0xe66   :  { %7119 = vsyncpa [#allocation4], 1 }
 0xe67   :  { %7121 = vsyncpa [#allocation4 + $0x1], 1 }
 0xe68   :  { %7122 = vsyncpa [#allocation6], 1 }
 0xe69   :  { %7124 = vsyncpa [#allocation6 + $0x1], 1 }
 0xe6a   :  { %7125 = vsyncpa [#allocation9], 1 }
 0xe6b   :  { %7127 = vsyncpa [#allocation9 + $0x1], 1 }
 0xe6c   :  { %7128 = vsyncpa [#allocation12], 1 }
 0xe6d   :  { %7130 = vsyncpa [#allocation12 + $0x1], 1 }

</bundles_post_ra>
